<compile_context>
chip_gen: v7x
topology: tpu7x:2x2x1
jax: 0.10.0
libtpu: 0.0.40
codegen_flags: <defaults>
</compile_context>

<pallas_src>
import math

import jax
import jax.numpy as jnp
import numpy as np
from jax import lax
from jax.experimental import pallas as pl

# ----------------------------- configuration -------------------------------
B = 2            # batch
S = 8            # sequence length == C_size
D = 32           # d_model
NHEAD = 2
HEAD_DIM = D // NHEAD
FF = 64          # dim_feedforward
N_ENC = 2        # encoder layers
N_DEC = 2        # decoder layers
EPS = 1e-5
SCALE = 1.0 / math.sqrt(HEAD_DIM)
DTYPE = jnp.float32


# ------------------------ packed parameter slab layout ----------------------
# Every parameter lives in one (SLAB_ROWS, SLAB_COLS) f32 slab.  Each piece
# starts at a row offset that is a multiple of 8 (sublane tile) and at lane 0,
# so all in-kernel reads are static, aligned slices.
def _build_layout():
    entries = []

    def add(name, rows, cols, kind):
        entries.append((name, rows, cols, kind))

    def add_attn(prefix):
        for h in range(NHEAD):
            add(f"{prefix}wq{h}", D, HEAD_DIM, "w")
            add(f"{prefix}wk{h}", D, HEAD_DIM, "w")
            add(f"{prefix}wv{h}", D, HEAD_DIM, "w")
            add(f"{prefix}wo{h}", HEAD_DIM, D, "w")
            add(f"{prefix}bq{h}", 1, HEAD_DIM, "z")
            add(f"{prefix}bk{h}", 1, HEAD_DIM, "z")
            add(f"{prefix}bv{h}", 1, HEAD_DIM, "z")
        add(f"{prefix}bo", 1, D, "z")

    def add_ffn(prefix):
        add(f"{prefix}w1", D, FF, "w")
        add(f"{prefix}bf1", 1, FF, "z")
        add(f"{prefix}w2", FF, D, "w")
        add(f"{prefix}bf2", 1, D, "z")

    def add_ln(g, b):
        add(g, 1, D, "g")
        add(b, 1, D, "z")

    for l in range(N_ENC):
        p = f"e{l}_"
        add_attn(p)
        add_ln(p + "g1", p + "b1")
        add_ffn(p)
        add_ln(p + "g2", p + "b2")
    for l in range(N_DEC):
        p = f"d{l}_"
        add_attn(p + "s")               # decoder self-attention
        add_ln(p + "g1", p + "b1")
        add_attn(p + "c")               # decoder cross-attention
        add_ln(p + "g2", p + "b2")
        add_ffn(p)
        add_ln(p + "g3", p + "b3")
    add_ln("en_g", "en_b")              # final encoder-stack norm
    add_ln("dn_g", "dn_b")              # final decoder-stack norm
    add("fc_w", S, D, "w")              # fc weight reshaped (S*D, 1) -> (S, D)
    add("fc_b", 1, 1, "z")

    layout, off = {}, 0
    for name, r, c, kind in entries:
        layout[name] = (off, r, c, kind)
        off += ((r + 7) // 8) * 8       # keep every piece 8-row aligned
    return layout, off


LAYOUT, SLAB_ROWS = _build_layout()
SLAB_COLS = FF                          # widest packed piece (ffn w1 / bf1)


# ------------------------------- fused kernel -------------------------------
def _transformer_kernel(x_ref, w_ref, o_ref):
    def P(name):
        off, r, c, _ = LAYOUT[name]
        return w_ref[off:off + r, :c]   # static, 8-row / lane-0 aligned slice

    def layer_norm(z, g, b):
        mean = jnp.mean(z, axis=-1, keepdims=True)
        var = jnp.mean(jnp.square(z - mean), axis=-1, keepdims=True)
        return (z - mean) * lax.rsqrt(var + EPS) * g + b

    def attention(xq, xkv, p):
        # Per-head weights were split on the host, so every projection output
        # starts at lane 0 (no lane-misaligned slicing).  Scores / context are
        # dot_generals batched over the batch dim.
        acc = None
        for h in range(NHEAD):          # static unroll, NHEAD == 2
            q = jnp.dot(xq, P(f"{p}wq{h}"),
                        preferred_element_type=jnp.float32) + P(f"{p}bq{h}")
            k = jnp.dot(xkv, P(f"{p}wk{h}"),
                        preferred_element_type=jnp.float32) + P(f"{p}bk{h}")
            v = jnp.dot(xkv, P(f"{p}wv{h}"),
                        preferred_element_type=jnp.float32) + P(f"{p}bv{h}")
            q3 = q.reshape(B, S, HEAD_DIM)
            k3 = k.reshape(B, S, HEAD_DIM)
            v3 = v.reshape(B, S, HEAD_DIM)
            s = jnp.einsum("bqd,bkd->bqk", q3, k3,
                           preferred_element_type=jnp.float32) * SCALE
            s = s - jnp.max(s, axis=-1, keepdims=True)
            e = jnp.exp(s)
            pr = e * pl.reciprocal(jnp.sum(e, axis=-1, keepdims=True),
                                   approx=True)
            ctx = jnp.einsum("bqk,bkd->bqd", pr, v3,
                             preferred_element_type=jnp.float32)
            out_h = jnp.dot(ctx.reshape(B * S, HEAD_DIM), P(f"{p}wo{h}"),
                            preferred_element_type=jnp.float32)
            acc = out_h if acc is None else acc + out_h
        return acc + P(f"{p}bo")

    def ffn(z, p):
        h = jnp.dot(z, P(f"{p}w1"),
                    preferred_element_type=jnp.float32) + P(f"{p}bf1")
        h = jnp.maximum(h, 0.0)
        return jnp.dot(h, P(f"{p}w2"),
                       preferred_element_type=jnp.float32) + P(f"{p}bf2")

    x = x_ref[...].astype(jnp.float32)          # (B*S, D), batch folded in

    # ------------------------- encoder stack + norm -------------------------
    mem = x
    for l in range(N_ENC):                      # static unroll over layers
        p = f"e{l}_"
        mem = layer_norm(mem + attention(mem, mem, p), P(p + "g1"), P(p + "b1"))
        mem = layer_norm(mem + ffn(mem, p), P(p + "g2"), P(p + "b2"))
    mem = layer_norm(mem, P("en_g"), P("en_b"))

    # ------------------------- decoder stack + norm -------------------------
    out = x                                     # tgt == src in this model
    for l in range(N_DEC):
        p = f"d{l}_"
        out = layer_norm(out + attention(out, out, p + "s"),
                         P(p + "g1"), P(p + "b1"))
        out = layer_norm(out + attention(out, mem, p + "c"),
                         P(p + "g2"), P(p + "b2"))
        out = layer_norm(out + ffn(out, p), P(p + "g3"), P(p + "b3"))
    out = layer_norm(out, P("dn_g"), P("dn_b"))

    # ---------------- flatten + fc as a VPU multiply-reduce -----------------
    # flatten(out_b) @ fc_w == sum_{s,d} out[b,s,d] * fc_w[s,d]
    prod = out.reshape(B, S, D) * P("fc_w")          # (B,S,D) * (S,D)
    val = jnp.sum(prod, axis=-1)                     # (B, S)
    val = jnp.sum(val, axis=-1, keepdims=True)       # (B, 1)
    o_ref[...] = (val + P("fc_b")).astype(o_ref.dtype)


# --------------------------------- wrapper -----------------------------------
def transformer_forward(x, slab):
    x2 = x.reshape(B * S, D).astype(DTYPE)           # fold batch on the host
    cost = pl.CostEstimate(
        flops=1_600_000,
        transcendentals=2_048,
        bytes_accessed=SLAB_ROWS * SLAB_COLS * 4 + B * S * D * 4 + B * 4,
    )
    out = pl.pallas_call(
        _transformer_kernel,
        out_shape=jax.ShapeDtypeStruct((B, 1), DTYPE),
        cost_estimate=cost,
    )(x2, slab)
    return out                                       # (B, 1)


# --------------------------- deterministic init ------------------------------
def init_slab(key):
    slab = np.zeros((SLAB_ROWS, SLAB_COLS), np.float32)
    keys = jax.random.split(key, len(LAYOUT))
    for (name, (off, r, c, kind)), k in zip(LAYOUT.items(), keys):
        if kind == "w":
            w = jax.random.normal(k, (r, c), jnp.float32) * 0.05
            slab[off:off + r, :c] = np.asarray(w)
        elif kind == "g":
            slab[off:off + r, :c] = 1.0
        # kind == "z": stays zero (attention/FFN biases, LN offsets, fc bias)
    return jnp.asarray(slab)


# --------------------------------- main --------------------------------------
if __name__ == "__main__":
    key = jax.random.PRNGKey(0)
    k_x, k_p = jax.random.split(key)
    x = jax.random.normal(k_x, (B, S, D), DTYPE)
    slab = init_slab(k_p)

    out = jax.jit(transformer_forward)(x, slab)
    out = jax.block_until_ready(out)
    assert out.shape == (B, 1), out.shape
    assert bool(jnp.all(jnp.isfinite(out))), "non-finite output"
    print("KERNEL_OK")
</pallas_src>

<mosaic_0001>
module attributes {stable_mosaic.version = 11 : i64} {
  func.func @_transformer_kernel(%arg0: memref<16x32xf32, #tpu.memory_space<vmem>>, %arg1: memref<2336x64xf32, #tpu.memory_space<vmem>>, %arg2: memref<2x1xf32, #tpu.memory_space<vmem>>) attributes {dimension_semantics = [], scalar_prefetch = 0 : i64, scratch_operands = 0 : i64, tpu.core_type = #tpu.core_type<tc>} {
    %c0 = arith.constant 0 : index
    %c0_0 = arith.constant 0 : index
    %0 = vector.load %arg0[%c0, %c0_0] : memref<16x32xf32, #tpu.memory_space<vmem>>, vector<16x32xf32>
    %c0_1 = arith.constant 0 : index
    %c0_2 = arith.constant 0 : index
    %1 = vector.load %arg1[%c0_1, %c0_2] : memref<2336x64xf32, #tpu.memory_space<vmem>>, vector<32x16xf32>
    %cst = arith.constant dense<0.000000e+00> : vector<16x16xf32>
    %2 = tpu.matmul %0, %1, %cst {dimension_numbers = #tpu.dot_dimension_numbers<[1], [0], [0], [1], [0, 0, 1, 1], [], []>} : vector<16x32xf32>, vector<32x16xf32>, vector<16x16xf32> -> vector<16x16xf32>
    %c112 = arith.constant 112 : index
    %c0_3 = arith.constant 0 : index
    %3 = vector.load %arg1[%c112, %c0_3] : memref<2336x64xf32, #tpu.memory_space<vmem>>, vector<1x16xf32>
    %4 = vector.broadcast %3 : vector<1x16xf32> to vector<16x16xf32>
    %5 = arith.addf %2, %4 : vector<16x16xf32>
    %c32 = arith.constant 32 : index
    %c0_4 = arith.constant 0 : index
    %6 = vector.load %arg1[%c32, %c0_4] : memref<2336x64xf32, #tpu.memory_space<vmem>>, vector<32x16xf32>
    %cst_5 = arith.constant dense<0.000000e+00> : vector<16x16xf32>
    %7 = tpu.matmul %0, %6, %cst_5 {dimension_numbers = #tpu.dot_dimension_numbers<[1], [0], [0], [1], [0, 0, 1, 1], [], []>} : vector<16x32xf32>, vector<32x16xf32>, vector<16x16xf32> -> vector<16x16xf32>
    %c120 = arith.constant 120 : index
    %c0_6 = arith.constant 0 : index
    %8 = vector.load %arg1[%c120, %c0_6] : memref<2336x64xf32, #tpu.memory_space<vmem>>, vector<1x16xf32>
    %9 = vector.broadcast %8 : vector<1x16xf32> to vector<16x16xf32>
    %10 = arith.addf %7, %9 : vector<16x16xf32>
    %c64 = arith.constant 64 : index
    %c0_7 = arith.constant 0 : index
    %11 = vector.load %arg1[%c64, %c0_7] : memref<2336x64xf32, #tpu.memory_space<vmem>>, vector<32x16xf32>
    %cst_8 = arith.constant dense<0.000000e+00> : vector<16x16xf32>
    %12 = tpu.matmul %0, %11, %cst_8 {dimension_numbers = #tpu.dot_dimension_numbers<[1], [0], [0], [1], [0, 0, 1, 1], [], []>} : vector<16x32xf32>, vector<32x16xf32>, vector<16x16xf32> -> vector<16x16xf32>
    %c128 = arith.constant 128 : index
    %c0_9 = arith.constant 0 : index
    %13 = vector.load %arg1[%c128, %c0_9] : memref<2336x64xf32, #tpu.memory_space<vmem>>, vector<1x16xf32>
    %14 = vector.broadcast %13 : vector<1x16xf32> to vector<16x16xf32>
    %15 = arith.addf %12, %14 : vector<16x16xf32>
    %16 = vector.shape_cast %5 : vector<16x16xf32> to vector<2x8x16xf32>
    %17 = vector.shape_cast %10 : vector<16x16xf32> to vector<2x8x16xf32>
    %18 = vector.shape_cast %15 : vector<16x16xf32> to vector<2x8x16xf32>
    "tpu.trace_start"() <{level = 10 : i32, message = "bqd,bkd->bqk"}> : () -> ()
    %cst_10 = arith.constant dense<0.000000e+00> : vector<2x8x8xf32>
    %19 = tpu.matmul %16, %17, %cst_10 {dimension_numbers = #tpu.dot_dimension_numbers<[2], [2], [1], [1], [0, 0, 0, 1, 1, 1], [0], [0]>} : vector<2x8x16xf32>, vector<2x8x16xf32>, vector<2x8x8xf32> -> vector<2x8x8xf32>
    "tpu.trace_stop"() : () -> ()
    %cst_11 = arith.constant 2.500000e-01 : f32
    %20 = vector.broadcast %cst_11 : f32 to vector<2x8x8xf32>
    %21 = arith.mulf %19, %20 : vector<2x8x8xf32>
    %cst_12 = arith.constant dense<0xFF800000> : vector<2x8xf32>
    %22 = vector.multi_reduction <maximumf>, %21, %cst_12 [2] : vector<2x8x8xf32> to vector<2x8xf32>
    %23 = vector.shape_cast %22 : vector<2x8xf32> to vector<2x8x1xf32>
    %24 = vector.broadcast %23 : vector<2x8x1xf32> to vector<2x8x8xf32>
    %25 = arith.subf %21, %24 : vector<2x8x8xf32>
    %26 = math.exp %25 : vector<2x8x8xf32>
    %cst_13 = arith.constant dense<0.000000e+00> : vector<2x8xf32>
    %27 = vector.multi_reduction <add>, %26, %cst_13 [2] : vector<2x8x8xf32> to vector<2x8xf32>
    %28 = vector.shape_cast %27 : vector<2x8xf32> to vector<2x8x1xf32>
    %29 = tpu.reciprocal %28 {approx = true} : vector<2x8x1xf32> -> vector<2x8x1xf32>
    %30 = vector.broadcast %29 : vector<2x8x1xf32> to vector<2x8x8xf32>
    %31 = arith.mulf %26, %30 : vector<2x8x8xf32>
    "tpu.trace_start"() <{level = 10 : i32, message = "bqk,bkd->bqd"}> : () -> ()
    %cst_14 = arith.constant dense<0.000000e+00> : vector<2x8x16xf32>
    %32 = tpu.matmul %31, %18, %cst_14 {dimension_numbers = #tpu.dot_dimension_numbers<[2], [1], [1], [2], [0, 0, 0, 1, 1, 2], [0], [0]>} : vector<2x8x8xf32>, vector<2x8x16xf32>, vector<2x8x16xf32> -> vector<2x8x16xf32>
    "tpu.trace_stop"() : () -> ()
    %33 = vector.shape_cast %32 : vector<2x8x16xf32> to vector<16x16xf32>
    %c96 = arith.constant 96 : index
    %c0_15 = arith.constant 0 : index
    %34 = vector.load %arg1[%c96, %c0_15] : memref<2336x64xf32, #tpu.memory_space<vmem>>, vector<16x32xf32>
    %cst_16 = arith.constant dense<0.000000e+00> : vector<16x32xf32>
    %35 = tpu.matmul %33, %34, %cst_16 {dimension_numbers = #tpu.dot_dimension_numbers<[1], [0], [0], [1], [0, 0, 1, 1], [], []>} : vector<16x16xf32>, vector<16x32xf32>, vector<16x32xf32> -> vector<16x32xf32>
    %c136 = arith.constant 136 : index
    %c0_17 = arith.constant 0 : index
    %36 = vector.load %arg1[%c136, %c0_17] : memref<2336x64xf32, #tpu.memory_space<vmem>>, vector<32x16xf32>
    %cst_18 = arith.constant dense<0.000000e+00> : vector<16x16xf32>
    %37 = tpu.matmul %0, %36, %cst_18 {dimension_numbers = #tpu.dot_dimension_numbers<[1], [0], [0], [1], [0, 0, 1, 1], [], []>} : vector<16x32xf32>, vector<32x16xf32>, vector<16x16xf32> -> vector<16x16xf32>
    %c248 = arith.constant 248 : index
    %c0_19 = arith.constant 0 : index
    %38 = vector.load %arg1[%c248, %c0_19] : memref<2336x64xf32, #tpu.memory_space<vmem>>, vector<1x16xf32>
    %39 = vector.broadcast %38 : vector<1x16xf32> to vector<16x16xf32>
    %40 = arith.addf %37, %39 : vector<16x16xf32>
    %c168 = arith.constant 168 : index
    %c0_20 = arith.constant 0 : index
    %41 = vector.load %arg1[%c168, %c0_20] : memref<2336x64xf32, #tpu.memory_space<vmem>>, vector<32x16xf32>
    %cst_21 = arith.constant dense<0.000000e+00> : vector<16x16xf32>
    %42 = tpu.matmul %0, %41, %cst_21 {dimension_numbers = #tpu.dot_dimension_numbers<[1], [0], [0], [1], [0, 0, 1, 1], [], []>} : vector<16x32xf32>, vector<32x16xf32>, vector<16x16xf32> -> vector<16x16xf32>
    %c256 = arith.constant 256 : index
    %c0_22 = arith.constant 0 : index
    %43 = vector.load %arg1[%c256, %c0_22] : memref<2336x64xf32, #tpu.memory_space<vmem>>, vector<1x16xf32>
    %44 = vector.broadcast %43 : vector<1x16xf32> to vector<16x16xf32>
    %45 = arith.addf %42, %44 : vector<16x16xf32>
    %c200 = arith.constant 200 : index
    %c0_23 = arith.constant 0 : index
    %46 = vector.load %arg1[%c200, %c0_23] : memref<2336x64xf32, #tpu.memory_space<vmem>>, vector<32x16xf32>
    %cst_24 = arith.constant dense<0.000000e+00> : vector<16x16xf32>
    %47 = tpu.matmul %0, %46, %cst_24 {dimension_numbers = #tpu.dot_dimension_numbers<[1], [0], [0], [1], [0, 0, 1, 1], [], []>} : vector<16x32xf32>, vector<32x16xf32>, vector<16x16xf32> -> vector<16x16xf32>
    %c264 = arith.constant 264 : index
    %c0_25 = arith.constant 0 : index
    %48 = vector.load %arg1[%c264, %c0_25] : memref<2336x64xf32, #tpu.memory_space<vmem>>, vector<1x16xf32>
    %49 = vector.broadcast %48 : vector<1x16xf32> to vector<16x16xf32>
    %50 = arith.addf %47, %49 : vector<16x16xf32>
    %51 = vector.shape_cast %40 : vector<16x16xf32> to vector<2x8x16xf32>
    %52 = vector.shape_cast %45 : vector<16x16xf32> to vector<2x8x16xf32>
    %53 = vector.shape_cast %50 : vector<16x16xf32> to vector<2x8x16xf32>
    "tpu.trace_start"() <{level = 10 : i32, message = "bqd,bkd->bqk"}> : () -> ()
    %cst_26 = arith.constant dense<0.000000e+00> : vector<2x8x8xf32>
    %54 = tpu.matmul %51, %52, %cst_26 {dimension_numbers = #tpu.dot_dimension_numbers<[2], [2], [1], [1], [0, 0, 0, 1, 1, 1], [0], [0]>} : vector<2x8x16xf32>, vector<2x8x16xf32>, vector<2x8x8xf32> -> vector<2x8x8xf32>
    "tpu.trace_stop"() : () -> ()
    %cst_27 = arith.constant 2.500000e-01 : f32
    %55 = vector.broadcast %cst_27 : f32 to vector<2x8x8xf32>
    %56 = arith.mulf %54, %55 : vector<2x8x8xf32>
    %cst_28 = arith.constant dense<0xFF800000> : vector<2x8xf32>
    %57 = vector.multi_reduction <maximumf>, %56, %cst_28 [2] : vector<2x8x8xf32> to vector<2x8xf32>
    %58 = vector.shape_cast %57 : vector<2x8xf32> to vector<2x8x1xf32>
    %59 = vector.broadcast %58 : vector<2x8x1xf32> to vector<2x8x8xf32>
    %60 = arith.subf %56, %59 : vector<2x8x8xf32>
    %61 = math.exp %60 : vector<2x8x8xf32>
    %cst_29 = arith.constant dense<0.000000e+00> : vector<2x8xf32>
    %62 = vector.multi_reduction <add>, %61, %cst_29 [2] : vector<2x8x8xf32> to vector<2x8xf32>
    %63 = vector.shape_cast %62 : vector<2x8xf32> to vector<2x8x1xf32>
    %64 = tpu.reciprocal %63 {approx = true} : vector<2x8x1xf32> -> vector<2x8x1xf32>
    %65 = vector.broadcast %64 : vector<2x8x1xf32> to vector<2x8x8xf32>
    %66 = arith.mulf %61, %65 : vector<2x8x8xf32>
    "tpu.trace_start"() <{level = 10 : i32, message = "bqk,bkd->bqd"}> : () -> ()
    %cst_30 = arith.constant dense<0.000000e+00> : vector<2x8x16xf32>
    %67 = tpu.matmul %66, %53, %cst_30 {dimension_numbers = #tpu.dot_dimension_numbers<[2], [1], [1], [2], [0, 0, 0, 1, 1, 2], [0], [0]>} : vector<2x8x8xf32>, vector<2x8x16xf32>, vector<2x8x16xf32> -> vector<2x8x16xf32>
    "tpu.trace_stop"() : () -> ()
    %68 = vector.shape_cast %67 : vector<2x8x16xf32> to vector<16x16xf32>
    %c232 = arith.constant 232 : index
    %c0_31 = arith.constant 0 : index
    %69 = vector.load %arg1[%c232, %c0_31] : memref<2336x64xf32, #tpu.memory_space<vmem>>, vector<16x32xf32>
    %cst_32 = arith.constant dense<0.000000e+00> : vector<16x32xf32>
    %70 = tpu.matmul %68, %69, %cst_32 {dimension_numbers = #tpu.dot_dimension_numbers<[1], [0], [0], [1], [0, 0, 1, 1], [], []>} : vector<16x16xf32>, vector<16x32xf32>, vector<16x32xf32> -> vector<16x32xf32>
    %71 = arith.addf %35, %70 : vector<16x32xf32>
    %c272 = arith.constant 272 : index
    %c0_33 = arith.constant 0 : index
    %72 = vector.load %arg1[%c272, %c0_33] : memref<2336x64xf32, #tpu.memory_space<vmem>>, vector<1x32xf32>
    %73 = vector.broadcast %72 : vector<1x32xf32> to vector<16x32xf32>
    %74 = arith.addf %71, %73 : vector<16x32xf32>
    %75 = arith.addf %0, %74 : vector<16x32xf32>
    %c280 = arith.constant 280 : index
    %c0_34 = arith.constant 0 : index
    %76 = vector.load %arg1[%c280, %c0_34] : memref<2336x64xf32, #tpu.memory_space<vmem>>, vector<1x32xf32>
    %c288 = arith.constant 288 : index
    %c0_35 = arith.constant 0 : index
    %77 = vector.load %arg1[%c288, %c0_35] : memref<2336x64xf32, #tpu.memory_space<vmem>>, vector<1x32xf32>
    %cst_36 = arith.constant dense<0.000000e+00> : vector<16xf32>
    %78 = vector.multi_reduction <add>, %75, %cst_36 [1] : vector<16x32xf32> to vector<16xf32>
    %79 = vector.shape_cast %78 : vector<16xf32> to vector<16x1xf32>
    %cst_37 = arith.constant 3.200000e+01 : f32
    %80 = vector.broadcast %cst_37 : f32 to vector<16x1xf32>
    %81 = arith.divf %79, %80 : vector<16x1xf32>
    %82 = vector.broadcast %81 : vector<16x1xf32> to vector<16x32xf32>
    %83 = arith.subf %75, %82 : vector<16x32xf32>
    %84 = arith.mulf %83, %83 : vector<16x32xf32>
    %cst_38 = arith.constant dense<0.000000e+00> : vector<16xf32>
    %85 = vector.multi_reduction <add>, %84, %cst_38 [1] : vector<16x32xf32> to vector<16xf32>
    %86 = vector.shape_cast %85 : vector<16xf32> to vector<16x1xf32>
    %cst_39 = arith.constant 3.200000e+01 : f32
    %87 = vector.broadcast %cst_39 : f32 to vector<16x1xf32>
    %88 = arith.divf %86, %87 : vector<16x1xf32>
    %89 = vector.broadcast %81 : vector<16x1xf32> to vector<16x32xf32>
    %90 = arith.subf %75, %89 : vector<16x32xf32>
    %cst_40 = arith.constant 9.99999974E-6 : f32
    %91 = vector.broadcast %cst_40 : f32 to vector<16x1xf32>
    %92 = arith.addf %88, %91 : vector<16x1xf32>
    %93 = math.rsqrt %92 : vector<16x1xf32>
    %94 = vector.broadcast %93 : vector<16x1xf32> to vector<16x32xf32>
    %95 = arith.mulf %90, %94 : vector<16x32xf32>
    %96 = vector.broadcast %76 : vector<1x32xf32> to vector<16x32xf32>
    %97 = arith.mulf %95, %96 : vector<16x32xf32>
    %98 = vector.broadcast %77 : vector<1x32xf32> to vector<16x32xf32>
    %99 = arith.addf %97, %98 : vector<16x32xf32>
    %c296 = arith.constant 296 : index
    %c0_41 = arith.constant 0 : index
    %100 = vector.load %arg1[%c296, %c0_41] : memref<2336x64xf32, #tpu.memory_space<vmem>>, vector<32x64xf32>
    %cst_42 = arith.constant dense<0.000000e+00> : vector<16x64xf32>
    %101 = tpu.matmul %99, %100, %cst_42 {dimension_numbers = #tpu.dot_dimension_numbers<[1], [0], [0], [1], [0, 0, 1, 1], [], []>} : vector<16x32xf32>, vector<32x64xf32>, vector<16x64xf32> -> vector<16x64xf32>
    %c328 = arith.constant 328 : index
    %c0_43 = arith.constant 0 : index
    %102 = vector.load %arg1[%c328, %c0_43] : memref<2336x64xf32, #tpu.memory_space<vmem>>, vector<1x64xf32>
    %103 = vector.broadcast %102 : vector<1x64xf32> to vector<16x64xf32>
    %104 = arith.addf %101, %103 : vector<16x64xf32>
    %cst_44 = arith.constant 0.000000e+00 : f32
    %105 = vector.broadcast %cst_44 : f32 to vector<16x64xf32>
    %106 = arith.maximumf %104, %105 : vector<16x64xf32>
    %c336 = arith.constant 336 : index
    %c0_45 = arith.constant 0 : index
    %107 = vector.load %arg1[%c336, %c0_45] : memref<2336x64xf32, #tpu.memory_space<vmem>>, vector<64x32xf32>
    %cst_46 = arith.constant dense<0.000000e+00> : vector<16x32xf32>
    %108 = tpu.matmul %106, %107, %cst_46 {dimension_numbers = #tpu.dot_dimension_numbers<[1], [0], [0], [1], [0, 0, 1, 1], [], []>} : vector<16x64xf32>, vector<64x32xf32>, vector<16x32xf32> -> vector<16x32xf32>
    %c400 = arith.constant 400 : index
    %c0_47 = arith.constant 0 : index
    %109 = vector.load %arg1[%c400, %c0_47] : memref<2336x64xf32, #tpu.memory_space<vmem>>, vector<1x32xf32>
    %110 = vector.broadcast %109 : vector<1x32xf32> to vector<16x32xf32>
    %111 = arith.addf %108, %110 : vector<16x32xf32>
    %112 = arith.addf %99, %111 : vector<16x32xf32>
    %c408 = arith.constant 408 : index
    %c0_48 = arith.constant 0 : index
    %113 = vector.load %arg1[%c408, %c0_48] : memref<2336x64xf32, #tpu.memory_space<vmem>>, vector<1x32xf32>
    %c416 = arith.constant 416 : index
    %c0_49 = arith.constant 0 : index
    %114 = vector.load %arg1[%c416, %c0_49] : memref<2336x64xf32, #tpu.memory_space<vmem>>, vector<1x32xf32>
    %cst_50 = arith.constant dense<0.000000e+00> : vector<16xf32>
    %115 = vector.multi_reduction <add>, %112, %cst_50 [1] : vector<16x32xf32> to vector<16xf32>
    %116 = vector.shape_cast %115 : vector<16xf32> to vector<16x1xf32>
    %cst_51 = arith.constant 3.200000e+01 : f32
    %117 = vector.broadcast %cst_51 : f32 to vector<16x1xf32>
    %118 = arith.divf %116, %117 : vector<16x1xf32>
    %119 = vector.broadcast %118 : vector<16x1xf32> to vector<16x32xf32>
    %120 = arith.subf %112, %119 : vector<16x32xf32>
    %121 = arith.mulf %120, %120 : vector<16x32xf32>
    %cst_52 = arith.constant dense<0.000000e+00> : vector<16xf32>
    %122 = vector.multi_reduction <add>, %121, %cst_52 [1] : vector<16x32xf32> to vector<16xf32>
    %123 = vector.shape_cast %122 : vector<16xf32> to vector<16x1xf32>
    %cst_53 = arith.constant 3.200000e+01 : f32
    %124 = vector.broadcast %cst_53 : f32 to vector<16x1xf32>
    %125 = arith.divf %123, %124 : vector<16x1xf32>
    %126 = vector.broadcast %118 : vector<16x1xf32> to vector<16x32xf32>
    %127 = arith.subf %112, %126 : vector<16x32xf32>
    %cst_54 = arith.constant 9.99999974E-6 : f32
    %128 = vector.broadcast %cst_54 : f32 to vector<16x1xf32>
    %129 = arith.addf %125, %128 : vector<16x1xf32>
    %130 = math.rsqrt %129 : vector<16x1xf32>
    %131 = vector.broadcast %130 : vector<16x1xf32> to vector<16x32xf32>
    %132 = arith.mulf %127, %131 : vector<16x32xf32>
    %133 = vector.broadcast %113 : vector<1x32xf32> to vector<16x32xf32>
    %134 = arith.mulf %132, %133 : vector<16x32xf32>
    %135 = vector.broadcast %114 : vector<1x32xf32> to vector<16x32xf32>
    %136 = arith.addf %134, %135 : vector<16x32xf32>
    %c424 = arith.constant 424 : index
    %c0_55 = arith.constant 0 : index
    %137 = vector.load %arg1[%c424, %c0_55] : memref<2336x64xf32, #tpu.memory_space<vmem>>, vector<32x16xf32>
    %cst_56 = arith.constant dense<0.000000e+00> : vector<16x16xf32>
    %138 = tpu.matmul %136, %137, %cst_56 {dimension_numbers = #tpu.dot_dimension_numbers<[1], [0], [0], [1], [0, 0, 1, 1], [], []>} : vector<16x32xf32>, vector<32x16xf32>, vector<16x16xf32> -> vector<16x16xf32>
    %c536 = arith.constant 536 : index
    %c0_57 = arith.constant 0 : index
    %139 = vector.load %arg1[%c536, %c0_57] : memref<2336x64xf32, #tpu.memory_space<vmem>>, vector<1x16xf32>
    %140 = vector.broadcast %139 : vector<1x16xf32> to vector<16x16xf32>
    %141 = arith.addf %138, %140 : vector<16x16xf32>
    %c456 = arith.constant 456 : index
    %c0_58 = arith.constant 0 : index
    %142 = vector.load %arg1[%c456, %c0_58] : memref<2336x64xf32, #tpu.memory_space<vmem>>, vector<32x16xf32>
    %cst_59 = arith.constant dense<0.000000e+00> : vector<16x16xf32>
    %143 = tpu.matmul %136, %142, %cst_59 {dimension_numbers = #tpu.dot_dimension_numbers<[1], [0], [0], [1], [0, 0, 1, 1], [], []>} : vector<16x32xf32>, vector<32x16xf32>, vector<16x16xf32> -> vector<16x16xf32>
    %c544 = arith.constant 544 : index
    %c0_60 = arith.constant 0 : index
    %144 = vector.load %arg1[%c544, %c0_60] : memref<2336x64xf32, #tpu.memory_space<vmem>>, vector<1x16xf32>
    %145 = vector.broadcast %144 : vector<1x16xf32> to vector<16x16xf32>
    %146 = arith.addf %143, %145 : vector<16x16xf32>
    %c488 = arith.constant 488 : index
    %c0_61 = arith.constant 0 : index
    %147 = vector.load %arg1[%c488, %c0_61] : memref<2336x64xf32, #tpu.memory_space<vmem>>, vector<32x16xf32>
    %cst_62 = arith.constant dense<0.000000e+00> : vector<16x16xf32>
    %148 = tpu.matmul %136, %147, %cst_62 {dimension_numbers = #tpu.dot_dimension_numbers<[1], [0], [0], [1], [0, 0, 1, 1], [], []>} : vector<16x32xf32>, vector<32x16xf32>, vector<16x16xf32> -> vector<16x16xf32>
    %c552 = arith.constant 552 : index
    %c0_63 = arith.constant 0 : index
    %149 = vector.load %arg1[%c552, %c0_63] : memref<2336x64xf32, #tpu.memory_space<vmem>>, vector<1x16xf32>
    %150 = vector.broadcast %149 : vector<1x16xf32> to vector<16x16xf32>
    %151 = arith.addf %148, %150 : vector<16x16xf32>
    %152 = vector.shape_cast %141 : vector<16x16xf32> to vector<2x8x16xf32>
    %153 = vector.shape_cast %146 : vector<16x16xf32> to vector<2x8x16xf32>
    %154 = vector.shape_cast %151 : vector<16x16xf32> to vector<2x8x16xf32>
    "tpu.trace_start"() <{level = 10 : i32, message = "bqd,bkd->bqk"}> : () -> ()
    %cst_64 = arith.constant dense<0.000000e+00> : vector<2x8x8xf32>
    %155 = tpu.matmul %152, %153, %cst_64 {dimension_numbers = #tpu.dot_dimension_numbers<[2], [2], [1], [1], [0, 0, 0, 1, 1, 1], [0], [0]>} : vector<2x8x16xf32>, vector<2x8x16xf32>, vector<2x8x8xf32> -> vector<2x8x8xf32>
    "tpu.trace_stop"() : () -> ()
    %cst_65 = arith.constant 2.500000e-01 : f32
    %156 = vector.broadcast %cst_65 : f32 to vector<2x8x8xf32>
    %157 = arith.mulf %155, %156 : vector<2x8x8xf32>
    %cst_66 = arith.constant dense<0xFF800000> : vector<2x8xf32>
    %158 = vector.multi_reduction <maximumf>, %157, %cst_66 [2] : vector<2x8x8xf32> to vector<2x8xf32>
    %159 = vector.shape_cast %158 : vector<2x8xf32> to vector<2x8x1xf32>
    %160 = vector.broadcast %159 : vector<2x8x1xf32> to vector<2x8x8xf32>
    %161 = arith.subf %157, %160 : vector<2x8x8xf32>
    %162 = math.exp %161 : vector<2x8x8xf32>
    %cst_67 = arith.constant dense<0.000000e+00> : vector<2x8xf32>
    %163 = vector.multi_reduction <add>, %162, %cst_67 [2] : vector<2x8x8xf32> to vector<2x8xf32>
    %164 = vector.shape_cast %163 : vector<2x8xf32> to vector<2x8x1xf32>
    %165 = tpu.reciprocal %164 {approx = true} : vector<2x8x1xf32> -> vector<2x8x1xf32>
    %166 = vector.broadcast %165 : vector<2x8x1xf32> to vector<2x8x8xf32>
    %167 = arith.mulf %162, %166 : vector<2x8x8xf32>
    "tpu.trace_start"() <{level = 10 : i32, message = "bqk,bkd->bqd"}> : () -> ()
    %cst_68 = arith.constant dense<0.000000e+00> : vector<2x8x16xf32>
    %168 = tpu.matmul %167, %154, %cst_68 {dimension_numbers = #tpu.dot_dimension_numbers<[2], [1], [1], [2], [0, 0, 0, 1, 1, 2], [0], [0]>} : vector<2x8x8xf32>, vector<2x8x16xf32>, vector<2x8x16xf32> -> vector<2x8x16xf32>
    "tpu.trace_stop"() : () -> ()
    %169 = vector.shape_cast %168 : vector<2x8x16xf32> to vector<16x16xf32>
    %c520 = arith.constant 520 : index
    %c0_69 = arith.constant 0 : index
    %170 = vector.load %arg1[%c520, %c0_69] : memref<2336x64xf32, #tpu.memory_space<vmem>>, vector<16x32xf32>
    %cst_70 = arith.constant dense<0.000000e+00> : vector<16x32xf32>
    %171 = tpu.matmul %169, %170, %cst_70 {dimension_numbers = #tpu.dot_dimension_numbers<[1], [0], [0], [1], [0, 0, 1, 1], [], []>} : vector<16x16xf32>, vector<16x32xf32>, vector<16x32xf32> -> vector<16x32xf32>
    %c560 = arith.constant 560 : index
    %c0_71 = arith.constant 0 : index
    %172 = vector.load %arg1[%c560, %c0_71] : memref<2336x64xf32, #tpu.memory_space<vmem>>, vector<32x16xf32>
    %cst_72 = arith.constant dense<0.000000e+00> : vector<16x16xf32>
    %173 = tpu.matmul %136, %172, %cst_72 {dimension_numbers = #tpu.dot_dimension_numbers<[1], [0], [0], [1], [0, 0, 1, 1], [], []>} : vector<16x32xf32>, vector<32x16xf32>, vector<16x16xf32> -> vector<16x16xf32>
    %c672 = arith.constant 672 : index
    %c0_73 = arith.constant 0 : index
    %174 = vector.load %arg1[%c672, %c0_73] : memref<2336x64xf32, #tpu.memory_space<vmem>>, vector<1x16xf32>
    %175 = vector.broadcast %174 : vector<1x16xf32> to vector<16x16xf32>
    %176 = arith.addf %173, %175 : vector<16x16xf32>
    %c592 = arith.constant 592 : index
    %c0_74 = arith.constant 0 : index
    %177 = vector.load %arg1[%c592, %c0_74] : memref<2336x64xf32, #tpu.memory_space<vmem>>, vector<32x16xf32>
    %cst_75 = arith.constant dense<0.000000e+00> : vector<16x16xf32>
    %178 = tpu.matmul %136, %177, %cst_75 {dimension_numbers = #tpu.dot_dimension_numbers<[1], [0], [0], [1], [0, 0, 1, 1], [], []>} : vector<16x32xf32>, vector<32x16xf32>, vector<16x16xf32> -> vector<16x16xf32>
    %c680 = arith.constant 680 : index
    %c0_76 = arith.constant 0 : index
    %179 = vector.load %arg1[%c680, %c0_76] : memref<2336x64xf32, #tpu.memory_space<vmem>>, vector<1x16xf32>
    %180 = vector.broadcast %179 : vector<1x16xf32> to vector<16x16xf32>
    %181 = arith.addf %178, %180 : vector<16x16xf32>
    %c624 = arith.constant 624 : index
    %c0_77 = arith.constant 0 : index
    %182 = vector.load %arg1[%c624, %c0_77] : memref<2336x64xf32, #tpu.memory_space<vmem>>, vector<32x16xf32>
    %cst_78 = arith.constant dense<0.000000e+00> : vector<16x16xf32>
    %183 = tpu.matmul %136, %182, %cst_78 {dimension_numbers = #tpu.dot_dimension_numbers<[1], [0], [0], [1], [0, 0, 1, 1], [], []>} : vector<16x32xf32>, vector<32x16xf32>, vector<16x16xf32> -> vector<16x16xf32>
    %c688 = arith.constant 688 : index
    %c0_79 = arith.constant 0 : index
    %184 = vector.load %arg1[%c688, %c0_79] : memref<2336x64xf32, #tpu.memory_space<vmem>>, vector<1x16xf32>
    %185 = vector.broadcast %184 : vector<1x16xf32> to vector<16x16xf32>
    %186 = arith.addf %183, %185 : vector<16x16xf32>
    %187 = vector.shape_cast %176 : vector<16x16xf32> to vector<2x8x16xf32>
    %188 = vector.shape_cast %181 : vector<16x16xf32> to vector<2x8x16xf32>
    %189 = vector.shape_cast %186 : vector<16x16xf32> to vector<2x8x16xf32>
    "tpu.trace_start"() <{level = 10 : i32, message = "bqd,bkd->bqk"}> : () -> ()
    %cst_80 = arith.constant dense<0.000000e+00> : vector<2x8x8xf32>
    %190 = tpu.matmul %187, %188, %cst_80 {dimension_numbers = #tpu.dot_dimension_numbers<[2], [2], [1], [1], [0, 0, 0, 1, 1, 1], [0], [0]>} : vector<2x8x16xf32>, vector<2x8x16xf32>, vector<2x8x8xf32> -> vector<2x8x8xf32>
    "tpu.trace_stop"() : () -> ()
    %cst_81 = arith.constant 2.500000e-01 : f32
    %191 = vector.broadcast %cst_81 : f32 to vector<2x8x8xf32>
    %192 = arith.mulf %190, %191 : vector<2x8x8xf32>
    %cst_82 = arith.constant dense<0xFF800000> : vector<2x8xf32>
    %193 = vector.multi_reduction <maximumf>, %192, %cst_82 [2] : vector<2x8x8xf32> to vector<2x8xf32>
    %194 = vector.shape_cast %193 : vector<2x8xf32> to vector<2x8x1xf32>
    %195 = vector.broadcast %194 : vector<2x8x1xf32> to vector<2x8x8xf32>
    %196 = arith.subf %192, %195 : vector<2x8x8xf32>
    %197 = math.exp %196 : vector<2x8x8xf32>
    %cst_83 = arith.constant dense<0.000000e+00> : vector<2x8xf32>
    %198 = vector.multi_reduction <add>, %197, %cst_83 [2] : vector<2x8x8xf32> to vector<2x8xf32>
    %199 = vector.shape_cast %198 : vector<2x8xf32> to vector<2x8x1xf32>
    %200 = tpu.reciprocal %199 {approx = true} : vector<2x8x1xf32> -> vector<2x8x1xf32>
    %201 = vector.broadcast %200 : vector<2x8x1xf32> to vector<2x8x8xf32>
    %202 = arith.mulf %197, %201 : vector<2x8x8xf32>
    "tpu.trace_start"() <{level = 10 : i32, message = "bqk,bkd->bqd"}> : () -> ()
    %cst_84 = arith.constant dense<0.000000e+00> : vector<2x8x16xf32>
    %203 = tpu.matmul %202, %189, %cst_84 {dimension_numbers = #tpu.dot_dimension_numbers<[2], [1], [1], [2], [0, 0, 0, 1, 1, 2], [0], [0]>} : vector<2x8x8xf32>, vector<2x8x16xf32>, vector<2x8x16xf32> -> vector<2x8x16xf32>
    "tpu.trace_stop"() : () -> ()
    %204 = vector.shape_cast %203 : vector<2x8x16xf32> to vector<16x16xf32>
    %c656 = arith.constant 656 : index
    %c0_85 = arith.constant 0 : index
    %205 = vector.load %arg1[%c656, %c0_85] : memref<2336x64xf32, #tpu.memory_space<vmem>>, vector<16x32xf32>
    %cst_86 = arith.constant dense<0.000000e+00> : vector<16x32xf32>
    %206 = tpu.matmul %204, %205, %cst_86 {dimension_numbers = #tpu.dot_dimension_numbers<[1], [0], [0], [1], [0, 0, 1, 1], [], []>} : vector<16x16xf32>, vector<16x32xf32>, vector<16x32xf32> -> vector<16x32xf32>
    %207 = arith.addf %171, %206 : vector<16x32xf32>
    %c696 = arith.constant 696 : index
    %c0_87 = arith.constant 0 : index
    %208 = vector.load %arg1[%c696, %c0_87] : memref<2336x64xf32, #tpu.memory_space<vmem>>, vector<1x32xf32>
    %209 = vector.broadcast %208 : vector<1x32xf32> to vector<16x32xf32>
    %210 = arith.addf %207, %209 : vector<16x32xf32>
    %211 = arith.addf %136, %210 : vector<16x32xf32>
    %c704 = arith.constant 704 : index
    %c0_88 = arith.constant 0 : index
    %212 = vector.load %arg1[%c704, %c0_88] : memref<2336x64xf32, #tpu.memory_space<vmem>>, vector<1x32xf32>
    %c712 = arith.constant 712 : index
    %c0_89 = arith.constant 0 : index
    %213 = vector.load %arg1[%c712, %c0_89] : memref<2336x64xf32, #tpu.memory_space<vmem>>, vector<1x32xf32>
    %cst_90 = arith.constant dense<0.000000e+00> : vector<16xf32>
    %214 = vector.multi_reduction <add>, %211, %cst_90 [1] : vector<16x32xf32> to vector<16xf32>
    %215 = vector.shape_cast %214 : vector<16xf32> to vector<16x1xf32>
    %cst_91 = arith.constant 3.200000e+01 : f32
    %216 = vector.broadcast %cst_91 : f32 to vector<16x1xf32>
    %217 = arith.divf %215, %216 : vector<16x1xf32>
    %218 = vector.broadcast %217 : vector<16x1xf32> to vector<16x32xf32>
    %219 = arith.subf %211, %218 : vector<16x32xf32>
    %220 = arith.mulf %219, %219 : vector<16x32xf32>
    %cst_92 = arith.constant dense<0.000000e+00> : vector<16xf32>
    %221 = vector.multi_reduction <add>, %220, %cst_92 [1] : vector<16x32xf32> to vector<16xf32>
    %222 = vector.shape_cast %221 : vector<16xf32> to vector<16x1xf32>
    %cst_93 = arith.constant 3.200000e+01 : f32
    %223 = vector.broadcast %cst_93 : f32 to vector<16x1xf32>
    %224 = arith.divf %222, %223 : vector<16x1xf32>
    %225 = vector.broadcast %217 : vector<16x1xf32> to vector<16x32xf32>
    %226 = arith.subf %211, %225 : vector<16x32xf32>
    %cst_94 = arith.constant 9.99999974E-6 : f32
    %227 = vector.broadcast %cst_94 : f32 to vector<16x1xf32>
    %228 = arith.addf %224, %227 : vector<16x1xf32>
    %229 = math.rsqrt %228 : vector<16x1xf32>
    %230 = vector.broadcast %229 : vector<16x1xf32> to vector<16x32xf32>
    %231 = arith.mulf %226, %230 : vector<16x32xf32>
    %232 = vector.broadcast %212 : vector<1x32xf32> to vector<16x32xf32>
    %233 = arith.mulf %231, %232 : vector<16x32xf32>
    %234 = vector.broadcast %213 : vector<1x32xf32> to vector<16x32xf32>
    %235 = arith.addf %233, %234 : vector<16x32xf32>
    %c720 = arith.constant 720 : index
    %c0_95 = arith.constant 0 : index
    %236 = vector.load %arg1[%c720, %c0_95] : memref<2336x64xf32, #tpu.memory_space<vmem>>, vector<32x64xf32>
    %cst_96 = arith.constant dense<0.000000e+00> : vector<16x64xf32>
    %237 = tpu.matmul %235, %236, %cst_96 {dimension_numbers = #tpu.dot_dimension_numbers<[1], [0], [0], [1], [0, 0, 1, 1], [], []>} : vector<16x32xf32>, vector<32x64xf32>, vector<16x64xf32> -> vector<16x64xf32>
    %c752 = arith.constant 752 : index
    %c0_97 = arith.constant 0 : index
    %238 = vector.load %arg1[%c752, %c0_97] : memref<2336x64xf32, #tpu.memory_space<vmem>>, vector<1x64xf32>
    %239 = vector.broadcast %238 : vector<1x64xf32> to vector<16x64xf32>
    %240 = arith.addf %237, %239 : vector<16x64xf32>
    %cst_98 = arith.constant 0.000000e+00 : f32
    %241 = vector.broadcast %cst_98 : f32 to vector<16x64xf32>
    %242 = arith.maximumf %240, %241 : vector<16x64xf32>
    %c760 = arith.constant 760 : index
    %c0_99 = arith.constant 0 : index
    %243 = vector.load %arg1[%c760, %c0_99] : memref<2336x64xf32, #tpu.memory_space<vmem>>, vector<64x32xf32>
    %cst_100 = arith.constant dense<0.000000e+00> : vector<16x32xf32>
    %244 = tpu.matmul %242, %243, %cst_100 {dimension_numbers = #tpu.dot_dimension_numbers<[1], [0], [0], [1], [0, 0, 1, 1], [], []>} : vector<16x64xf32>, vector<64x32xf32>, vector<16x32xf32> -> vector<16x32xf32>
    %c824 = arith.constant 824 : index
    %c0_101 = arith.constant 0 : index
    %245 = vector.load %arg1[%c824, %c0_101] : memref<2336x64xf32, #tpu.memory_space<vmem>>, vector<1x32xf32>
    %246 = vector.broadcast %245 : vector<1x32xf32> to vector<16x32xf32>
    %247 = arith.addf %244, %246 : vector<16x32xf32>
    %248 = arith.addf %235, %247 : vector<16x32xf32>
    %c832 = arith.constant 832 : index
    %c0_102 = arith.constant 0 : index
    %249 = vector.load %arg1[%c832, %c0_102] : memref<2336x64xf32, #tpu.memory_space<vmem>>, vector<1x32xf32>
    %c840 = arith.constant 840 : index
    %c0_103 = arith.constant 0 : index
    %250 = vector.load %arg1[%c840, %c0_103] : memref<2336x64xf32, #tpu.memory_space<vmem>>, vector<1x32xf32>
    %cst_104 = arith.constant dense<0.000000e+00> : vector<16xf32>
    %251 = vector.multi_reduction <add>, %248, %cst_104 [1] : vector<16x32xf32> to vector<16xf32>
    %252 = vector.shape_cast %251 : vector<16xf32> to vector<16x1xf32>
    %cst_105 = arith.constant 3.200000e+01 : f32
    %253 = vector.broadcast %cst_105 : f32 to vector<16x1xf32>
    %254 = arith.divf %252, %253 : vector<16x1xf32>
    %255 = vector.broadcast %254 : vector<16x1xf32> to vector<16x32xf32>
    %256 = arith.subf %248, %255 : vector<16x32xf32>
    %257 = arith.mulf %256, %256 : vector<16x32xf32>
    %cst_106 = arith.constant dense<0.000000e+00> : vector<16xf32>
    %258 = vector.multi_reduction <add>, %257, %cst_106 [1] : vector<16x32xf32> to vector<16xf32>
    %259 = vector.shape_cast %258 : vector<16xf32> to vector<16x1xf32>
    %cst_107 = arith.constant 3.200000e+01 : f32
    %260 = vector.broadcast %cst_107 : f32 to vector<16x1xf32>
    %261 = arith.divf %259, %260 : vector<16x1xf32>
    %262 = vector.broadcast %254 : vector<16x1xf32> to vector<16x32xf32>
    %263 = arith.subf %248, %262 : vector<16x32xf32>
    %cst_108 = arith.constant 9.99999974E-6 : f32
    %264 = vector.broadcast %cst_108 : f32 to vector<16x1xf32>
    %265 = arith.addf %261, %264 : vector<16x1xf32>
    %266 = math.rsqrt %265 : vector<16x1xf32>
    %267 = vector.broadcast %266 : vector<16x1xf32> to vector<16x32xf32>
    %268 = arith.mulf %263, %267 : vector<16x32xf32>
    %269 = vector.broadcast %249 : vector<1x32xf32> to vector<16x32xf32>
    %270 = arith.mulf %268, %269 : vector<16x32xf32>
    %271 = vector.broadcast %250 : vector<1x32xf32> to vector<16x32xf32>
    %272 = arith.addf %270, %271 : vector<16x32xf32>
    %c2288 = arith.constant 2288 : index
    %c0_109 = arith.constant 0 : index
    %273 = vector.load %arg1[%c2288, %c0_109] : memref<2336x64xf32, #tpu.memory_space<vmem>>, vector<1x32xf32>
    %c2296 = arith.constant 2296 : index
    %c0_110 = arith.constant 0 : index
    %274 = vector.load %arg1[%c2296, %c0_110] : memref<2336x64xf32, #tpu.memory_space<vmem>>, vector<1x32xf32>
    %cst_111 = arith.constant dense<0.000000e+00> : vector<16xf32>
    %275 = vector.multi_reduction <add>, %272, %cst_111 [1] : vector<16x32xf32> to vector<16xf32>
    %276 = vector.shape_cast %275 : vector<16xf32> to vector<16x1xf32>
    %cst_112 = arith.constant 3.200000e+01 : f32
    %277 = vector.broadcast %cst_112 : f32 to vector<16x1xf32>
    %278 = arith.divf %276, %277 : vector<16x1xf32>
    %279 = vector.broadcast %278 : vector<16x1xf32> to vector<16x32xf32>
    %280 = arith.subf %272, %279 : vector<16x32xf32>
    %281 = arith.mulf %280, %280 : vector<16x32xf32>
    %cst_113 = arith.constant dense<0.000000e+00> : vector<16xf32>
    %282 = vector.multi_reduction <add>, %281, %cst_113 [1] : vector<16x32xf32> to vector<16xf32>
    %283 = vector.shape_cast %282 : vector<16xf32> to vector<16x1xf32>
    %cst_114 = arith.constant 3.200000e+01 : f32
    %284 = vector.broadcast %cst_114 : f32 to vector<16x1xf32>
    %285 = arith.divf %283, %284 : vector<16x1xf32>
    %286 = vector.broadcast %278 : vector<16x1xf32> to vector<16x32xf32>
    %287 = arith.subf %272, %286 : vector<16x32xf32>
    %cst_115 = arith.constant 9.99999974E-6 : f32
    %288 = vector.broadcast %cst_115 : f32 to vector<16x1xf32>
    %289 = arith.addf %285, %288 : vector<16x1xf32>
    %290 = math.rsqrt %289 : vector<16x1xf32>
    %291 = vector.broadcast %290 : vector<16x1xf32> to vector<16x32xf32>
    %292 = arith.mulf %287, %291 : vector<16x32xf32>
    %293 = vector.broadcast %273 : vector<1x32xf32> to vector<16x32xf32>
    %294 = arith.mulf %292, %293 : vector<16x32xf32>
    %295 = vector.broadcast %274 : vector<1x32xf32> to vector<16x32xf32>
    %296 = arith.addf %294, %295 : vector<16x32xf32>
    %c848 = arith.constant 848 : index
    %c0_116 = arith.constant 0 : index
    %297 = vector.load %arg1[%c848, %c0_116] : memref<2336x64xf32, #tpu.memory_space<vmem>>, vector<32x16xf32>
    %cst_117 = arith.constant dense<0.000000e+00> : vector<16x16xf32>
    %298 = tpu.matmul %0, %297, %cst_117 {dimension_numbers = #tpu.dot_dimension_numbers<[1], [0], [0], [1], [0, 0, 1, 1], [], []>} : vector<16x32xf32>, vector<32x16xf32>, vector<16x16xf32> -> vector<16x16xf32>
    %c960 = arith.constant 960 : index
    %c0_118 = arith.constant 0 : index
    %299 = vector.load %arg1[%c960, %c0_118] : memref<2336x64xf32, #tpu.memory_space<vmem>>, vector<1x16xf32>
    %300 = vector.broadcast %299 : vector<1x16xf32> to vector<16x16xf32>
    %301 = arith.addf %298, %300 : vector<16x16xf32>
    %c880 = arith.constant 880 : index
    %c0_119 = arith.constant 0 : index
    %302 = vector.load %arg1[%c880, %c0_119] : memref<2336x64xf32, #tpu.memory_space<vmem>>, vector<32x16xf32>
    %cst_120 = arith.constant dense<0.000000e+00> : vector<16x16xf32>
    %303 = tpu.matmul %0, %302, %cst_120 {dimension_numbers = #tpu.dot_dimension_numbers<[1], [0], [0], [1], [0, 0, 1, 1], [], []>} : vector<16x32xf32>, vector<32x16xf32>, vector<16x16xf32> -> vector<16x16xf32>
    %c968 = arith.constant 968 : index
    %c0_121 = arith.constant 0 : index
    %304 = vector.load %arg1[%c968, %c0_121] : memref<2336x64xf32, #tpu.memory_space<vmem>>, vector<1x16xf32>
    %305 = vector.broadcast %304 : vector<1x16xf32> to vector<16x16xf32>
    %306 = arith.addf %303, %305 : vector<16x16xf32>
    %c912 = arith.constant 912 : index
    %c0_122 = arith.constant 0 : index
    %307 = vector.load %arg1[%c912, %c0_122] : memref<2336x64xf32, #tpu.memory_space<vmem>>, vector<32x16xf32>
    %cst_123 = arith.constant dense<0.000000e+00> : vector<16x16xf32>
    %308 = tpu.matmul %0, %307, %cst_123 {dimension_numbers = #tpu.dot_dimension_numbers<[1], [0], [0], [1], [0, 0, 1, 1], [], []>} : vector<16x32xf32>, vector<32x16xf32>, vector<16x16xf32> -> vector<16x16xf32>
    %c976 = arith.constant 976 : index
    %c0_124 = arith.constant 0 : index
    %309 = vector.load %arg1[%c976, %c0_124] : memref<2336x64xf32, #tpu.memory_space<vmem>>, vector<1x16xf32>
    %310 = vector.broadcast %309 : vector<1x16xf32> to vector<16x16xf32>
    %311 = arith.addf %308, %310 : vector<16x16xf32>
    %312 = vector.shape_cast %301 : vector<16x16xf32> to vector<2x8x16xf32>
    %313 = vector.shape_cast %306 : vector<16x16xf32> to vector<2x8x16xf32>
    %314 = vector.shape_cast %311 : vector<16x16xf32> to vector<2x8x16xf32>
    "tpu.trace_start"() <{level = 10 : i32, message = "bqd,bkd->bqk"}> : () -> ()
    %cst_125 = arith.constant dense<0.000000e+00> : vector<2x8x8xf32>
    %315 = tpu.matmul %312, %313, %cst_125 {dimension_numbers = #tpu.dot_dimension_numbers<[2], [2], [1], [1], [0, 0, 0, 1, 1, 1], [0], [0]>} : vector<2x8x16xf32>, vector<2x8x16xf32>, vector<2x8x8xf32> -> vector<2x8x8xf32>
    "tpu.trace_stop"() : () -> ()
    %cst_126 = arith.constant 2.500000e-01 : f32
    %316 = vector.broadcast %cst_126 : f32 to vector<2x8x8xf32>
    %317 = arith.mulf %315, %316 : vector<2x8x8xf32>
    %cst_127 = arith.constant dense<0xFF800000> : vector<2x8xf32>
    %318 = vector.multi_reduction <maximumf>, %317, %cst_127 [2] : vector<2x8x8xf32> to vector<2x8xf32>
    %319 = vector.shape_cast %318 : vector<2x8xf32> to vector<2x8x1xf32>
    %320 = vector.broadcast %319 : vector<2x8x1xf32> to vector<2x8x8xf32>
    %321 = arith.subf %317, %320 : vector<2x8x8xf32>
    %322 = math.exp %321 : vector<2x8x8xf32>
    %cst_128 = arith.constant dense<0.000000e+00> : vector<2x8xf32>
    %323 = vector.multi_reduction <add>, %322, %cst_128 [2] : vector<2x8x8xf32> to vector<2x8xf32>
    %324 = vector.shape_cast %323 : vector<2x8xf32> to vector<2x8x1xf32>
    %325 = tpu.reciprocal %324 {approx = true} : vector<2x8x1xf32> -> vector<2x8x1xf32>
    %326 = vector.broadcast %325 : vector<2x8x1xf32> to vector<2x8x8xf32>
    %327 = arith.mulf %322, %326 : vector<2x8x8xf32>
    "tpu.trace_start"() <{level = 10 : i32, message = "bqk,bkd->bqd"}> : () -> ()
    %cst_129 = arith.constant dense<0.000000e+00> : vector<2x8x16xf32>
    %328 = tpu.matmul %327, %314, %cst_129 {dimension_numbers = #tpu.dot_dimension_numbers<[2], [1], [1], [2], [0, 0, 0, 1, 1, 2], [0], [0]>} : vector<2x8x8xf32>, vector<2x8x16xf32>, vector<2x8x16xf32> -> vector<2x8x16xf32>
    "tpu.trace_stop"() : () -> ()
    %329 = vector.shape_cast %328 : vector<2x8x16xf32> to vector<16x16xf32>
    %c944 = arith.constant 944 : index
    %c0_130 = arith.constant 0 : index
    %330 = vector.load %arg1[%c944, %c0_130] : memref<2336x64xf32, #tpu.memory_space<vmem>>, vector<16x32xf32>
    %cst_131 = arith.constant dense<0.000000e+00> : vector<16x32xf32>
    %331 = tpu.matmul %329, %330, %cst_131 {dimension_numbers = #tpu.dot_dimension_numbers<[1], [0], [0], [1], [0, 0, 1, 1], [], []>} : vector<16x16xf32>, vector<16x32xf32>, vector<16x32xf32> -> vector<16x32xf32>
    %c984 = arith.constant 984 : index
    %c0_132 = arith.constant 0 : index
    %332 = vector.load %arg1[%c984, %c0_132] : memref<2336x64xf32, #tpu.memory_space<vmem>>, vector<32x16xf32>
    %cst_133 = arith.constant dense<0.000000e+00> : vector<16x16xf32>
    %333 = tpu.matmul %0, %332, %cst_133 {dimension_numbers = #tpu.dot_dimension_numbers<[1], [0], [0], [1], [0, 0, 1, 1], [], []>} : vector<16x32xf32>, vector<32x16xf32>, vector<16x16xf32> -> vector<16x16xf32>
    %c1096 = arith.constant 1096 : index
    %c0_134 = arith.constant 0 : index
    %334 = vector.load %arg1[%c1096, %c0_134] : memref<2336x64xf32, #tpu.memory_space<vmem>>, vector<1x16xf32>
    %335 = vector.broadcast %334 : vector<1x16xf32> to vector<16x16xf32>
    %336 = arith.addf %333, %335 : vector<16x16xf32>
    %c1016 = arith.constant 1016 : index
    %c0_135 = arith.constant 0 : index
    %337 = vector.load %arg1[%c1016, %c0_135] : memref<2336x64xf32, #tpu.memory_space<vmem>>, vector<32x16xf32>
    %cst_136 = arith.constant dense<0.000000e+00> : vector<16x16xf32>
    %338 = tpu.matmul %0, %337, %cst_136 {dimension_numbers = #tpu.dot_dimension_numbers<[1], [0], [0], [1], [0, 0, 1, 1], [], []>} : vector<16x32xf32>, vector<32x16xf32>, vector<16x16xf32> -> vector<16x16xf32>
    %c1104 = arith.constant 1104 : index
    %c0_137 = arith.constant 0 : index
    %339 = vector.load %arg1[%c1104, %c0_137] : memref<2336x64xf32, #tpu.memory_space<vmem>>, vector<1x16xf32>
    %340 = vector.broadcast %339 : vector<1x16xf32> to vector<16x16xf32>
    %341 = arith.addf %338, %340 : vector<16x16xf32>
    %c1048 = arith.constant 1048 : index
    %c0_138 = arith.constant 0 : index
    %342 = vector.load %arg1[%c1048, %c0_138] : memref<2336x64xf32, #tpu.memory_space<vmem>>, vector<32x16xf32>
    %cst_139 = arith.constant dense<0.000000e+00> : vector<16x16xf32>
    %343 = tpu.matmul %0, %342, %cst_139 {dimension_numbers = #tpu.dot_dimension_numbers<[1], [0], [0], [1], [0, 0, 1, 1], [], []>} : vector<16x32xf32>, vector<32x16xf32>, vector<16x16xf32> -> vector<16x16xf32>
    %c1112 = arith.constant 1112 : index
    %c0_140 = arith.constant 0 : index
    %344 = vector.load %arg1[%c1112, %c0_140] : memref<2336x64xf32, #tpu.memory_space<vmem>>, vector<1x16xf32>
    %345 = vector.broadcast %344 : vector<1x16xf32> to vector<16x16xf32>
    %346 = arith.addf %343, %345 : vector<16x16xf32>
    %347 = vector.shape_cast %336 : vector<16x16xf32> to vector<2x8x16xf32>
    %348 = vector.shape_cast %341 : vector<16x16xf32> to vector<2x8x16xf32>
    %349 = vector.shape_cast %346 : vector<16x16xf32> to vector<2x8x16xf32>
    "tpu.trace_start"() <{level = 10 : i32, message = "bqd,bkd->bqk"}> : () -> ()
    %cst_141 = arith.constant dense<0.000000e+00> : vector<2x8x8xf32>
    %350 = tpu.matmul %347, %348, %cst_141 {dimension_numbers = #tpu.dot_dimension_numbers<[2], [2], [1], [1], [0, 0, 0, 1, 1, 1], [0], [0]>} : vector<2x8x16xf32>, vector<2x8x16xf32>, vector<2x8x8xf32> -> vector<2x8x8xf32>
    "tpu.trace_stop"() : () -> ()
    %cst_142 = arith.constant 2.500000e-01 : f32
    %351 = vector.broadcast %cst_142 : f32 to vector<2x8x8xf32>
    %352 = arith.mulf %350, %351 : vector<2x8x8xf32>
    %cst_143 = arith.constant dense<0xFF800000> : vector<2x8xf32>
    %353 = vector.multi_reduction <maximumf>, %352, %cst_143 [2] : vector<2x8x8xf32> to vector<2x8xf32>
    %354 = vector.shape_cast %353 : vector<2x8xf32> to vector<2x8x1xf32>
    %355 = vector.broadcast %354 : vector<2x8x1xf32> to vector<2x8x8xf32>
    %356 = arith.subf %352, %355 : vector<2x8x8xf32>
    %357 = math.exp %356 : vector<2x8x8xf32>
    %cst_144 = arith.constant dense<0.000000e+00> : vector<2x8xf32>
    %358 = vector.multi_reduction <add>, %357, %cst_144 [2] : vector<2x8x8xf32> to vector<2x8xf32>
    %359 = vector.shape_cast %358 : vector<2x8xf32> to vector<2x8x1xf32>
    %360 = tpu.reciprocal %359 {approx = true} : vector<2x8x1xf32> -> vector<2x8x1xf32>
    %361 = vector.broadcast %360 : vector<2x8x1xf32> to vector<2x8x8xf32>
    %362 = arith.mulf %357, %361 : vector<2x8x8xf32>
    "tpu.trace_start"() <{level = 10 : i32, message = "bqk,bkd->bqd"}> : () -> ()
    %cst_145 = arith.constant dense<0.000000e+00> : vector<2x8x16xf32>
    %363 = tpu.matmul %362, %349, %cst_145 {dimension_numbers = #tpu.dot_dimension_numbers<[2], [1], [1], [2], [0, 0, 0, 1, 1, 2], [0], [0]>} : vector<2x8x8xf32>, vector<2x8x16xf32>, vector<2x8x16xf32> -> vector<2x8x16xf32>
    "tpu.trace_stop"() : () -> ()
    %364 = vector.shape_cast %363 : vector<2x8x16xf32> to vector<16x16xf32>
    %c1080 = arith.constant 1080 : index
    %c0_146 = arith.constant 0 : index
    %365 = vector.load %arg1[%c1080, %c0_146] : memref<2336x64xf32, #tpu.memory_space<vmem>>, vector<16x32xf32>
    %cst_147 = arith.constant dense<0.000000e+00> : vector<16x32xf32>
    %366 = tpu.matmul %364, %365, %cst_147 {dimension_numbers = #tpu.dot_dimension_numbers<[1], [0], [0], [1], [0, 0, 1, 1], [], []>} : vector<16x16xf32>, vector<16x32xf32>, vector<16x32xf32> -> vector<16x32xf32>
    %367 = arith.addf %331, %366 : vector<16x32xf32>
    %c1120 = arith.constant 1120 : index
    %c0_148 = arith.constant 0 : index
    %368 = vector.load %arg1[%c1120, %c0_148] : memref<2336x64xf32, #tpu.memory_space<vmem>>, vector<1x32xf32>
    %369 = vector.broadcast %368 : vector<1x32xf32> to vector<16x32xf32>
    %370 = arith.addf %367, %369 : vector<16x32xf32>
    %371 = arith.addf %0, %370 : vector<16x32xf32>
    %c1128 = arith.constant 1128 : index
    %c0_149 = arith.constant 0 : index
    %372 = vector.load %arg1[%c1128, %c0_149] : memref<2336x64xf32, #tpu.memory_space<vmem>>, vector<1x32xf32>
    %c1136 = arith.constant 1136 : index
    %c0_150 = arith.constant 0 : index
    %373 = vector.load %arg1[%c1136, %c0_150] : memref<2336x64xf32, #tpu.memory_space<vmem>>, vector<1x32xf32>
    %cst_151 = arith.constant dense<0.000000e+00> : vector<16xf32>
    %374 = vector.multi_reduction <add>, %371, %cst_151 [1] : vector<16x32xf32> to vector<16xf32>
    %375 = vector.shape_cast %374 : vector<16xf32> to vector<16x1xf32>
    %cst_152 = arith.constant 3.200000e+01 : f32
    %376 = vector.broadcast %cst_152 : f32 to vector<16x1xf32>
    %377 = arith.divf %375, %376 : vector<16x1xf32>
    %378 = vector.broadcast %377 : vector<16x1xf32> to vector<16x32xf32>
    %379 = arith.subf %371, %378 : vector<16x32xf32>
    %380 = arith.mulf %379, %379 : vector<16x32xf32>
    %cst_153 = arith.constant dense<0.000000e+00> : vector<16xf32>
    %381 = vector.multi_reduction <add>, %380, %cst_153 [1] : vector<16x32xf32> to vector<16xf32>
    %382 = vector.shape_cast %381 : vector<16xf32> to vector<16x1xf32>
    %cst_154 = arith.constant 3.200000e+01 : f32
    %383 = vector.broadcast %cst_154 : f32 to vector<16x1xf32>
    %384 = arith.divf %382, %383 : vector<16x1xf32>
    %385 = vector.broadcast %377 : vector<16x1xf32> to vector<16x32xf32>
    %386 = arith.subf %371, %385 : vector<16x32xf32>
    %cst_155 = arith.constant 9.99999974E-6 : f32
    %387 = vector.broadcast %cst_155 : f32 to vector<16x1xf32>
    %388 = arith.addf %384, %387 : vector<16x1xf32>
    %389 = math.rsqrt %388 : vector<16x1xf32>
    %390 = vector.broadcast %389 : vector<16x1xf32> to vector<16x32xf32>
    %391 = arith.mulf %386, %390 : vector<16x32xf32>
    %392 = vector.broadcast %372 : vector<1x32xf32> to vector<16x32xf32>
    %393 = arith.mulf %391, %392 : vector<16x32xf32>
    %394 = vector.broadcast %373 : vector<1x32xf32> to vector<16x32xf32>
    %395 = arith.addf %393, %394 : vector<16x32xf32>
    %c1144 = arith.constant 1144 : index
    %c0_156 = arith.constant 0 : index
    %396 = vector.load %arg1[%c1144, %c0_156] : memref<2336x64xf32, #tpu.memory_space<vmem>>, vector<32x16xf32>
    %cst_157 = arith.constant dense<0.000000e+00> : vector<16x16xf32>
    %397 = tpu.matmul %395, %396, %cst_157 {dimension_numbers = #tpu.dot_dimension_numbers<[1], [0], [0], [1], [0, 0, 1, 1], [], []>} : vector<16x32xf32>, vector<32x16xf32>, vector<16x16xf32> -> vector<16x16xf32>
    %c1256 = arith.constant 1256 : index
    %c0_158 = arith.constant 0 : index
    %398 = vector.load %arg1[%c1256, %c0_158] : memref<2336x64xf32, #tpu.memory_space<vmem>>, vector<1x16xf32>
    %399 = vector.broadcast %398 : vector<1x16xf32> to vector<16x16xf32>
    %400 = arith.addf %397, %399 : vector<16x16xf32>
    %c1176 = arith.constant 1176 : index
    %c0_159 = arith.constant 0 : index
    %401 = vector.load %arg1[%c1176, %c0_159] : memref<2336x64xf32, #tpu.memory_space<vmem>>, vector<32x16xf32>
    %cst_160 = arith.constant dense<0.000000e+00> : vector<16x16xf32>
    %402 = tpu.matmul %296, %401, %cst_160 {dimension_numbers = #tpu.dot_dimension_numbers<[1], [0], [0], [1], [0, 0, 1, 1], [], []>} : vector<16x32xf32>, vector<32x16xf32>, vector<16x16xf32> -> vector<16x16xf32>
    %c1264 = arith.constant 1264 : index
    %c0_161 = arith.constant 0 : index
    %403 = vector.load %arg1[%c1264, %c0_161] : memref<2336x64xf32, #tpu.memory_space<vmem>>, vector<1x16xf32>
    %404 = vector.broadcast %403 : vector<1x16xf32> to vector<16x16xf32>
    %405 = arith.addf %402, %404 : vector<16x16xf32>
    %c1208 = arith.constant 1208 : index
    %c0_162 = arith.constant 0 : index
    %406 = vector.load %arg1[%c1208, %c0_162] : memref<2336x64xf32, #tpu.memory_space<vmem>>, vector<32x16xf32>
    %cst_163 = arith.constant dense<0.000000e+00> : vector<16x16xf32>
    %407 = tpu.matmul %296, %406, %cst_163 {dimension_numbers = #tpu.dot_dimension_numbers<[1], [0], [0], [1], [0, 0, 1, 1], [], []>} : vector<16x32xf32>, vector<32x16xf32>, vector<16x16xf32> -> vector<16x16xf32>
    %c1272 = arith.constant 1272 : index
    %c0_164 = arith.constant 0 : index
    %408 = vector.load %arg1[%c1272, %c0_164] : memref<2336x64xf32, #tpu.memory_space<vmem>>, vector<1x16xf32>
    %409 = vector.broadcast %408 : vector<1x16xf32> to vector<16x16xf32>
    %410 = arith.addf %407, %409 : vector<16x16xf32>
    %411 = vector.shape_cast %400 : vector<16x16xf32> to vector<2x8x16xf32>
    %412 = vector.shape_cast %405 : vector<16x16xf32> to vector<2x8x16xf32>
    %413 = vector.shape_cast %410 : vector<16x16xf32> to vector<2x8x16xf32>
    "tpu.trace_start"() <{level = 10 : i32, message = "bqd,bkd->bqk"}> : () -> ()
    %cst_165 = arith.constant dense<0.000000e+00> : vector<2x8x8xf32>
    %414 = tpu.matmul %411, %412, %cst_165 {dimension_numbers = #tpu.dot_dimension_numbers<[2], [2], [1], [1], [0, 0, 0, 1, 1, 1], [0], [0]>} : vector<2x8x16xf32>, vector<2x8x16xf32>, vector<2x8x8xf32> -> vector<2x8x8xf32>
    "tpu.trace_stop"() : () -> ()
    %cst_166 = arith.constant 2.500000e-01 : f32
    %415 = vector.broadcast %cst_166 : f32 to vector<2x8x8xf32>
    %416 = arith.mulf %414, %415 : vector<2x8x8xf32>
    %cst_167 = arith.constant dense<0xFF800000> : vector<2x8xf32>
    %417 = vector.multi_reduction <maximumf>, %416, %cst_167 [2] : vector<2x8x8xf32> to vector<2x8xf32>
    %418 = vector.shape_cast %417 : vector<2x8xf32> to vector<2x8x1xf32>
    %419 = vector.broadcast %418 : vector<2x8x1xf32> to vector<2x8x8xf32>
    %420 = arith.subf %416, %419 : vector<2x8x8xf32>
    %421 = math.exp %420 : vector<2x8x8xf32>
    %cst_168 = arith.constant dense<0.000000e+00> : vector<2x8xf32>
    %422 = vector.multi_reduction <add>, %421, %cst_168 [2] : vector<2x8x8xf32> to vector<2x8xf32>
    %423 = vector.shape_cast %422 : vector<2x8xf32> to vector<2x8x1xf32>
    %424 = tpu.reciprocal %423 {approx = true} : vector<2x8x1xf32> -> vector<2x8x1xf32>
    %425 = vector.broadcast %424 : vector<2x8x1xf32> to vector<2x8x8xf32>
    %426 = arith.mulf %421, %425 : vector<2x8x8xf32>
    "tpu.trace_start"() <{level = 10 : i32, message = "bqk,bkd->bqd"}> : () -> ()
    %cst_169 = arith.constant dense<0.000000e+00> : vector<2x8x16xf32>
    %427 = tpu.matmul %426, %413, %cst_169 {dimension_numbers = #tpu.dot_dimension_numbers<[2], [1], [1], [2], [0, 0, 0, 1, 1, 2], [0], [0]>} : vector<2x8x8xf32>, vector<2x8x16xf32>, vector<2x8x16xf32> -> vector<2x8x16xf32>
    "tpu.trace_stop"() : () -> ()
    %428 = vector.shape_cast %427 : vector<2x8x16xf32> to vector<16x16xf32>
    %c1240 = arith.constant 1240 : index
    %c0_170 = arith.constant 0 : index
    %429 = vector.load %arg1[%c1240, %c0_170] : memref<2336x64xf32, #tpu.memory_space<vmem>>, vector<16x32xf32>
    %cst_171 = arith.constant dense<0.000000e+00> : vector<16x32xf32>
    %430 = tpu.matmul %428, %429, %cst_171 {dimension_numbers = #tpu.dot_dimension_numbers<[1], [0], [0], [1], [0, 0, 1, 1], [], []>} : vector<16x16xf32>, vector<16x32xf32>, vector<16x32xf32> -> vector<16x32xf32>
    %c1280 = arith.constant 1280 : index
    %c0_172 = arith.constant 0 : index
    %431 = vector.load %arg1[%c1280, %c0_172] : memref<2336x64xf32, #tpu.memory_space<vmem>>, vector<32x16xf32>
    %cst_173 = arith.constant dense<0.000000e+00> : vector<16x16xf32>
    %432 = tpu.matmul %395, %431, %cst_173 {dimension_numbers = #tpu.dot_dimension_numbers<[1], [0], [0], [1], [0, 0, 1, 1], [], []>} : vector<16x32xf32>, vector<32x16xf32>, vector<16x16xf32> -> vector<16x16xf32>
    %c1392 = arith.constant 1392 : index
    %c0_174 = arith.constant 0 : index
    %433 = vector.load %arg1[%c1392, %c0_174] : memref<2336x64xf32, #tpu.memory_space<vmem>>, vector<1x16xf32>
    %434 = vector.broadcast %433 : vector<1x16xf32> to vector<16x16xf32>
    %435 = arith.addf %432, %434 : vector<16x16xf32>
    %c1312 = arith.constant 1312 : index
    %c0_175 = arith.constant 0 : index
    %436 = vector.load %arg1[%c1312, %c0_175] : memref<2336x64xf32, #tpu.memory_space<vmem>>, vector<32x16xf32>
    %cst_176 = arith.constant dense<0.000000e+00> : vector<16x16xf32>
    %437 = tpu.matmul %296, %436, %cst_176 {dimension_numbers = #tpu.dot_dimension_numbers<[1], [0], [0], [1], [0, 0, 1, 1], [], []>} : vector<16x32xf32>, vector<32x16xf32>, vector<16x16xf32> -> vector<16x16xf32>
    %c1400 = arith.constant 1400 : index
    %c0_177 = arith.constant 0 : index
    %438 = vector.load %arg1[%c1400, %c0_177] : memref<2336x64xf32, #tpu.memory_space<vmem>>, vector<1x16xf32>
    %439 = vector.broadcast %438 : vector<1x16xf32> to vector<16x16xf32>
    %440 = arith.addf %437, %439 : vector<16x16xf32>
    %c1344 = arith.constant 1344 : index
    %c0_178 = arith.constant 0 : index
    %441 = vector.load %arg1[%c1344, %c0_178] : memref<2336x64xf32, #tpu.memory_space<vmem>>, vector<32x16xf32>
    %cst_179 = arith.constant dense<0.000000e+00> : vector<16x16xf32>
    %442 = tpu.matmul %296, %441, %cst_179 {dimension_numbers = #tpu.dot_dimension_numbers<[1], [0], [0], [1], [0, 0, 1, 1], [], []>} : vector<16x32xf32>, vector<32x16xf32>, vector<16x16xf32> -> vector<16x16xf32>
    %c1408 = arith.constant 1408 : index
    %c0_180 = arith.constant 0 : index
    %443 = vector.load %arg1[%c1408, %c0_180] : memref<2336x64xf32, #tpu.memory_space<vmem>>, vector<1x16xf32>
    %444 = vector.broadcast %443 : vector<1x16xf32> to vector<16x16xf32>
    %445 = arith.addf %442, %444 : vector<16x16xf32>
    %446 = vector.shape_cast %435 : vector<16x16xf32> to vector<2x8x16xf32>
    %447 = vector.shape_cast %440 : vector<16x16xf32> to vector<2x8x16xf32>
    %448 = vector.shape_cast %445 : vector<16x16xf32> to vector<2x8x16xf32>
    "tpu.trace_start"() <{level = 10 : i32, message = "bqd,bkd->bqk"}> : () -> ()
    %cst_181 = arith.constant dense<0.000000e+00> : vector<2x8x8xf32>
    %449 = tpu.matmul %446, %447, %cst_181 {dimension_numbers = #tpu.dot_dimension_numbers<[2], [2], [1], [1], [0, 0, 0, 1, 1, 1], [0], [0]>} : vector<2x8x16xf32>, vector<2x8x16xf32>, vector<2x8x8xf32> -> vector<2x8x8xf32>
    "tpu.trace_stop"() : () -> ()
    %cst_182 = arith.constant 2.500000e-01 : f32
    %450 = vector.broadcast %cst_182 : f32 to vector<2x8x8xf32>
    %451 = arith.mulf %449, %450 : vector<2x8x8xf32>
    %cst_183 = arith.constant dense<0xFF800000> : vector<2x8xf32>
    %452 = vector.multi_reduction <maximumf>, %451, %cst_183 [2] : vector<2x8x8xf32> to vector<2x8xf32>
    %453 = vector.shape_cast %452 : vector<2x8xf32> to vector<2x8x1xf32>
    %454 = vector.broadcast %453 : vector<2x8x1xf32> to vector<2x8x8xf32>
    %455 = arith.subf %451, %454 : vector<2x8x8xf32>
    %456 = math.exp %455 : vector<2x8x8xf32>
    %cst_184 = arith.constant dense<0.000000e+00> : vector<2x8xf32>
    %457 = vector.multi_reduction <add>, %456, %cst_184 [2] : vector<2x8x8xf32> to vector<2x8xf32>
    %458 = vector.shape_cast %457 : vector<2x8xf32> to vector<2x8x1xf32>
    %459 = tpu.reciprocal %458 {approx = true} : vector<2x8x1xf32> -> vector<2x8x1xf32>
    %460 = vector.broadcast %459 : vector<2x8x1xf32> to vector<2x8x8xf32>
    %461 = arith.mulf %456, %460 : vector<2x8x8xf32>
    "tpu.trace_start"() <{level = 10 : i32, message = "bqk,bkd->bqd"}> : () -> ()
    %cst_185 = arith.constant dense<0.000000e+00> : vector<2x8x16xf32>
    %462 = tpu.matmul %461, %448, %cst_185 {dimension_numbers = #tpu.dot_dimension_numbers<[2], [1], [1], [2], [0, 0, 0, 1, 1, 2], [0], [0]>} : vector<2x8x8xf32>, vector<2x8x16xf32>, vector<2x8x16xf32> -> vector<2x8x16xf32>
    "tpu.trace_stop"() : () -> ()
    %463 = vector.shape_cast %462 : vector<2x8x16xf32> to vector<16x16xf32>
    %c1376 = arith.constant 1376 : index
    %c0_186 = arith.constant 0 : index
    %464 = vector.load %arg1[%c1376, %c0_186] : memref<2336x64xf32, #tpu.memory_space<vmem>>, vector<16x32xf32>
    %cst_187 = arith.constant dense<0.000000e+00> : vector<16x32xf32>
    %465 = tpu.matmul %463, %464, %cst_187 {dimension_numbers = #tpu.dot_dimension_numbers<[1], [0], [0], [1], [0, 0, 1, 1], [], []>} : vector<16x16xf32>, vector<16x32xf32>, vector<16x32xf32> -> vector<16x32xf32>
    %466 = arith.addf %430, %465 : vector<16x32xf32>
    %c1416 = arith.constant 1416 : index
    %c0_188 = arith.constant 0 : index
    %467 = vector.load %arg1[%c1416, %c0_188] : memref<2336x64xf32, #tpu.memory_space<vmem>>, vector<1x32xf32>
    %468 = vector.broadcast %467 : vector<1x32xf32> to vector<16x32xf32>
    %469 = arith.addf %466, %468 : vector<16x32xf32>
    %470 = arith.addf %395, %469 : vector<16x32xf32>
    %c1424 = arith.constant 1424 : index
    %c0_189 = arith.constant 0 : index
    %471 = vector.load %arg1[%c1424, %c0_189] : memref<2336x64xf32, #tpu.memory_space<vmem>>, vector<1x32xf32>
    %c1432 = arith.constant 1432 : index
    %c0_190 = arith.constant 0 : index
    %472 = vector.load %arg1[%c1432, %c0_190] : memref<2336x64xf32, #tpu.memory_space<vmem>>, vector<1x32xf32>
    %cst_191 = arith.constant dense<0.000000e+00> : vector<16xf32>
    %473 = vector.multi_reduction <add>, %470, %cst_191 [1] : vector<16x32xf32> to vector<16xf32>
    %474 = vector.shape_cast %473 : vector<16xf32> to vector<16x1xf32>
    %cst_192 = arith.constant 3.200000e+01 : f32
    %475 = vector.broadcast %cst_192 : f32 to vector<16x1xf32>
    %476 = arith.divf %474, %475 : vector<16x1xf32>
    %477 = vector.broadcast %476 : vector<16x1xf32> to vector<16x32xf32>
    %478 = arith.subf %470, %477 : vector<16x32xf32>
    %479 = arith.mulf %478, %478 : vector<16x32xf32>
    %cst_193 = arith.constant dense<0.000000e+00> : vector<16xf32>
    %480 = vector.multi_reduction <add>, %479, %cst_193 [1] : vector<16x32xf32> to vector<16xf32>
    %481 = vector.shape_cast %480 : vector<16xf32> to vector<16x1xf32>
    %cst_194 = arith.constant 3.200000e+01 : f32
    %482 = vector.broadcast %cst_194 : f32 to vector<16x1xf32>
    %483 = arith.divf %481, %482 : vector<16x1xf32>
    %484 = vector.broadcast %476 : vector<16x1xf32> to vector<16x32xf32>
    %485 = arith.subf %470, %484 : vector<16x32xf32>
    %cst_195 = arith.constant 9.99999974E-6 : f32
    %486 = vector.broadcast %cst_195 : f32 to vector<16x1xf32>
    %487 = arith.addf %483, %486 : vector<16x1xf32>
    %488 = math.rsqrt %487 : vector<16x1xf32>
    %489 = vector.broadcast %488 : vector<16x1xf32> to vector<16x32xf32>
    %490 = arith.mulf %485, %489 : vector<16x32xf32>
    %491 = vector.broadcast %471 : vector<1x32xf32> to vector<16x32xf32>
    %492 = arith.mulf %490, %491 : vector<16x32xf32>
    %493 = vector.broadcast %472 : vector<1x32xf32> to vector<16x32xf32>
    %494 = arith.addf %492, %493 : vector<16x32xf32>
    %c1440 = arith.constant 1440 : index
    %c0_196 = arith.constant 0 : index
    %495 = vector.load %arg1[%c1440, %c0_196] : memref<2336x64xf32, #tpu.memory_space<vmem>>, vector<32x64xf32>
    %cst_197 = arith.constant dense<0.000000e+00> : vector<16x64xf32>
    %496 = tpu.matmul %494, %495, %cst_197 {dimension_numbers = #tpu.dot_dimension_numbers<[1], [0], [0], [1], [0, 0, 1, 1], [], []>} : vector<16x32xf32>, vector<32x64xf32>, vector<16x64xf32> -> vector<16x64xf32>
    %c1472 = arith.constant 1472 : index
    %c0_198 = arith.constant 0 : index
    %497 = vector.load %arg1[%c1472, %c0_198] : memref<2336x64xf32, #tpu.memory_space<vmem>>, vector<1x64xf32>
    %498 = vector.broadcast %497 : vector<1x64xf32> to vector<16x64xf32>
    %499 = arith.addf %496, %498 : vector<16x64xf32>
    %cst_199 = arith.constant 0.000000e+00 : f32
    %500 = vector.broadcast %cst_199 : f32 to vector<16x64xf32>
    %501 = arith.maximumf %499, %500 : vector<16x64xf32>
    %c1480 = arith.constant 1480 : index
    %c0_200 = arith.constant 0 : index
    %502 = vector.load %arg1[%c1480, %c0_200] : memref<2336x64xf32, #tpu.memory_space<vmem>>, vector<64x32xf32>
    %cst_201 = arith.constant dense<0.000000e+00> : vector<16x32xf32>
    %503 = tpu.matmul %501, %502, %cst_201 {dimension_numbers = #tpu.dot_dimension_numbers<[1], [0], [0], [1], [0, 0, 1, 1], [], []>} : vector<16x64xf32>, vector<64x32xf32>, vector<16x32xf32> -> vector<16x32xf32>
    %c1544 = arith.constant 1544 : index
    %c0_202 = arith.constant 0 : index
    %504 = vector.load %arg1[%c1544, %c0_202] : memref<2336x64xf32, #tpu.memory_space<vmem>>, vector<1x32xf32>
    %505 = vector.broadcast %504 : vector<1x32xf32> to vector<16x32xf32>
    %506 = arith.addf %503, %505 : vector<16x32xf32>
    %507 = arith.addf %494, %506 : vector<16x32xf32>
    %c1552 = arith.constant 1552 : index
    %c0_203 = arith.constant 0 : index
    %508 = vector.load %arg1[%c1552, %c0_203] : memref<2336x64xf32, #tpu.memory_space<vmem>>, vector<1x32xf32>
    %c1560 = arith.constant 1560 : index
    %c0_204 = arith.constant 0 : index
    %509 = vector.load %arg1[%c1560, %c0_204] : memref<2336x64xf32, #tpu.memory_space<vmem>>, vector<1x32xf32>
    %cst_205 = arith.constant dense<0.000000e+00> : vector<16xf32>
    %510 = vector.multi_reduction <add>, %507, %cst_205 [1] : vector<16x32xf32> to vector<16xf32>
    %511 = vector.shape_cast %510 : vector<16xf32> to vector<16x1xf32>
    %cst_206 = arith.constant 3.200000e+01 : f32
    %512 = vector.broadcast %cst_206 : f32 to vector<16x1xf32>
    %513 = arith.divf %511, %512 : vector<16x1xf32>
    %514 = vector.broadcast %513 : vector<16x1xf32> to vector<16x32xf32>
    %515 = arith.subf %507, %514 : vector<16x32xf32>
    %516 = arith.mulf %515, %515 : vector<16x32xf32>
    %cst_207 = arith.constant dense<0.000000e+00> : vector<16xf32>
    %517 = vector.multi_reduction <add>, %516, %cst_207 [1] : vector<16x32xf32> to vector<16xf32>
    %518 = vector.shape_cast %517 : vector<16xf32> to vector<16x1xf32>
    %cst_208 = arith.constant 3.200000e+01 : f32
    %519 = vector.broadcast %cst_208 : f32 to vector<16x1xf32>
    %520 = arith.divf %518, %519 : vector<16x1xf32>
    %521 = vector.broadcast %513 : vector<16x1xf32> to vector<16x32xf32>
    %522 = arith.subf %507, %521 : vector<16x32xf32>
    %cst_209 = arith.constant 9.99999974E-6 : f32
    %523 = vector.broadcast %cst_209 : f32 to vector<16x1xf32>
    %524 = arith.addf %520, %523 : vector<16x1xf32>
    %525 = math.rsqrt %524 : vector<16x1xf32>
    %526 = vector.broadcast %525 : vector<16x1xf32> to vector<16x32xf32>
    %527 = arith.mulf %522, %526 : vector<16x32xf32>
    %528 = vector.broadcast %508 : vector<1x32xf32> to vector<16x32xf32>
    %529 = arith.mulf %527, %528 : vector<16x32xf32>
    %530 = vector.broadcast %509 : vector<1x32xf32> to vector<16x32xf32>
    %531 = arith.addf %529, %530 : vector<16x32xf32>
    %c1568 = arith.constant 1568 : index
    %c0_210 = arith.constant 0 : index
    %532 = vector.load %arg1[%c1568, %c0_210] : memref<2336x64xf32, #tpu.memory_space<vmem>>, vector<32x16xf32>
    %cst_211 = arith.constant dense<0.000000e+00> : vector<16x16xf32>
    %533 = tpu.matmul %531, %532, %cst_211 {dimension_numbers = #tpu.dot_dimension_numbers<[1], [0], [0], [1], [0, 0, 1, 1], [], []>} : vector<16x32xf32>, vector<32x16xf32>, vector<16x16xf32> -> vector<16x16xf32>
    %c1680 = arith.constant 1680 : index
    %c0_212 = arith.constant 0 : index
    %534 = vector.load %arg1[%c1680, %c0_212] : memref<2336x64xf32, #tpu.memory_space<vmem>>, vector<1x16xf32>
    %535 = vector.broadcast %534 : vector<1x16xf32> to vector<16x16xf32>
    %536 = arith.addf %533, %535 : vector<16x16xf32>
    %c1600 = arith.constant 1600 : index
    %c0_213 = arith.constant 0 : index
    %537 = vector.load %arg1[%c1600, %c0_213] : memref<2336x64xf32, #tpu.memory_space<vmem>>, vector<32x16xf32>
    %cst_214 = arith.constant dense<0.000000e+00> : vector<16x16xf32>
    %538 = tpu.matmul %531, %537, %cst_214 {dimension_numbers = #tpu.dot_dimension_numbers<[1], [0], [0], [1], [0, 0, 1, 1], [], []>} : vector<16x32xf32>, vector<32x16xf32>, vector<16x16xf32> -> vector<16x16xf32>
    %c1688 = arith.constant 1688 : index
    %c0_215 = arith.constant 0 : index
    %539 = vector.load %arg1[%c1688, %c0_215] : memref<2336x64xf32, #tpu.memory_space<vmem>>, vector<1x16xf32>
    %540 = vector.broadcast %539 : vector<1x16xf32> to vector<16x16xf32>
    %541 = arith.addf %538, %540 : vector<16x16xf32>
    %c1632 = arith.constant 1632 : index
    %c0_216 = arith.constant 0 : index
    %542 = vector.load %arg1[%c1632, %c0_216] : memref<2336x64xf32, #tpu.memory_space<vmem>>, vector<32x16xf32>
    %cst_217 = arith.constant dense<0.000000e+00> : vector<16x16xf32>
    %543 = tpu.matmul %531, %542, %cst_217 {dimension_numbers = #tpu.dot_dimension_numbers<[1], [0], [0], [1], [0, 0, 1, 1], [], []>} : vector<16x32xf32>, vector<32x16xf32>, vector<16x16xf32> -> vector<16x16xf32>
    %c1696 = arith.constant 1696 : index
    %c0_218 = arith.constant 0 : index
    %544 = vector.load %arg1[%c1696, %c0_218] : memref<2336x64xf32, #tpu.memory_space<vmem>>, vector<1x16xf32>
    %545 = vector.broadcast %544 : vector<1x16xf32> to vector<16x16xf32>
    %546 = arith.addf %543, %545 : vector<16x16xf32>
    %547 = vector.shape_cast %536 : vector<16x16xf32> to vector<2x8x16xf32>
    %548 = vector.shape_cast %541 : vector<16x16xf32> to vector<2x8x16xf32>
    %549 = vector.shape_cast %546 : vector<16x16xf32> to vector<2x8x16xf32>
    "tpu.trace_start"() <{level = 10 : i32, message = "bqd,bkd->bqk"}> : () -> ()
    %cst_219 = arith.constant dense<0.000000e+00> : vector<2x8x8xf32>
    %550 = tpu.matmul %547, %548, %cst_219 {dimension_numbers = #tpu.dot_dimension_numbers<[2], [2], [1], [1], [0, 0, 0, 1, 1, 1], [0], [0]>} : vector<2x8x16xf32>, vector<2x8x16xf32>, vector<2x8x8xf32> -> vector<2x8x8xf32>
    "tpu.trace_stop"() : () -> ()
    %cst_220 = arith.constant 2.500000e-01 : f32
    %551 = vector.broadcast %cst_220 : f32 to vector<2x8x8xf32>
    %552 = arith.mulf %550, %551 : vector<2x8x8xf32>
    %cst_221 = arith.constant dense<0xFF800000> : vector<2x8xf32>
    %553 = vector.multi_reduction <maximumf>, %552, %cst_221 [2] : vector<2x8x8xf32> to vector<2x8xf32>
    %554 = vector.shape_cast %553 : vector<2x8xf32> to vector<2x8x1xf32>
    %555 = vector.broadcast %554 : vector<2x8x1xf32> to vector<2x8x8xf32>
    %556 = arith.subf %552, %555 : vector<2x8x8xf32>
    %557 = math.exp %556 : vector<2x8x8xf32>
    %cst_222 = arith.constant dense<0.000000e+00> : vector<2x8xf32>
    %558 = vector.multi_reduction <add>, %557, %cst_222 [2] : vector<2x8x8xf32> to vector<2x8xf32>
    %559 = vector.shape_cast %558 : vector<2x8xf32> to vector<2x8x1xf32>
    %560 = tpu.reciprocal %559 {approx = true} : vector<2x8x1xf32> -> vector<2x8x1xf32>
    %561 = vector.broadcast %560 : vector<2x8x1xf32> to vector<2x8x8xf32>
    %562 = arith.mulf %557, %561 : vector<2x8x8xf32>
    "tpu.trace_start"() <{level = 10 : i32, message = "bqk,bkd->bqd"}> : () -> ()
    %cst_223 = arith.constant dense<0.000000e+00> : vector<2x8x16xf32>
    %563 = tpu.matmul %562, %549, %cst_223 {dimension_numbers = #tpu.dot_dimension_numbers<[2], [1], [1], [2], [0, 0, 0, 1, 1, 2], [0], [0]>} : vector<2x8x8xf32>, vector<2x8x16xf32>, vector<2x8x16xf32> -> vector<2x8x16xf32>
    "tpu.trace_stop"() : () -> ()
    %564 = vector.shape_cast %563 : vector<2x8x16xf32> to vector<16x16xf32>
    %c1664 = arith.constant 1664 : index
    %c0_224 = arith.constant 0 : index
    %565 = vector.load %arg1[%c1664, %c0_224] : memref<2336x64xf32, #tpu.memory_space<vmem>>, vector<16x32xf32>
    %cst_225 = arith.constant dense<0.000000e+00> : vector<16x32xf32>
    %566 = tpu.matmul %564, %565, %cst_225 {dimension_numbers = #tpu.dot_dimension_numbers<[1], [0], [0], [1], [0, 0, 1, 1], [], []>} : vector<16x16xf32>, vector<16x32xf32>, vector<16x32xf32> -> vector<16x32xf32>
    %c1704 = arith.constant 1704 : index
    %c0_226 = arith.constant 0 : index
    %567 = vector.load %arg1[%c1704, %c0_226] : memref<2336x64xf32, #tpu.memory_space<vmem>>, vector<32x16xf32>
    %cst_227 = arith.constant dense<0.000000e+00> : vector<16x16xf32>
    %568 = tpu.matmul %531, %567, %cst_227 {dimension_numbers = #tpu.dot_dimension_numbers<[1], [0], [0], [1], [0, 0, 1, 1], [], []>} : vector<16x32xf32>, vector<32x16xf32>, vector<16x16xf32> -> vector<16x16xf32>
    %c1816 = arith.constant 1816 : index
    %c0_228 = arith.constant 0 : index
    %569 = vector.load %arg1[%c1816, %c0_228] : memref<2336x64xf32, #tpu.memory_space<vmem>>, vector<1x16xf32>
    %570 = vector.broadcast %569 : vector<1x16xf32> to vector<16x16xf32>
    %571 = arith.addf %568, %570 : vector<16x16xf32>
    %c1736 = arith.constant 1736 : index
    %c0_229 = arith.constant 0 : index
    %572 = vector.load %arg1[%c1736, %c0_229] : memref<2336x64xf32, #tpu.memory_space<vmem>>, vector<32x16xf32>
    %cst_230 = arith.constant dense<0.000000e+00> : vector<16x16xf32>
    %573 = tpu.matmul %531, %572, %cst_230 {dimension_numbers = #tpu.dot_dimension_numbers<[1], [0], [0], [1], [0, 0, 1, 1], [], []>} : vector<16x32xf32>, vector<32x16xf32>, vector<16x16xf32> -> vector<16x16xf32>
    %c1824 = arith.constant 1824 : index
    %c0_231 = arith.constant 0 : index
    %574 = vector.load %arg1[%c1824, %c0_231] : memref<2336x64xf32, #tpu.memory_space<vmem>>, vector<1x16xf32>
    %575 = vector.broadcast %574 : vector<1x16xf32> to vector<16x16xf32>
    %576 = arith.addf %573, %575 : vector<16x16xf32>
    %c1768 = arith.constant 1768 : index
    %c0_232 = arith.constant 0 : index
    %577 = vector.load %arg1[%c1768, %c0_232] : memref<2336x64xf32, #tpu.memory_space<vmem>>, vector<32x16xf32>
    %cst_233 = arith.constant dense<0.000000e+00> : vector<16x16xf32>
    %578 = tpu.matmul %531, %577, %cst_233 {dimension_numbers = #tpu.dot_dimension_numbers<[1], [0], [0], [1], [0, 0, 1, 1], [], []>} : vector<16x32xf32>, vector<32x16xf32>, vector<16x16xf32> -> vector<16x16xf32>
    %c1832 = arith.constant 1832 : index
    %c0_234 = arith.constant 0 : index
    %579 = vector.load %arg1[%c1832, %c0_234] : memref<2336x64xf32, #tpu.memory_space<vmem>>, vector<1x16xf32>
    %580 = vector.broadcast %579 : vector<1x16xf32> to vector<16x16xf32>
    %581 = arith.addf %578, %580 : vector<16x16xf32>
    %582 = vector.shape_cast %571 : vector<16x16xf32> to vector<2x8x16xf32>
    %583 = vector.shape_cast %576 : vector<16x16xf32> to vector<2x8x16xf32>
    %584 = vector.shape_cast %581 : vector<16x16xf32> to vector<2x8x16xf32>
    "tpu.trace_start"() <{level = 10 : i32, message = "bqd,bkd->bqk"}> : () -> ()
    %cst_235 = arith.constant dense<0.000000e+00> : vector<2x8x8xf32>
    %585 = tpu.matmul %582, %583, %cst_235 {dimension_numbers = #tpu.dot_dimension_numbers<[2], [2], [1], [1], [0, 0, 0, 1, 1, 1], [0], [0]>} : vector<2x8x16xf32>, vector<2x8x16xf32>, vector<2x8x8xf32> -> vector<2x8x8xf32>
    "tpu.trace_stop"() : () -> ()
    %cst_236 = arith.constant 2.500000e-01 : f32
    %586 = vector.broadcast %cst_236 : f32 to vector<2x8x8xf32>
    %587 = arith.mulf %585, %586 : vector<2x8x8xf32>
    %cst_237 = arith.constant dense<0xFF800000> : vector<2x8xf32>
    %588 = vector.multi_reduction <maximumf>, %587, %cst_237 [2] : vector<2x8x8xf32> to vector<2x8xf32>
    %589 = vector.shape_cast %588 : vector<2x8xf32> to vector<2x8x1xf32>
    %590 = vector.broadcast %589 : vector<2x8x1xf32> to vector<2x8x8xf32>
    %591 = arith.subf %587, %590 : vector<2x8x8xf32>
    %592 = math.exp %591 : vector<2x8x8xf32>
    %cst_238 = arith.constant dense<0.000000e+00> : vector<2x8xf32>
    %593 = vector.multi_reduction <add>, %592, %cst_238 [2] : vector<2x8x8xf32> to vector<2x8xf32>
    %594 = vector.shape_cast %593 : vector<2x8xf32> to vector<2x8x1xf32>
    %595 = tpu.reciprocal %594 {approx = true} : vector<2x8x1xf32> -> vector<2x8x1xf32>
    %596 = vector.broadcast %595 : vector<2x8x1xf32> to vector<2x8x8xf32>
    %597 = arith.mulf %592, %596 : vector<2x8x8xf32>
    "tpu.trace_start"() <{level = 10 : i32, message = "bqk,bkd->bqd"}> : () -> ()
    %cst_239 = arith.constant dense<0.000000e+00> : vector<2x8x16xf32>
    %598 = tpu.matmul %597, %584, %cst_239 {dimension_numbers = #tpu.dot_dimension_numbers<[2], [1], [1], [2], [0, 0, 0, 1, 1, 2], [0], [0]>} : vector<2x8x8xf32>, vector<2x8x16xf32>, vector<2x8x16xf32> -> vector<2x8x16xf32>
    "tpu.trace_stop"() : () -> ()
    %599 = vector.shape_cast %598 : vector<2x8x16xf32> to vector<16x16xf32>
    %c1800 = arith.constant 1800 : index
    %c0_240 = arith.constant 0 : index
    %600 = vector.load %arg1[%c1800, %c0_240] : memref<2336x64xf32, #tpu.memory_space<vmem>>, vector<16x32xf32>
    %cst_241 = arith.constant dense<0.000000e+00> : vector<16x32xf32>
    %601 = tpu.matmul %599, %600, %cst_241 {dimension_numbers = #tpu.dot_dimension_numbers<[1], [0], [0], [1], [0, 0, 1, 1], [], []>} : vector<16x16xf32>, vector<16x32xf32>, vector<16x32xf32> -> vector<16x32xf32>
    %602 = arith.addf %566, %601 : vector<16x32xf32>
    %c1840 = arith.constant 1840 : index
    %c0_242 = arith.constant 0 : index
    %603 = vector.load %arg1[%c1840, %c0_242] : memref<2336x64xf32, #tpu.memory_space<vmem>>, vector<1x32xf32>
    %604 = vector.broadcast %603 : vector<1x32xf32> to vector<16x32xf32>
    %605 = arith.addf %602, %604 : vector<16x32xf32>
    %606 = arith.addf %531, %605 : vector<16x32xf32>
    %c1848 = arith.constant 1848 : index
    %c0_243 = arith.constant 0 : index
    %607 = vector.load %arg1[%c1848, %c0_243] : memref<2336x64xf32, #tpu.memory_space<vmem>>, vector<1x32xf32>
    %c1856 = arith.constant 1856 : index
    %c0_244 = arith.constant 0 : index
    %608 = vector.load %arg1[%c1856, %c0_244] : memref<2336x64xf32, #tpu.memory_space<vmem>>, vector<1x32xf32>
    %cst_245 = arith.constant dense<0.000000e+00> : vector<16xf32>
    %609 = vector.multi_reduction <add>, %606, %cst_245 [1] : vector<16x32xf32> to vector<16xf32>
    %610 = vector.shape_cast %609 : vector<16xf32> to vector<16x1xf32>
    %cst_246 = arith.constant 3.200000e+01 : f32
    %611 = vector.broadcast %cst_246 : f32 to vector<16x1xf32>
    %612 = arith.divf %610, %611 : vector<16x1xf32>
    %613 = vector.broadcast %612 : vector<16x1xf32> to vector<16x32xf32>
    %614 = arith.subf %606, %613 : vector<16x32xf32>
    %615 = arith.mulf %614, %614 : vector<16x32xf32>
    %cst_247 = arith.constant dense<0.000000e+00> : vector<16xf32>
    %616 = vector.multi_reduction <add>, %615, %cst_247 [1] : vector<16x32xf32> to vector<16xf32>
    %617 = vector.shape_cast %616 : vector<16xf32> to vector<16x1xf32>
    %cst_248 = arith.constant 3.200000e+01 : f32
    %618 = vector.broadcast %cst_248 : f32 to vector<16x1xf32>
    %619 = arith.divf %617, %618 : vector<16x1xf32>
    %620 = vector.broadcast %612 : vector<16x1xf32> to vector<16x32xf32>
    %621 = arith.subf %606, %620 : vector<16x32xf32>
    %cst_249 = arith.constant 9.99999974E-6 : f32
    %622 = vector.broadcast %cst_249 : f32 to vector<16x1xf32>
    %623 = arith.addf %619, %622 : vector<16x1xf32>
    %624 = math.rsqrt %623 : vector<16x1xf32>
    %625 = vector.broadcast %624 : vector<16x1xf32> to vector<16x32xf32>
    %626 = arith.mulf %621, %625 : vector<16x32xf32>
    %627 = vector.broadcast %607 : vector<1x32xf32> to vector<16x32xf32>
    %628 = arith.mulf %626, %627 : vector<16x32xf32>
    %629 = vector.broadcast %608 : vector<1x32xf32> to vector<16x32xf32>
    %630 = arith.addf %628, %629 : vector<16x32xf32>
    %c1864 = arith.constant 1864 : index
    %c0_250 = arith.constant 0 : index
    %631 = vector.load %arg1[%c1864, %c0_250] : memref<2336x64xf32, #tpu.memory_space<vmem>>, vector<32x16xf32>
    %cst_251 = arith.constant dense<0.000000e+00> : vector<16x16xf32>
    %632 = tpu.matmul %630, %631, %cst_251 {dimension_numbers = #tpu.dot_dimension_numbers<[1], [0], [0], [1], [0, 0, 1, 1], [], []>} : vector<16x32xf32>, vector<32x16xf32>, vector<16x16xf32> -> vector<16x16xf32>
    %c1976 = arith.constant 1976 : index
    %c0_252 = arith.constant 0 : index
    %633 = vector.load %arg1[%c1976, %c0_252] : memref<2336x64xf32, #tpu.memory_space<vmem>>, vector<1x16xf32>
    %634 = vector.broadcast %633 : vector<1x16xf32> to vector<16x16xf32>
    %635 = arith.addf %632, %634 : vector<16x16xf32>
    %c1896 = arith.constant 1896 : index
    %c0_253 = arith.constant 0 : index
    %636 = vector.load %arg1[%c1896, %c0_253] : memref<2336x64xf32, #tpu.memory_space<vmem>>, vector<32x16xf32>
    %cst_254 = arith.constant dense<0.000000e+00> : vector<16x16xf32>
    %637 = tpu.matmul %296, %636, %cst_254 {dimension_numbers = #tpu.dot_dimension_numbers<[1], [0], [0], [1], [0, 0, 1, 1], [], []>} : vector<16x32xf32>, vector<32x16xf32>, vector<16x16xf32> -> vector<16x16xf32>
    %c1984 = arith.constant 1984 : index
    %c0_255 = arith.constant 0 : index
    %638 = vector.load %arg1[%c1984, %c0_255] : memref<2336x64xf32, #tpu.memory_space<vmem>>, vector<1x16xf32>
    %639 = vector.broadcast %638 : vector<1x16xf32> to vector<16x16xf32>
    %640 = arith.addf %637, %639 : vector<16x16xf32>
    %c1928 = arith.constant 1928 : index
    %c0_256 = arith.constant 0 : index
    %641 = vector.load %arg1[%c1928, %c0_256] : memref<2336x64xf32, #tpu.memory_space<vmem>>, vector<32x16xf32>
    %cst_257 = arith.constant dense<0.000000e+00> : vector<16x16xf32>
    %642 = tpu.matmul %296, %641, %cst_257 {dimension_numbers = #tpu.dot_dimension_numbers<[1], [0], [0], [1], [0, 0, 1, 1], [], []>} : vector<16x32xf32>, vector<32x16xf32>, vector<16x16xf32> -> vector<16x16xf32>
    %c1992 = arith.constant 1992 : index
    %c0_258 = arith.constant 0 : index
    %643 = vector.load %arg1[%c1992, %c0_258] : memref<2336x64xf32, #tpu.memory_space<vmem>>, vector<1x16xf32>
    %644 = vector.broadcast %643 : vector<1x16xf32> to vector<16x16xf32>
    %645 = arith.addf %642, %644 : vector<16x16xf32>
    %646 = vector.shape_cast %635 : vector<16x16xf32> to vector<2x8x16xf32>
    %647 = vector.shape_cast %640 : vector<16x16xf32> to vector<2x8x16xf32>
    %648 = vector.shape_cast %645 : vector<16x16xf32> to vector<2x8x16xf32>
    "tpu.trace_start"() <{level = 10 : i32, message = "bqd,bkd->bqk"}> : () -> ()
    %cst_259 = arith.constant dense<0.000000e+00> : vector<2x8x8xf32>
    %649 = tpu.matmul %646, %647, %cst_259 {dimension_numbers = #tpu.dot_dimension_numbers<[2], [2], [1], [1], [0, 0, 0, 1, 1, 1], [0], [0]>} : vector<2x8x16xf32>, vector<2x8x16xf32>, vector<2x8x8xf32> -> vector<2x8x8xf32>
    "tpu.trace_stop"() : () -> ()
    %cst_260 = arith.constant 2.500000e-01 : f32
    %650 = vector.broadcast %cst_260 : f32 to vector<2x8x8xf32>
    %651 = arith.mulf %649, %650 : vector<2x8x8xf32>
    %cst_261 = arith.constant dense<0xFF800000> : vector<2x8xf32>
    %652 = vector.multi_reduction <maximumf>, %651, %cst_261 [2] : vector<2x8x8xf32> to vector<2x8xf32>
    %653 = vector.shape_cast %652 : vector<2x8xf32> to vector<2x8x1xf32>
    %654 = vector.broadcast %653 : vector<2x8x1xf32> to vector<2x8x8xf32>
    %655 = arith.subf %651, %654 : vector<2x8x8xf32>
    %656 = math.exp %655 : vector<2x8x8xf32>
    %cst_262 = arith.constant dense<0.000000e+00> : vector<2x8xf32>
    %657 = vector.multi_reduction <add>, %656, %cst_262 [2] : vector<2x8x8xf32> to vector<2x8xf32>
    %658 = vector.shape_cast %657 : vector<2x8xf32> to vector<2x8x1xf32>
    %659 = tpu.reciprocal %658 {approx = true} : vector<2x8x1xf32> -> vector<2x8x1xf32>
    %660 = vector.broadcast %659 : vector<2x8x1xf32> to vector<2x8x8xf32>
    %661 = arith.mulf %656, %660 : vector<2x8x8xf32>
    "tpu.trace_start"() <{level = 10 : i32, message = "bqk,bkd->bqd"}> : () -> ()
    %cst_263 = arith.constant dense<0.000000e+00> : vector<2x8x16xf32>
    %662 = tpu.matmul %661, %648, %cst_263 {dimension_numbers = #tpu.dot_dimension_numbers<[2], [1], [1], [2], [0, 0, 0, 1, 1, 2], [0], [0]>} : vector<2x8x8xf32>, vector<2x8x16xf32>, vector<2x8x16xf32> -> vector<2x8x16xf32>
    "tpu.trace_stop"() : () -> ()
    %663 = vector.shape_cast %662 : vector<2x8x16xf32> to vector<16x16xf32>
    %c1960 = arith.constant 1960 : index
    %c0_264 = arith.constant 0 : index
    %664 = vector.load %arg1[%c1960, %c0_264] : memref<2336x64xf32, #tpu.memory_space<vmem>>, vector<16x32xf32>
    %cst_265 = arith.constant dense<0.000000e+00> : vector<16x32xf32>
    %665 = tpu.matmul %663, %664, %cst_265 {dimension_numbers = #tpu.dot_dimension_numbers<[1], [0], [0], [1], [0, 0, 1, 1], [], []>} : vector<16x16xf32>, vector<16x32xf32>, vector<16x32xf32> -> vector<16x32xf32>
    %c2000 = arith.constant 2000 : index
    %c0_266 = arith.constant 0 : index
    %666 = vector.load %arg1[%c2000, %c0_266] : memref<2336x64xf32, #tpu.memory_space<vmem>>, vector<32x16xf32>
    %cst_267 = arith.constant dense<0.000000e+00> : vector<16x16xf32>
    %667 = tpu.matmul %630, %666, %cst_267 {dimension_numbers = #tpu.dot_dimension_numbers<[1], [0], [0], [1], [0, 0, 1, 1], [], []>} : vector<16x32xf32>, vector<32x16xf32>, vector<16x16xf32> -> vector<16x16xf32>
    %c2112 = arith.constant 2112 : index
    %c0_268 = arith.constant 0 : index
    %668 = vector.load %arg1[%c2112, %c0_268] : memref<2336x64xf32, #tpu.memory_space<vmem>>, vector<1x16xf32>
    %669 = vector.broadcast %668 : vector<1x16xf32> to vector<16x16xf32>
    %670 = arith.addf %667, %669 : vector<16x16xf32>
    %c2032 = arith.constant 2032 : index
    %c0_269 = arith.constant 0 : index
    %671 = vector.load %arg1[%c2032, %c0_269] : memref<2336x64xf32, #tpu.memory_space<vmem>>, vector<32x16xf32>
    %cst_270 = arith.constant dense<0.000000e+00> : vector<16x16xf32>
    %672 = tpu.matmul %296, %671, %cst_270 {dimension_numbers = #tpu.dot_dimension_numbers<[1], [0], [0], [1], [0, 0, 1, 1], [], []>} : vector<16x32xf32>, vector<32x16xf32>, vector<16x16xf32> -> vector<16x16xf32>
    %c2120 = arith.constant 2120 : index
    %c0_271 = arith.constant 0 : index
    %673 = vector.load %arg1[%c2120, %c0_271] : memref<2336x64xf32, #tpu.memory_space<vmem>>, vector<1x16xf32>
    %674 = vector.broadcast %673 : vector<1x16xf32> to vector<16x16xf32>
    %675 = arith.addf %672, %674 : vector<16x16xf32>
    %c2064 = arith.constant 2064 : index
    %c0_272 = arith.constant 0 : index
    %676 = vector.load %arg1[%c2064, %c0_272] : memref<2336x64xf32, #tpu.memory_space<vmem>>, vector<32x16xf32>
    %cst_273 = arith.constant dense<0.000000e+00> : vector<16x16xf32>
    %677 = tpu.matmul %296, %676, %cst_273 {dimension_numbers = #tpu.dot_dimension_numbers<[1], [0], [0], [1], [0, 0, 1, 1], [], []>} : vector<16x32xf32>, vector<32x16xf32>, vector<16x16xf32> -> vector<16x16xf32>
    %c2128 = arith.constant 2128 : index
    %c0_274 = arith.constant 0 : index
    %678 = vector.load %arg1[%c2128, %c0_274] : memref<2336x64xf32, #tpu.memory_space<vmem>>, vector<1x16xf32>
    %679 = vector.broadcast %678 : vector<1x16xf32> to vector<16x16xf32>
    %680 = arith.addf %677, %679 : vector<16x16xf32>
    %681 = vector.shape_cast %670 : vector<16x16xf32> to vector<2x8x16xf32>
    %682 = vector.shape_cast %675 : vector<16x16xf32> to vector<2x8x16xf32>
    %683 = vector.shape_cast %680 : vector<16x16xf32> to vector<2x8x16xf32>
    "tpu.trace_start"() <{level = 10 : i32, message = "bqd,bkd->bqk"}> : () -> ()
    %cst_275 = arith.constant dense<0.000000e+00> : vector<2x8x8xf32>
    %684 = tpu.matmul %681, %682, %cst_275 {dimension_numbers = #tpu.dot_dimension_numbers<[2], [2], [1], [1], [0, 0, 0, 1, 1, 1], [0], [0]>} : vector<2x8x16xf32>, vector<2x8x16xf32>, vector<2x8x8xf32> -> vector<2x8x8xf32>
    "tpu.trace_stop"() : () -> ()
    %cst_276 = arith.constant 2.500000e-01 : f32
    %685 = vector.broadcast %cst_276 : f32 to vector<2x8x8xf32>
    %686 = arith.mulf %684, %685 : vector<2x8x8xf32>
    %cst_277 = arith.constant dense<0xFF800000> : vector<2x8xf32>
    %687 = vector.multi_reduction <maximumf>, %686, %cst_277 [2] : vector<2x8x8xf32> to vector<2x8xf32>
    %688 = vector.shape_cast %687 : vector<2x8xf32> to vector<2x8x1xf32>
    %689 = vector.broadcast %688 : vector<2x8x1xf32> to vector<2x8x8xf32>
    %690 = arith.subf %686, %689 : vector<2x8x8xf32>
    %691 = math.exp %690 : vector<2x8x8xf32>
    %cst_278 = arith.constant dense<0.000000e+00> : vector<2x8xf32>
    %692 = vector.multi_reduction <add>, %691, %cst_278 [2] : vector<2x8x8xf32> to vector<2x8xf32>
    %693 = vector.shape_cast %692 : vector<2x8xf32> to vector<2x8x1xf32>
    %694 = tpu.reciprocal %693 {approx = true} : vector<2x8x1xf32> -> vector<2x8x1xf32>
    %695 = vector.broadcast %694 : vector<2x8x1xf32> to vector<2x8x8xf32>
    %696 = arith.mulf %691, %695 : vector<2x8x8xf32>
    "tpu.trace_start"() <{level = 10 : i32, message = "bqk,bkd->bqd"}> : () -> ()
    %cst_279 = arith.constant dense<0.000000e+00> : vector<2x8x16xf32>
    %697 = tpu.matmul %696, %683, %cst_279 {dimension_numbers = #tpu.dot_dimension_numbers<[2], [1], [1], [2], [0, 0, 0, 1, 1, 2], [0], [0]>} : vector<2x8x8xf32>, vector<2x8x16xf32>, vector<2x8x16xf32> -> vector<2x8x16xf32>
    "tpu.trace_stop"() : () -> ()
    %698 = vector.shape_cast %697 : vector<2x8x16xf32> to vector<16x16xf32>
    %c2096 = arith.constant 2096 : index
    %c0_280 = arith.constant 0 : index
    %699 = vector.load %arg1[%c2096, %c0_280] : memref<2336x64xf32, #tpu.memory_space<vmem>>, vector<16x32xf32>
    %cst_281 = arith.constant dense<0.000000e+00> : vector<16x32xf32>
    %700 = tpu.matmul %698, %699, %cst_281 {dimension_numbers = #tpu.dot_dimension_numbers<[1], [0], [0], [1], [0, 0, 1, 1], [], []>} : vector<16x16xf32>, vector<16x32xf32>, vector<16x32xf32> -> vector<16x32xf32>
    %701 = arith.addf %665, %700 : vector<16x32xf32>
    %c2136 = arith.constant 2136 : index
    %c0_282 = arith.constant 0 : index
    %702 = vector.load %arg1[%c2136, %c0_282] : memref<2336x64xf32, #tpu.memory_space<vmem>>, vector<1x32xf32>
    %703 = vector.broadcast %702 : vector<1x32xf32> to vector<16x32xf32>
    %704 = arith.addf %701, %703 : vector<16x32xf32>
    %705 = arith.addf %630, %704 : vector<16x32xf32>
    %c2144 = arith.constant 2144 : index
    %c0_283 = arith.constant 0 : index
    %706 = vector.load %arg1[%c2144, %c0_283] : memref<2336x64xf32, #tpu.memory_space<vmem>>, vector<1x32xf32>
    %c2152 = arith.constant 2152 : index
    %c0_284 = arith.constant 0 : index
    %707 = vector.load %arg1[%c2152, %c0_284] : memref<2336x64xf32, #tpu.memory_space<vmem>>, vector<1x32xf32>
    %cst_285 = arith.constant dense<0.000000e+00> : vector<16xf32>
    %708 = vector.multi_reduction <add>, %705, %cst_285 [1] : vector<16x32xf32> to vector<16xf32>
    %709 = vector.shape_cast %708 : vector<16xf32> to vector<16x1xf32>
    %cst_286 = arith.constant 3.200000e+01 : f32
    %710 = vector.broadcast %cst_286 : f32 to vector<16x1xf32>
    %711 = arith.divf %709, %710 : vector<16x1xf32>
    %712 = vector.broadcast %711 : vector<16x1xf32> to vector<16x32xf32>
    %713 = arith.subf %705, %712 : vector<16x32xf32>
    %714 = arith.mulf %713, %713 : vector<16x32xf32>
    %cst_287 = arith.constant dense<0.000000e+00> : vector<16xf32>
    %715 = vector.multi_reduction <add>, %714, %cst_287 [1] : vector<16x32xf32> to vector<16xf32>
    %716 = vector.shape_cast %715 : vector<16xf32> to vector<16x1xf32>
    %cst_288 = arith.constant 3.200000e+01 : f32
    %717 = vector.broadcast %cst_288 : f32 to vector<16x1xf32>
    %718 = arith.divf %716, %717 : vector<16x1xf32>
    %719 = vector.broadcast %711 : vector<16x1xf32> to vector<16x32xf32>
    %720 = arith.subf %705, %719 : vector<16x32xf32>
    %cst_289 = arith.constant 9.99999974E-6 : f32
    %721 = vector.broadcast %cst_289 : f32 to vector<16x1xf32>
    %722 = arith.addf %718, %721 : vector<16x1xf32>
    %723 = math.rsqrt %722 : vector<16x1xf32>
    %724 = vector.broadcast %723 : vector<16x1xf32> to vector<16x32xf32>
    %725 = arith.mulf %720, %724 : vector<16x32xf32>
    %726 = vector.broadcast %706 : vector<1x32xf32> to vector<16x32xf32>
    %727 = arith.mulf %725, %726 : vector<16x32xf32>
    %728 = vector.broadcast %707 : vector<1x32xf32> to vector<16x32xf32>
    %729 = arith.addf %727, %728 : vector<16x32xf32>
    %c2160 = arith.constant 2160 : index
    %c0_290 = arith.constant 0 : index
    %730 = vector.load %arg1[%c2160, %c0_290] : memref<2336x64xf32, #tpu.memory_space<vmem>>, vector<32x64xf32>
    %cst_291 = arith.constant dense<0.000000e+00> : vector<16x64xf32>
    %731 = tpu.matmul %729, %730, %cst_291 {dimension_numbers = #tpu.dot_dimension_numbers<[1], [0], [0], [1], [0, 0, 1, 1], [], []>} : vector<16x32xf32>, vector<32x64xf32>, vector<16x64xf32> -> vector<16x64xf32>
    %c2192 = arith.constant 2192 : index
    %c0_292 = arith.constant 0 : index
    %732 = vector.load %arg1[%c2192, %c0_292] : memref<2336x64xf32, #tpu.memory_space<vmem>>, vector<1x64xf32>
    %733 = vector.broadcast %732 : vector<1x64xf32> to vector<16x64xf32>
    %734 = arith.addf %731, %733 : vector<16x64xf32>
    %cst_293 = arith.constant 0.000000e+00 : f32
    %735 = vector.broadcast %cst_293 : f32 to vector<16x64xf32>
    %736 = arith.maximumf %734, %735 : vector<16x64xf32>
    %c2200 = arith.constant 2200 : index
    %c0_294 = arith.constant 0 : index
    %737 = vector.load %arg1[%c2200, %c0_294] : memref<2336x64xf32, #tpu.memory_space<vmem>>, vector<64x32xf32>
    %cst_295 = arith.constant dense<0.000000e+00> : vector<16x32xf32>
    %738 = tpu.matmul %736, %737, %cst_295 {dimension_numbers = #tpu.dot_dimension_numbers<[1], [0], [0], [1], [0, 0, 1, 1], [], []>} : vector<16x64xf32>, vector<64x32xf32>, vector<16x32xf32> -> vector<16x32xf32>
    %c2264 = arith.constant 2264 : index
    %c0_296 = arith.constant 0 : index
    %739 = vector.load %arg1[%c2264, %c0_296] : memref<2336x64xf32, #tpu.memory_space<vmem>>, vector<1x32xf32>
    %740 = vector.broadcast %739 : vector<1x32xf32> to vector<16x32xf32>
    %741 = arith.addf %738, %740 : vector<16x32xf32>
    %742 = arith.addf %729, %741 : vector<16x32xf32>
    %c2272 = arith.constant 2272 : index
    %c0_297 = arith.constant 0 : index
    %743 = vector.load %arg1[%c2272, %c0_297] : memref<2336x64xf32, #tpu.memory_space<vmem>>, vector<1x32xf32>
    %c2280 = arith.constant 2280 : index
    %c0_298 = arith.constant 0 : index
    %744 = vector.load %arg1[%c2280, %c0_298] : memref<2336x64xf32, #tpu.memory_space<vmem>>, vector<1x32xf32>
    %cst_299 = arith.constant dense<0.000000e+00> : vector<16xf32>
    %745 = vector.multi_reduction <add>, %742, %cst_299 [1] : vector<16x32xf32> to vector<16xf32>
    %746 = vector.shape_cast %745 : vector<16xf32> to vector<16x1xf32>
    %cst_300 = arith.constant 3.200000e+01 : f32
    %747 = vector.broadcast %cst_300 : f32 to vector<16x1xf32>
    %748 = arith.divf %746, %747 : vector<16x1xf32>
    %749 = vector.broadcast %748 : vector<16x1xf32> to vector<16x32xf32>
    %750 = arith.subf %742, %749 : vector<16x32xf32>
    %751 = arith.mulf %750, %750 : vector<16x32xf32>
    %cst_301 = arith.constant dense<0.000000e+00> : vector<16xf32>
    %752 = vector.multi_reduction <add>, %751, %cst_301 [1] : vector<16x32xf32> to vector<16xf32>
    %753 = vector.shape_cast %752 : vector<16xf32> to vector<16x1xf32>
    %cst_302 = arith.constant 3.200000e+01 : f32
    %754 = vector.broadcast %cst_302 : f32 to vector<16x1xf32>
    %755 = arith.divf %753, %754 : vector<16x1xf32>
    %756 = vector.broadcast %748 : vector<16x1xf32> to vector<16x32xf32>
    %757 = arith.subf %742, %756 : vector<16x32xf32>
    %cst_303 = arith.constant 9.99999974E-6 : f32
    %758 = vector.broadcast %cst_303 : f32 to vector<16x1xf32>
    %759 = arith.addf %755, %758 : vector<16x1xf32>
    %760 = math.rsqrt %759 : vector<16x1xf32>
    %761 = vector.broadcast %760 : vector<16x1xf32> to vector<16x32xf32>
    %762 = arith.mulf %757, %761 : vector<16x32xf32>
    %763 = vector.broadcast %743 : vector<1x32xf32> to vector<16x32xf32>
    %764 = arith.mulf %762, %763 : vector<16x32xf32>
    %765 = vector.broadcast %744 : vector<1x32xf32> to vector<16x32xf32>
    %766 = arith.addf %764, %765 : vector<16x32xf32>
    %c2304 = arith.constant 2304 : index
    %c0_304 = arith.constant 0 : index
    %767 = vector.load %arg1[%c2304, %c0_304] : memref<2336x64xf32, #tpu.memory_space<vmem>>, vector<1x32xf32>
    %c2312 = arith.constant 2312 : index
    %c0_305 = arith.constant 0 : index
    %768 = vector.load %arg1[%c2312, %c0_305] : memref<2336x64xf32, #tpu.memory_space<vmem>>, vector<1x32xf32>
    %cst_306 = arith.constant dense<0.000000e+00> : vector<16xf32>
    %769 = vector.multi_reduction <add>, %766, %cst_306 [1] : vector<16x32xf32> to vector<16xf32>
    %770 = vector.shape_cast %769 : vector<16xf32> to vector<16x1xf32>
    %cst_307 = arith.constant 3.200000e+01 : f32
    %771 = vector.broadcast %cst_307 : f32 to vector<16x1xf32>
    %772 = arith.divf %770, %771 : vector<16x1xf32>
    %773 = vector.broadcast %772 : vector<16x1xf32> to vector<16x32xf32>
    %774 = arith.subf %766, %773 : vector<16x32xf32>
    %775 = arith.mulf %774, %774 : vector<16x32xf32>
    %cst_308 = arith.constant dense<0.000000e+00> : vector<16xf32>
    %776 = vector.multi_reduction <add>, %775, %cst_308 [1] : vector<16x32xf32> to vector<16xf32>
    %777 = vector.shape_cast %776 : vector<16xf32> to vector<16x1xf32>
    %cst_309 = arith.constant 3.200000e+01 : f32
    %778 = vector.broadcast %cst_309 : f32 to vector<16x1xf32>
    %779 = arith.divf %777, %778 : vector<16x1xf32>
    %780 = vector.broadcast %772 : vector<16x1xf32> to vector<16x32xf32>
    %781 = arith.subf %766, %780 : vector<16x32xf32>
    %cst_310 = arith.constant 9.99999974E-6 : f32
    %782 = vector.broadcast %cst_310 : f32 to vector<16x1xf32>
    %783 = arith.addf %779, %782 : vector<16x1xf32>
    %784 = math.rsqrt %783 : vector<16x1xf32>
    %785 = vector.broadcast %784 : vector<16x1xf32> to vector<16x32xf32>
    %786 = arith.mulf %781, %785 : vector<16x32xf32>
    %787 = vector.broadcast %767 : vector<1x32xf32> to vector<16x32xf32>
    %788 = arith.mulf %786, %787 : vector<16x32xf32>
    %789 = vector.broadcast %768 : vector<1x32xf32> to vector<16x32xf32>
    %790 = arith.addf %788, %789 : vector<16x32xf32>
    %791 = vector.shape_cast %790 : vector<16x32xf32> to vector<2x8x32xf32>
    %c2320 = arith.constant 2320 : index
    %c0_311 = arith.constant 0 : index
    %792 = vector.load %arg1[%c2320, %c0_311] : memref<2336x64xf32, #tpu.memory_space<vmem>>, vector<8x32xf32>
    %793 = vector.shape_cast %792 : vector<8x32xf32> to vector<1x8x32xf32>
    %794 = vector.broadcast %793 : vector<1x8x32xf32> to vector<2x8x32xf32>
    %795 = arith.mulf %791, %794 : vector<2x8x32xf32>
    %cst_312 = arith.constant dense<0.000000e+00> : vector<2x8xf32>
    %796 = vector.multi_reduction <add>, %795, %cst_312 [2] : vector<2x8x32xf32> to vector<2x8xf32>
    %cst_313 = arith.constant dense<0.000000e+00> : vector<2xf32>
    %797 = vector.multi_reduction <add>, %796, %cst_313 [1] : vector<2x8xf32> to vector<2xf32>
    %798 = vector.shape_cast %797 : vector<2xf32> to vector<2x1xf32>
    %c2328 = arith.constant 2328 : index
    %c0_314 = arith.constant 0 : index
    %799 = vector.load %arg1[%c2328, %c0_314] : memref<2336x64xf32, #tpu.memory_space<vmem>>, vector<1x1xf32>
    %800 = vector.broadcast %799 : vector<1x1xf32> to vector<2x1xf32>
    %801 = arith.addf %798, %800 : vector<2x1xf32>
    %c0_315 = arith.constant 0 : index
    %c0_316 = arith.constant 0 : index
    %802 = vector.load %arg2[%c0_315, %c0_316] : memref<2x1xf32, #tpu.memory_space<vmem>>, vector<2x1xf32>
    tpu.vector_store %arg2[%c0_315, %c0_316], %801 {strides = array<i32>} : memref<2x1xf32, #tpu.memory_space<vmem>>, vector<2x1xf32>,
    return
  }
}

</mosaic_0001>

<bundles_post_ra>
// kernel: transformer_forward.1
= control target key start
LH: loop header
LB: loop body
LE: loop exit
PB: predicated region body
PF: predicated region fallthrough
CT: control target
= control target key end

     0   :  { %vm22_vm0 = vcmask 261120   ;;  %v11379_v14 = vmov 0.0   ;;  %vm11380_vm1 = vmmov 0   ;;  %vm272_vm2 = vcmask 130048   ;;  %s12875_s1 = inlined_call_operand.vmem [shape: f32[2336,64], index: 1, kind: input, shape index: {}]   ;;  %s12876_s0 = inlined_call_operand.vmem [shape: f32[16,32], index: 0, kind: input, shape index: {}]   ;;  %s12877_s2 = inlined_call_operand.vmem [shape: f32[2,1], index: 2, kind: output, shape index: {}]  }
   0x1   :  { %v13_v0 = vld [vmem:[%s12875_s1] sm:$0xff]  ;;  %v14_v1 = vld [vmem:[%s12875_s1 + $0x8] sm:$0xff]  ;;  %v15_v2 = vld [vmem:[%s12875_s1 + $0x10] sm:$0xff]  ;;  %vm427_vm3 = vcmask 64512   ;;  %vm1491_vm4 = vcmask 523264   ;;  %vm9245_vm5 = vcmask 1041409  }
   0x2   :  { %v10787_v3 = vpack.c.bf16 %v14_v1, %v13_v0  ;;  %v16_v4 = vld [vmem:[%s12875_s1 + $0x18] sm:$0xff]  ;;  %v11411_v5 = vld [vmem:[%s12876_s0] sm:$0xff]  ;;  %v105_v8 = vld [vmem:[%s12875_s1 + $0x28] sm:$0xff]  ;;  %vm9248_vm6 = vcmask 58368   ;;  %vm9258_vm7 = vcmask 1024  }
   0x3   :  { %v10791_v6 = vpack.c.bf16 %v16_v4, %v15_v2  ;;  %9955 = vmatprep.mubr.msk.f32.mxu1 %vm22_vm0, %v11411_v5  ;;  %v104_v7 = vld [vmem:[%s12875_s1 + $0x20] sm:$0xff]  ;;  %9977 = vmatprep.mubr.msk.f32.mxu0 %vm22_vm0, %v11411_v5  ;;  %v106_v10 = vld [vmem:[%s12875_s1 + $0x30] sm:$0xff]  ;;  %v107_v11 = vld [vmem:[%s12875_s1 + $0x38] sm:$0xff] }
   0x4   :  { %10788 = vmatprep.subr.bf16.mxu1 %v10787_v3  ;;  %v10795_v9 = vpack.c.bf16 %v105_v8, %v104_v7  ;;  %v11432_v12 = vld [vmem:[%s12876_s0 + $0x8] sm:$0xff]  ;;  %v10799_v13 = vpack.c.bf16 %v107_v11, %v106_v10  ;;  %v9267_v17 = vld [vmem:[%s12875_s1 + $0x78] ss:$0 sm:$0xff]  ;;  %v9264_v20 = vld [vmem:[%s12875_s1 + $0x70] ss:$0 sm:$0xff] }
   0x5   :  { %10790 = vmatpush3.bf16.msra.mxu1 %v10787_v3  ;;  %v188_v25 = vld [vmem:[%s12875_s1 + $0x40] sm:$0xff]  ;;  %v189_v26 = vld [vmem:[%s12875_s1 + $0x48] sm:$0xff]  ;;  %v190_v27 = vld [vmem:[%s12875_s1 + $0x50] sm:$0xff] }
   0x6   :  { %10792 = vmatprep.subr.bf16.mxu1 %v10791_v6  ;;  %v10803_v28 = vpack.c.bf16 %v189_v26, %v188_v25  ;;  %v191_v29 = vld [vmem:[%s12875_s1 + $0x58] sm:$0xff]  ;;  %v9270_v50 = vld [vmem:[%s12875_s1 + $0x80] ss:$0 sm:$0xff]  ;;  %v682_v53 = vld [vmem:[%s12875_s1 + $0xa8] sm:$0xff] }
   0x7   :  { %v10807_v30 = vpack.c.bf16 %v191_v29, %v190_v27  ;;  %v683_v54 = vld [vmem:[%s12875_s1 + $0xb0] sm:$0xff]  ;;  %v598_v57 = vld [vmem:[%s12875_s1 + $0x88] sm:$0xff]  ;;  %v684_v62 = vld [vmem:[%s12875_s1 + $0xb8] sm:$0xff] }
   0x8   :  { %10804 = vmatprep.subr.bf16.mxu0 %v10803_v28  ;;  %v10819_v56 = vpack.c.bf16 %v683_v54, %v682_v53  ;;  %v599_v58 = vld [vmem:[%s12875_s1 + $0x90] sm:$0xff]  ;;  %v685_v63 = vld [vmem:[%s12875_s1 + $0xc0] sm:$0xff]  ;;  %v600_v3 = vld [vmem:[%s12875_s1 + $0x98] sm:$0xff] }
   0x9   :  { %10794 = vmatpush3.bf16.msra.mxu1 %v10791_v6  ;;  %10806 = vmatpush3.bf16.msra.mxu0 %v10803_v28  ;;  %v10811_v59 = vpack.c.bf16 %v599_v58, %v598_v57  ;;  %v10823_v2 = vpack.c.bf16 %v685_v63, %v684_v62  ;;  %v601_v4 = vld [vmem:[%s12875_s1 + $0xa0] sm:$0xff]  ;;  %v766_v25 = vld [vmem:[%s12875_s1 + $0xc8] sm:$0xff]  ;;  %v767_v26 = vld [vmem:[%s12875_s1 + $0xd0] sm:$0xff] }
   0xa   :  { %10796 = vmatprep.subr.bf16.mxu1 %v10795_v9  ;;  %10808 = vmatprep.subr.bf16.mxu0 %v10807_v30  ;;  %v10815_v8 = vpack.c.bf16 %v601_v4, %v600_v3  ;;  %v768_v27 = vld [vmem:[%s12875_s1 + $0xd8] sm:$0xff]  ;;  %v10827_v28 = vpack.c.bf16 %v767_v26, %v766_v25  ;;  %v769_v29 = vld [vmem:[%s12875_s1 + $0xe0] sm:$0xff] }
   0xb   :  { %v596_v63 = vld [vmem:[%s12875_s1 + $0x60] sm:$0xff] }
   0xc   :  { %9956 = vmatmul.mubr.msk.f32.vlgmr.msra.gmra.mrb[0].mxu1 %vm22_vm0, %v11432_v12 }
   0xd   :  { %10798 = vmatpush3.bf16.msra.mxu1 %v10795_v9  ;;  %9966 = vmatprep.mubr.msk.f32.mxu1 %vm22_vm0, %v11411_v5 }
   0xe   :  { %10800 = vmatprep.subr.bf16.mxu1 %v10799_v13  ;;  %10810 = vmatpush3.bf16.msra.mxu0 %v10807_v30  ;;  %v10831_v30 = vpack.c.bf16 %v769_v29, %v768_v27  ;;  %v1387_v27 = vld [vmem:[%s12875_s1 + $0x130] sm:$0xff]  ;;  %v1388_v29 = vld [vmem:[%s12875_s1 + $0x138] sm:$0xff] }
   0xf   :  { %9990 = vmatprep.subr.mxu0 %v11379_v14 }
  0x11   :  { %10802 = vmatpush3.bf16.msra.mxu1 %v10799_v13  ;;  %9978 = vmatmul.mubr.msk.f32.vlgmr.msra.gmra.mrb[0].mxu0 %vm22_vm0, %v11432_v12 }
  0x12   :  { %9980 = vmatprep.subr.mxu1 %v11379_v14  ;;  %9992 = vmatprep.mubr.msk.f32.mxu0 %vm11380_vm1, %v11379_v14 }
  0x14   :  { %9967 = vmatmul.mubr.msk.f32.vlgmr.msra.gmra.mrb[2].mxu1 %vm22_vm0, %v11432_v12 }
  0x15   :  { %9982 = vmatprep.mubr.msk.f32.mxu1 %vm11380_vm1, %v11379_v14 }
  0xdf   :  { %v9957_v15 = vpop.f32.mrb[0].mxu1 }
  0xe0   :  { %v95_v16 = vpop.f32.mrb[1].mxu1  ;;  %v101_v24 = vadd.f32 %v9957_v15, %v9264_v20  ;;  %v9282_v15 = vld [vmem:[%s12875_s1 + $0x100] ss:$0 sm:$0xff] }
  0xe1   :  { %v96_v22 = vadd.f32 %v9264_v20, %v95_v16 }
  0xe4   :  { %v9979_v49 = vpop.f32.mrb[0].mxu0 }
  0xe5   :  { %v269_v51 = vadd.f32 %v9979_v49, %v9270_v50  ;;  %v263_v52 = vpop.f32.mrb[1].mxu0 }
  0xe6   :  { %v264_v55 = vadd.f32 %v9270_v50, %v263_v52  ;;  %v9285_v50 = vld [vmem:[%s12875_s1 + $0x108] ss:$0 sm:$0xff] }
  0xe7   :  { %v9968_v18 = vpop.f32.mrb[2].mxu1 }
  0xe8   :  { %v179_v19 = vpop.f32.mrb[3].mxu1  ;;  %v185_v23 = vadd.f32 %v9968_v18, %v9267_v17  ;;  %9991 = vmatpush3.msra.mxu0 %v264_v55 }
  0xe9   :  { %v180_v21 = vadd.f32 %v9267_v17, %v179_v19  ;;  %10812 = vmatprep.subr.bf16.mxu0 %v10811_v59  ;;  %v9279_v19 = vld [vmem:[%s12875_s1 + $0xf8] ss:$0 sm:$0xff] }
  0xeb   :  { %9981 = vmatpush3.xpose.msk.msra.mxu1 %vm272_vm2, %v180_v21 }
  0xec   :  { %9985 = vmatprep.subr.mxu1 %v11379_v14 }
  0xee   :  { %9983 = vmatmul.mubr.msk.f32.vlgmr.msra.gmra.mrb[4].mxu1 %vm272_vm2, %v96_v22 }
  0xef   :  { %9986 = vmatpush3.xpose.msk.msra.mxu1 %vm272_vm2, %v185_v23  ;;  %9987 = vmatprep.mubr.msk.f32.mxu1 %vm11380_vm1, %v11379_v14 }
  0xf0   :  { %9995 = vmatprep.subr.mxu1 %v11379_v14 }
  0xf2   :  { %9988 = vmatmul.mubr.msk.f32.vlgmr.msra.gmra.mrb[6].mxu1 %vm272_vm2, %v101_v24 }
  0xf3   :  { %9997 = vmatprep.mubr.msk.f32.mxu1 %vm11380_vm1, %v11379_v14  ;;  %9996 = vmatpush3.msra.mxu1 %v269_v51 }
  0xf4   :  { %10820 = vmatprep.subr.bf16.mxu1 %v10819_v56 }
 0x1c1   :  { %v345_v31 = vpop.f32.mrb[4].mxu1 }
 0x1c2   :  { %v9984_v32 = vpop.f32.mrb[5].mxu1  ;;  %v425_v36 = vmul.f32 0.25, %v345_v31 }
 0x1c4   :  { %v428_v38 = vsel %vm427_vm3, %v425_v36, -inf }
 0x1c5   :  { %v421_v33 = vpop.f32.mrb[6].mxu1 }
 0x1c6   :  { %v426_v34 = vmul.f32 0.25, %v421_v33  ;;  %v9989_v35 = vpop.f32.mrb[7].mxu1 }
 0x1c8   :  { %v431_v37 = vsel %vm427_vm3, %v426_v34, -inf }
 0x1c9   :  { %432 = vmax.xlane.f32.xlu0 %v431_v37 }
 0x1cd   :  { %429 = vmax.xlane.f32.xlu0 %v428_v38 }
 0x256   :  { %v433_v39 = vpop.xlane.xlu0 %432 }
 0x257   :  { %v435_v40 = vsub.f32 %v426_v34, %v433_v39 }
 0x259   :  { %v438_v41 = vmul.f32 1.442695, %v435_v40 }
 0x25a   :  { %v430_v42 = vpop.xlane.xlu0 %429 }
 0x25b   :  { %11233 = vpow2.f32 %v438_v41  ;;  %v434_v43 = vsub.f32 %v425_v36, %v430_v42 }
 0x25d   :  { %v436_v44 = vmul.f32 1.442695, %v434_v43 }
 0x25f   :  { %11235 = vpow2.f32 %v436_v44 }
 0x265   :  { %v11234_v45 = vpop.eup %11233 }
 0x266   :  { %v443_v46 = vsel %vm427_vm3, %v11234_v45, 0.0 }
 0x267   :  { %444 = vadd.xlane.f32.xlu1 %v443_v46 }
 0x269   :  { %v11236_v47 = vpop.eup %11235 }
 0x26a   :  { %v440_v48 = vsel %vm427_vm3, %v11236_v47, 0.0 }
 0x26b   :  { %441 = vadd.xlane.f32.xlu1 %v440_v48 }
 0x2f4   :  { %v445_v60 = vpop.xlane.xlu1 %444 }
 0x2f5   :  { %11237 = vrcp.f32 %v445_v60  ;;  %v1172_v60 = vld [vmem:[%s12875_s1 + $0xe8] sm:$0xff] }
 0x2f8   :  { %v442_v61 = vpop.xlane.xlu1 %441 }
 0x2f9   :  { %11239 = vrcp.f32 %v442_v61  ;;  %v1173_v61 = vld [vmem:[%s12875_s1 + $0xf0] sm:$0xff] }
 0x2fa   :  { %v10835_v62 = vpack.c.bf16 %v1173_v61, %v1172_v60  ;;  %v9301_v60 = vld [vmem:[%s12875_s1 + $0x148] ss:$0 sm:$0xff] }
 0x2ff   :  { %v11238_v0 = vpop.eup %11237 }
 0x300   :  { %v449_v1 = vmul.f32 %v11238_v0, %v11234_v45  ;;  %v597_v0 = vld [vmem:[%s12875_s1 + $0x68] sm:$0xff] }
 0x302   :  { %9998 = vmatmul.mubr.msk.f32.vlgmr.msra.gmra.mrb[8].mxu1 %vm427_vm3, %v449_v1  ;;  %v10839_v1 = vpack.c.bf16 %v597_v0, %v596_v63 }
 0x303   :  { %v11240_v6 = vpop.eup %11239  ;;  %10822 = vmatpush3.bf16.msra.mxu1 %v10819_v56  ;;  %10019 = vmatprep.mubr.msk.f32.mxu1 %vm22_vm0, %v11411_v5 }
 0x304   :  { %v448_v7 = vmul.f32 %v11240_v6, %v11236_v47  ;;  %10824 = vmatprep.subr.bf16.mxu1 %v10823_v2 }
 0x306   :  { %9993 = vmatmul.mubr.msk.f32.vlgmr.msra.gmra.mrb[2].mxu0 %vm427_vm3, %v448_v7  ;;  %v9298_v7 = vld [vmem:[%s12875_s1 + $0x110] ss:$0 sm:$0xff] }
 0x307   :  { %10814 = vmatpush3.bf16.msra.mxu0 %v10811_v59  ;;  %10826 = vmatpush3.bf16.msra.mxu1 %v10823_v2 }
 0x308   :  { %10816 = vmatprep.subr.bf16.mxu0 %v10815_v8  ;;  %10008 = vmatprep.mubr.msk.f32.mxu0 %vm22_vm0, %v11411_v5 }
 0x309   :  { %10033 = vmatprep.subr.mxu1 %v11379_v14 }
 0x30a   :  { %10020 = vmatmul.mubr.msk.f32.vlgmr.msra.gmra.mrb[10].mxu1 %vm22_vm0, %v11432_v12 }
 0x30b   :  { %10818 = vmatpush3.bf16.msra.mxu0 %v10815_v8  ;;  %10035 = vmatprep.mubr.msk.f32.mxu1 %vm11380_vm1, %v11379_v14 }
 0x30c   :  { %10828 = vmatprep.subr.bf16.mxu0 %v10827_v28 }
 0x30e   :  { %10009 = vmatmul.mubr.msk.f32.vlgmr.msra.gmra.mrb[4].mxu0 %vm22_vm0, %v11432_v12 }
 0x30f   :  { %10030 = vmatprep.mubr.msk.f32.mxu0 %vm22_vm0, %v11411_v5  ;;  %10830 = vmatpush3.bf16.msra.mxu0 %v10827_v28 }
 0x310   :  { %10832 = vmatprep.subr.bf16.mxu0 %v10831_v30 }
 0x313   :  { %10834 = vmatpush3.bf16.msra.mxu0 %v10831_v30  ;;  %v1389_v30 = vld [vmem:[%s12875_s1 + $0x140] sm:$0xff] }
 0x314   :  { %10043 = vmatprep.subr.mxu0 %v11379_v14 }
 0x316   :  { %10031 = vmatmul.mubr.msk.f32.vlgmr.msra.gmra.mrb[6].mxu0 %vm22_vm0, %v11432_v12 }
 0x317   :  { %10045 = vmatprep.mubr.msk.f32.mxu0 %vm11380_vm1, %v11379_v14 }
 0x3d5   :  { %v11522_v9 = vpop.f32.mrb[8].mxu1 }
 0x3d6   :  { %v9999_v10 = vpop.f32.mrb[9].mxu1 }
 0x3d9   :  { %v11524_v11 = vpop.f32.mrb[2].mxu0 }
 0x3da   :  { %v9994_v13 = vpop.f32.mrb[3].mxu0 }
 0x3dd   :  { %v10021_v16 = vpop.f32.mrb[10].mxu1 }
 0x3de   :  { %v757_v17 = vpop.f32.mrb[11].mxu1  ;;  %v763_v23 = vadd.f32 %v10021_v16, %v9282_v15 }
 0x3df   :  { %v758_v18 = vadd.f32 %v9282_v15, %v757_v17 }
 0x3e1   :  { %v10010_v20 = vpop.f32.mrb[4].mxu0  ;;  %10034 = vmatpush3.xpose.msk.msra.mxu1 %vm272_vm2, %v758_v18 }
 0x3e2   :  { %v673_v21 = vpop.f32.mrb[5].mxu0  ;;  %10038 = vmatprep.subr.mxu1 %v11379_v14  ;;  %v679_v24 = vadd.f32 %v10010_v20, %v9279_v19 }
 0x3e3   :  { %v674_v22 = vadd.f32 %v9279_v19, %v673_v21 }
 0x3e5   :  { %10036 = vmatmul.mubr.msk.f32.vlgmr.msra.gmra.mrb[12].mxu1 %vm272_vm2, %v674_v22 }
 0x3e6   :  { %10039 = vmatpush3.xpose.msk.msra.mxu1 %vm272_vm2, %v763_v23  ;;  %10040 = vmatprep.mubr.msk.f32.mxu1 %vm11380_vm1, %v11379_v14 }
 0x3e7   :  { %10048 = vmatprep.subr.mxu1 %v11379_v14 }
 0x3e9   :  { %10041 = vmatmul.mubr.msk.f32.vlgmr.msra.gmra.mrb[14].mxu1 %vm272_vm2, %v679_v24  ;;  %v10032_v49 = vpop.f32.mrb[6].mxu0 }
 0x3ea   :  { %10050 = vmatprep.mubr.msk.f32.mxu1 %vm11380_vm1, %v11379_v14  ;;  %v841_v51 = vpop.f32.mrb[7].mxu0  ;;  %v847_v53 = vadd.f32 %v10032_v49, %v9285_v50 }
 0x3eb   :  { %v842_v52 = vadd.f32 %v9285_v50, %v841_v51 }
 0x3ec   :  { %10049 = vmatpush3.msra.mxu1 %v847_v53 }
 0x3ed   :  { %10044 = vmatpush3.msra.mxu0 %v842_v52  ;;  %v9300_v52 = vld [vmem:[%s12875_s1 + $0x120] ss:$0 sm:$0xff] }
 0x3ee   :  { %10836 = vmatprep.subr.bf16.mxu0 %v10835_v62 }
 0x4b8   :  { %v922_v31 = vpop.f32.mrb[12].mxu1 }
 0x4b9   :  { %v1002_v32 = vmul.f32 0.25, %v922_v31  ;;  %v10037_v33 = vpop.f32.mrb[13].mxu1  ;;  %v10847_v31 = vpack.c.bf16 %v1389_v30, %v1388_v29  ;;  %v1617_v29 = vld [vmem:[%s12875_s1 + $0x1b8] sm:$0xff]  ;;  %v1618_v30 = vld [vmem:[%s12875_s1 + $0x1c0] sm:$0xff] }
 0x4ba   :  { %v1479_v33 = vld [vmem:[%s12875_s1 + $0x158] sm:$0xff] }
 0x4bb   :  { %v1004_v34 = vsel %vm427_vm3, %v1002_v32, -inf }
 0x4bc   :  { %1005 = vmax.xlane.f32.xlu0 %v1004_v34  ;;  %v998_v35 = vpop.f32.mrb[14].mxu1  ;;  %v1480_v34 = vld [vmem:[%s12875_s1 + $0x160] sm:$0xff] }
 0x4bd   :  { %v1003_v36 = vmul.f32 0.25, %v998_v35  ;;  %v10042_v37 = vpop.f32.mrb[15].mxu1 }
 0x4bf   :  { %v1007_v38 = vsel %vm427_vm3, %v1003_v36, -inf }
 0x4c0   :  { %1008 = vmax.xlane.f32.xlu1 %v1007_v38  ;;  %v1482_v38 = vld [vmem:[%s12875_s1 + $0x170] sm:$0xff] }
 0x549   :  { %v1006_v39 = vpop.xlane.xlu0 %1005 }
 0x54a   :  { %v1010_v40 = vsub.f32 %v1002_v32, %v1006_v39  ;;  %v1478_v32 = vld [vmem:[%s12875_s1 + $0x150] sm:$0xff]  ;;  %v1483_v39 = vld [vmem:[%s12875_s1 + $0x178] sm:$0xff] }
 0x54b   :  { %v10851_v35 = vpack.c.bf16 %v1479_v33, %v1478_v32  ;;  %v1791_v32 = vld [vmem:[%s12875_s1 + $0x1f8] sm:$0xff]  ;;  %v1792_v33 = vld [vmem:[%s12875_s1 + $0x200] sm:$0xff] }
 0x54c   :  { %v1012_v41 = vmul.f32 1.442695, %v1010_v40  ;;  %v10859_v40 = vpack.c.bf16 %v1483_v39, %v1482_v38 }
 0x54d   :  { %v1009_v42 = vpop.xlane.xlu1 %1008 }
 0x54e   :  { %11241 = vpow2.f32 %v1012_v41  ;;  %v1011_v43 = vsub.f32 %v1003_v36, %v1009_v42  ;;  %v1481_v36 = vld [vmem:[%s12875_s1 + $0x168] sm:$0xff] }
 0x54f   :  { %v10855_v37 = vpack.c.bf16 %v1481_v36, %v1480_v34  ;;  %v10887_v34 = vpack.c.bf16 %v1792_v33, %v1791_v32  ;;  %v1706_v36 = vld [vmem:[%s12875_s1 + $0x1d0] sm:$0xff] }
 0x550   :  { %v1014_v44 = vmul.f32 1.442695, %v1011_v43 }
 0x552   :  { %11243 = vpow2.f32 %v1014_v44 }
 0x558   :  { %v11242_v45 = vpop.eup %11241 }
 0x559   :  { %v1016_v46 = vsel %vm427_vm3, %v11242_v45, 0.0 }
 0x55a   :  { %1017 = vadd.xlane.f32.xlu0 %v1016_v46 }
 0x55c   :  { %v11244_v47 = vpop.eup %11243 }
 0x55d   :  { %v1019_v48 = vsel %vm427_vm3, %v11244_v47, 0.0 }
 0x55e   :  { %1020 = vadd.xlane.f32.xlu1 %v1019_v48  ;;  %v9299_v48 = vld [vmem:[%s12875_s1 + $0x118] ss:$0 sm:$0xff] }
 0x5e7   :  { %v1018_v54 = vpop.xlane.xlu0 %1017 }
 0x5e8   :  { %11245 = vrcp.f32 %v1018_v54 }
 0x5eb   :  { %v1021_v55 = vpop.xlane.xlu1 %1020 }
 0x5ec   :  { %11247 = vrcp.f32 %v1021_v55 }
 0x5f2   :  { %v11246_v56 = vpop.eup %11245 }
 0x5f3   :  { %v1024_v57 = vmul.f32 %v11246_v56, %v11242_v45 }
 0x5f5   :  { %10046 = vmatmul.mubr.msk.f32.vlgmr.msra.gmra.mrb[8].mxu0 %vm427_vm3, %v1024_v57  ;;  %v1484_v57 = vld [vmem:[%s12875_s1 + $0x180] sm:$0xff] }
 0x5f6   :  { %v11248_v58 = vpop.eup %11247  ;;  %10838 = vmatpush3.bf16.msra.mxu0 %v10835_v62 }
 0x5f7   :  { %v1025_v59 = vmul.f32 %v11248_v58, %v11244_v47  ;;  %10840 = vmatprep.subr.bf16.mxu0 %v10839_v1  ;;  %v1485_v58 = vld [vmem:[%s12875_s1 + $0x188] sm:$0xff] }
 0x5f9   :  { %10051 = vmatmul.mubr.msk.f32.vlgmr.msra.gmra.mrb[16].mxu1 %vm427_vm3, %v1025_v59  ;;  %v10863_v59 = vpack.c.bf16 %v1485_v58, %v1484_v57  ;;  %v9315_v57 = vld [vmem:[%s12875_s1 + $0x228] ss:$0 sm:$0xff] }
 0x6c8   :  { %v1095_v2 = vpop.f32.mrb[8].mxu0 }
 0x6c9   :  { %v10047_v3 = vpop.f32.mrb[9].mxu0  ;;  %10057 = vmatprep.mubr.msk.f32.mxu0 %vm272_vm2, %v1095_v2 }
 0x6ca   :  { %v9304_v3 = vld [vmem:[%s12875_s1 + $0x190] ss:$0 sm:$0xff] }
 0x6cc   :  { %v1168_v4 = vpop.f32.mrb[16].mxu1 }
 0x6cd   :  { %v10052_v6 = vpop.f32.mrb[17].mxu1  ;;  %10058 = vmatmul.mubr.msk.f32.vlgmr.msra.gmra.mrb[10].mxu0 %vm272_vm2, %v1168_v4 }
 0x6ce   :  { %10842 = vmatpush3.bf16.msra.mxu0 %v10839_v1  ;;  %10064 = vmatprep.mubr.msk.f32.mxu0 %vm272_vm2, %v11524_v11 }
 0x6cf   :  { %10852 = vmatprep.subr.bf16.mxu0 %v10851_v35 }
 0x6d5   :  { %10065 = vmatmul.mubr.msk.f32.vlgmr.msra.gmra.mrb[10].mxu0 %vm272_vm2, %v11522_v9 }
 0x6d6   :  { %10854 = vmatpush3.bf16.msra.mxu0 %v10851_v35  ;;  %v1705_v35 = vld [vmem:[%s12875_s1 + $0x1c8] sm:$0xff] }
 0x6d7   :  { %10856 = vmatprep.subr.bf16.mxu0 %v10855_v37 }
 0x6da   :  { %10858 = vmatpush3.bf16.msra.mxu0 %v10855_v37  ;;  %v10875_v37 = vpack.c.bf16 %v1706_v36, %v1705_v35  ;;  %v2199_v35 = vld [vmem:[%s12875_s1 + $0x240] sm:$0xff]  ;;  %v2200_v36 = vld [vmem:[%s12875_s1 + $0x248] sm:$0xff] }
 0x6db   :  { %10860 = vmatprep.subr.bf16.mxu0 %v10859_v40 }
 0x6de   :  { %10862 = vmatpush3.bf16.msra.mxu0 %v10859_v40 }
 0x6df   :  { %10864 = vmatprep.subr.bf16.mxu0 %v10863_v59 }
 0x6e2   :  { %10866 = vmatpush3.bf16.msra.mxu0 %v10863_v59 }
 0x7a8   :  { %v10066_v8 = vpop.f32.mrb[10].mxu0 }
 0x7a9   :  { %v1342_v10 = vadd.f32 %v10066_v8, %v9298_v7  ;;  %v1327_v13 = vpop.f32.mrb[11].mxu0 }
 0x7aa   :  { %v1341_v15 = vadd.f32 %v9298_v7, %v1327_v13 }
 0x7ab   :  { %v1344_v16 = vadd.f32 %v1342_v10, %v11432_v12 }
 0x7ac   :  { %v1343_v17 = vadd.f32 %v1341_v15, %v11411_v5  ;;  %v1386_v5 = vld [vmem:[%s12875_s1 + $0x128] sm:$0xff] }
 0x7ad   :  { %v1350_v18 = vsel %vm22_vm0, %v1344_v16, 0.0  ;;  %v10843_v28 = vpack.c.bf16 %v1387_v27, %v1386_v5  ;;  %v1789_v5 = vld [vmem:[%s12875_s1 + $0x1e8] sm:$0xff]  ;;  %v1790_v27 = vld [vmem:[%s12875_s1 + $0x1f0] sm:$0xff] }
 0x7ae   :  { %1351 = vadd.xlane.f32.xlu1 %v1350_v18  ;;  %v1347_v11 = vsel %vm22_vm0, %v1343_v17, 0.0 }
 0x7af   :  { %1348 = vadd.xlane.f32.xlu0 %v1347_v11  ;;  %10844 = vmatprep.subr.bf16.mxu1 %v10843_v28 }
 0x7b0   :  { %10846 = vmatpush3.bf16.msra.mxu1 %v10843_v28  ;;  %v10883_v28 = vpack.c.bf16 %v1790_v27, %v1789_v5  ;;  %v2197_v27 = vld [vmem:[%s12875_s1 + $0x230] sm:$0xff] }
 0x7b1   :  { %10848 = vmatprep.subr.bf16.mxu1 %v10847_v31 }
 0x7b2   :  { %10884 = vmatprep.subr.bf16.mxu0 %v10883_v28 }
 0x7b4   :  { %10850 = vmatpush3.bf16.msra.mxu1 %v10847_v31  ;;  %v10871_v31 = vpack.c.bf16 %v1618_v30, %v1617_v29  ;;  %v2281_v30 = vld [vmem:[%s12875_s1 + $0x250] sm:$0xff] }
 0x83b   :  { %v1352_v19 = vpop.xlane.xlu1 %1351 }
 0x83c   :  { %v1355_v9 = vmul.f32 0.03125, %v1352_v19  ;;  %v1349_v20 = vpop.xlane.xlu0 %1348 }
 0x83d   :  { %v1354_v21 = vmul.f32 0.03125, %v1349_v20 }
 0x83e   :  { %v1357_v22 = vsub.f32 %v1344_v16, %v1355_v9 }
 0x83f   :  { %v1356_v23 = vsub.f32 %v1343_v17, %v1354_v21 }
 0x840   :  { %v1359_v24 = vmul.f32 %v1357_v22, %v1357_v22 }
 0x841   :  { %v1358_v25 = vmul.f32 %v1356_v23, %v1356_v23 }
 0x842   :  { %v1363_v26 = vsel %vm22_vm0, %v1359_v24, 0.0 }
 0x843   :  { %1364 = vadd.xlane.f32.xlu1 %v1363_v26  ;;  %v1360_v12 = vsel %vm22_vm0, %v1358_v25, 0.0  ;;  %v1615_v25 = vld [vmem:[%s12875_s1 + $0x1a8] sm:$0xff]  ;;  %v1616_v26 = vld [vmem:[%s12875_s1 + $0x1b0] sm:$0xff] }
 0x844   :  { %1361 = vadd.xlane.f32.xlu0 %v1360_v12  ;;  %v10867_v12 = vpack.c.bf16 %v1616_v26, %v1615_v25 }
 0x846   :  { %10868 = vmatprep.subr.bf16.mxu1 %v10867_v12 }
 0x8d0   :  { %v1365_v41 = vpop.xlane.xlu1 %1364 }
 0x8d1   :  { %v1367_v42 = vmul.f32 0.03125, %v1365_v41  ;;  %v1362_v43 = vpop.xlane.xlu0 %1361 }
 0x8d2   :  { %v1366_v44 = vmul.f32 0.03125, %v1362_v43 }
 0x8d3   :  { %v1369_v45 = vadd.f32 1e-05, %v1367_v42 }
 0x8d4   :  { %v1368_v46 = vadd.f32 1e-05, %v1366_v44 }
 0x8d5   :  { %11249 = vrsqrt.f32 %v1369_v45  ;;  %v9307_v45 = vld [vmem:[%s12875_s1 + $0x198] ss:$0 sm:$0xff] }
 0x8d6   :  { %11251 = vrsqrt.f32 %v1368_v46 }
 0x8df   :  { %v11250_v47 = vpop.eup %11249 }
 0x8e0   :  { %v11252_v49 = vpop.eup %11251  ;;  %v1373_v50 = vmul.f32 %v11250_v47, %v1357_v22 }
 0x8e1   :  { %v1372_v51 = vmul.f32 %v11252_v49, %v1356_v23  ;;  %v9308_v49 = vld [vmem:[%s12875_s1 + $0x1a0] ss:$0 sm:$0xff] }
 0x8e2   :  { %v1379_v53 = vmul.f32 %v9299_v48, %v1373_v50 }
 0x8e3   :  { %v1378_v54 = vmul.f32 %v9299_v48, %v1372_v51 }
 0x8e4   :  { %v1385_v56 = vadd.f32 %v9300_v52, %v1379_v53  ;;  %v1708_v53 = vld [vmem:[%s12875_s1 + $0x1e0] sm:$0xff] }
 0x8e5   :  { %v1384_v55 = vadd.f32 %v9300_v52, %v1378_v54  ;;  %v1707_v52 = vld [vmem:[%s12875_s1 + $0x1d8] sm:$0xff] }
 0x8e7   :  { %10075 = vmatprep.mubr.msk.f32.mxu1 %vm22_vm0, %v1384_v55 }
 0x8e8   :  { %10076 = vmatmul.mubr.msk.f32.vlgmr.msra.gmra.mrb[18].mxu1 %vm22_vm0, %v1385_v56 }
 0x8e9   :  { %10870 = vmatpush3.bf16.msra.mxu1 %v10867_v12 }
 0x8ea   :  { %10872 = vmatprep.subr.bf16.mxu1 %v10871_v31 }
 0x8ed   :  { %10874 = vmatpush3.bf16.msra.mxu1 %v10871_v31  ;;  %v2282_v31 = vld [vmem:[%s12875_s1 + $0x258] sm:$0xff] }
 0x8ee   :  { %10876 = vmatprep.subr.bf16.mxu1 %v10875_v37  ;;  %v10899_v32 = vpack.c.bf16 %v2282_v31, %v2281_v30 }
 0x9bb   :  { %v10077_v61 = vpop.f32.mrb[18].mxu1 }
 0x9bc   :  { %v1473_v62 = vadd.f32 %v10077_v61, %v9301_v60  ;;  %v1467_v63 = vpop.f32.mrb[19].mxu1 }
 0x9bd   :  { %v1468_v0 = vadd.f32 %v9301_v60, %v1467_v63  ;;  %v9312_v63 = vld [vmem:[%s12875_s1 + $0x220] ss:$0 sm:$0xff] }
 0x9be   :  { %v1477_v2 = vmax.f32 %v1473_v62, 0.0 }
 0x9bf   :  { %v1476_v1 = vmax.f32 %v1468_v0, 0.0 }
 0x9c1   :  { %10094 = vmatprep.mubr.msk.f32.mxu0 %vm1491_vm4, %v1476_v1 }
 0x9c2   :  { %10095 = vmatmul.mubr.msk.f32.vlgmr.msra.gmra.mrb[12].mxu0 %vm1491_vm4, %v1477_v2  ;;  %v9309_v2 = vld [vmem:[%s12875_s1 + $0x218] ss:$0 sm:$0xff] }
 0x9c3   :  { %10886 = vmatpush3.bf16.msra.mxu0 %v10883_v28  ;;  %v2198_v28 = vld [vmem:[%s12875_s1 + $0x238] sm:$0xff] }
 0x9c4   :  { %10888 = vmatprep.subr.bf16.mxu0 %v10887_v34  ;;  %v10891_v29 = vpack.c.bf16 %v2198_v28, %v2197_v27 }
 0x9c7   :  { %10890 = vmatpush3.bf16.msra.mxu0 %v10887_v34 }
 0x9c8   :  { %10140 = vmatprep.subr.mxu0 %v11379_v14 }
 0xa95   :  { %v10096_v4 = vpop.f32.mrb[12].mxu0 }
 0xa96   :  { %v1570_v6 = vadd.f32 %v10096_v4, %v9304_v3  ;;  %v1564_v7 = vpop.f32.mrb[13].mxu0 }
 0xa97   :  { %v1565_v8 = vadd.f32 %v9304_v3, %v1564_v7 }
 0xa98   :  { %v1574_v10 = vadd.f32 %v1570_v6, %v1385_v56  ;;  %v10879_v56 = vpack.c.bf16 %v1708_v53, %v1707_v52 }
 0xa99   :  { %v1573_v13 = vadd.f32 %v1565_v8, %v1384_v55 }
 0xa9a   :  { %v1580_v15 = vsel %vm22_vm0, %v1574_v10, 0.0 }
 0xa9b   :  { %1581 = vadd.xlane.f32.xlu1 %v1580_v15  ;;  %v1577_v16 = vsel %vm22_vm0, %v1573_v13, 0.0 }
 0xa9c   :  { %1578 = vadd.xlane.f32.xlu0 %v1577_v16 }
 0xb28   :  { %v1582_v17 = vpop.xlane.xlu1 %1581 }
 0xb29   :  { %v1584_v18 = vmul.f32 0.03125, %v1582_v17  ;;  %v1579_v11 = vpop.xlane.xlu0 %1578 }
 0xb2a   :  { %v1583_v19 = vmul.f32 0.03125, %v1579_v11 }
 0xb2b   :  { %v1586_v9 = vsub.f32 %v1574_v10, %v1584_v18 }
 0xb2c   :  { %v1585_v20 = vsub.f32 %v1573_v13, %v1583_v19 }
 0xb2d   :  { %v1588_v21 = vmul.f32 %v1586_v9, %v1586_v9 }
 0xb2e   :  { %v1587_v22 = vmul.f32 %v1585_v20, %v1585_v20 }
 0xb2f   :  { %v1592_v23 = vsel %vm22_vm0, %v1588_v21, 0.0 }
 0xb30   :  { %1593 = vadd.xlane.f32.xlu1 %v1592_v23  ;;  %v1589_v24 = vsel %vm22_vm0, %v1587_v22, 0.0 }
 0xb31   :  { %1590 = vadd.xlane.f32.xlu0 %v1589_v24 }
 0xbbd   :  { %v1594_v38 = vpop.xlane.xlu1 %1593 }
 0xbbe   :  { %v1596_v39 = vmul.f32 0.03125, %v1594_v38  ;;  %v1591_v40 = vpop.xlane.xlu0 %1590 }
 0xbbf   :  { %v1595_v41 = vmul.f32 0.03125, %v1591_v40  ;;  %v2283_v40 = vld [vmem:[%s12875_s1 + $0x260] sm:$0xff] }
 0xbc0   :  { %v1598_v42 = vadd.f32 1e-05, %v1596_v39  ;;  %v10895_v39 = vpack.c.bf16 %v2200_v36, %v2199_v35  ;;  %v2195_v36 = vld [vmem:[%s12875_s1 + $0x208] sm:$0xff] }
 0xbc1   :  { %v1597_v43 = vadd.f32 1e-05, %v1595_v41  ;;  %v2284_v41 = vld [vmem:[%s12875_s1 + $0x268] sm:$0xff] }
 0xbc2   :  { %11253 = vrsqrt.f32 %v1598_v42  ;;  %v2365_v42 = vld [vmem:[%s12875_s1 + $0x270] sm:$0xff] }
 0xbc3   :  { %11255 = vrsqrt.f32 %v1597_v43  ;;  %v2366_v43 = vld [vmem:[%s12875_s1 + $0x278] sm:$0xff] }
 0xbcc   :  { %v11254_v44 = vpop.eup %11253 }
 0xbcd   :  { %v11256_v46 = vpop.eup %11255  ;;  %v1602_v47 = vmul.f32 %v11254_v44, %v1586_v9 }
 0xbce   :  { %v1601_v48 = vmul.f32 %v11256_v46, %v1585_v20  ;;  %v10903_v46 = vpack.c.bf16 %v2284_v41, %v2283_v40 }
 0xbcf   :  { %v1608_v50 = vmul.f32 %v9307_v45, %v1602_v47  ;;  %v10907_v47 = vpack.c.bf16 %v2366_v43, %v2365_v42  ;;  %v9343_v43 = vld [vmem:[%s12875_s1 + $0x2b8] ss:$0 sm:$0xff] }
 0xbd0   :  { %v1607_v51 = vmul.f32 %v9307_v45, %v1601_v48  ;;  %v2367_v48 = vld [vmem:[%s12875_s1 + $0x280] sm:$0xff] }
 0xbd1   :  { %v11696_v55 = vadd.f32 %v9308_v49, %v1608_v50 }
 0xbd2   :  { %v11694_v54 = vadd.f32 %v9308_v49, %v1607_v51  ;;  %v2368_v49 = vld [vmem:[%s12875_s1 + $0x288] sm:$0xff] }
 0xbd3   :  { %v10911_v50 = vpack.c.bf16 %v2368_v49, %v2367_v48 }
 0xbd4   :  { %10105 = vmatprep.mubr.msk.f32.mxu1 %vm22_vm0, %v11694_v54  ;;  %10127 = vmatprep.mubr.msk.f32.mxu0 %vm22_vm0, %v11694_v54 }
 0xbd5   :  { %10106 = vmatmul.mubr.msk.f32.vlgmr.msra.gmra.mrb[20].mxu1 %vm22_vm0, %v11696_v55  ;;  %10128 = vmatmul.mubr.msk.f32.vlgmr.msra.gmra.mrb[14].mxu0 %vm22_vm0, %v11696_v55 }
 0xbd6   :  { %10878 = vmatpush3.bf16.msra.mxu1 %v10875_v37  ;;  %10116 = vmatprep.mubr.msk.f32.mxu1 %vm22_vm0, %v11694_v54 }
 0xbd7   :  { %10880 = vmatprep.subr.bf16.mxu1 %v10879_v56  ;;  %10142 = vmatprep.mubr.msk.f32.mxu0 %vm11380_vm1, %v11379_v14 }
 0xbda   :  { %10882 = vmatpush3.bf16.msra.mxu1 %v10879_v56 }
 0xbdb   :  { %10130 = vmatprep.subr.mxu1 %v11379_v14 }
 0xbdd   :  { %10117 = vmatmul.mubr.msk.f32.vlgmr.msra.gmra.mrb[22].mxu1 %vm22_vm0, %v11696_v55 }
 0xbde   :  { %10132 = vmatprep.mubr.msk.f32.mxu1 %vm11380_vm1, %v11379_v14 }
 0xca8   :  { %v10107_v58 = vpop.f32.mrb[20].mxu1  ;;  %v10129_v59 = vpop.f32.mrb[14].mxu0 }
 0xca9   :  { %v1696_v60 = vpop.f32.mrb[21].mxu1  ;;  %v1864_v61 = vpop.f32.mrb[15].mxu0  ;;  %v1702_v7 = vadd.f32 %v10107_v58, %v9309_v2  ;;  %v1870_v8 = vadd.f32 %v10129_v59, %v9315_v57  ;;  %v9327_v59 = vld [vmem:[%s12875_s1 + $0x2a8] ss:$0 sm:$0xff] }
 0xcaa   :  { %v1865_v62 = vadd.f32 %v9315_v57, %v1864_v61  ;;  %v1697_v4 = vadd.f32 %v9309_v2, %v1696_v60 }
 0xcac   :  { %10141 = vmatpush3.msra.mxu0 %v1865_v62  ;;  %v9324_v62 = vld [vmem:[%s12875_s1 + $0x2a0] ss:$0 sm:$0xff] }
 0xcad   :  { %10892 = vmatprep.subr.bf16.mxu0 %v10891_v29 }
 0xcb0   :  { %v10118_v0 = vpop.f32.mrb[22].mxu1 }
 0xcb1   :  { %v1780_v1 = vpop.f32.mrb[23].mxu1  ;;  %v1786_v6 = vadd.f32 %v10118_v0, %v9312_v63  ;;  %v9330_v0 = vld [vmem:[%s12875_s1 + $0x2b0] ss:$0 sm:$0xff] }
 0xcb2   :  { %v1781_v3 = vadd.f32 %v9312_v63, %v1780_v1 }
 0xcb4   :  { %10131 = vmatpush3.xpose.msk.msra.mxu1 %vm272_vm2, %v1781_v3 }
 0xcb5   :  { %10135 = vmatprep.subr.mxu1 %v11379_v14 }
 0xcb7   :  { %10133 = vmatmul.mubr.msk.f32.vlgmr.msra.gmra.mrb[24].mxu1 %vm272_vm2, %v1697_v4 }
 0xcb8   :  { %10136 = vmatpush3.xpose.msk.msra.mxu1 %vm272_vm2, %v1786_v6  ;;  %10137 = vmatprep.mubr.msk.f32.mxu1 %vm11380_vm1, %v11379_v14 }
 0xcb9   :  { %10145 = vmatprep.subr.mxu1 %v11379_v14 }
 0xcbb   :  { %10138 = vmatmul.mubr.msk.f32.vlgmr.msra.gmra.mrb[26].mxu1 %vm272_vm2, %v1702_v7 }
 0xcbc   :  { %10146 = vmatpush3.msra.mxu1 %v1870_v8  ;;  %10147 = vmatprep.mubr.msk.f32.mxu1 %vm11380_vm1, %v11379_v14 }
 0xcbd   :  { %10900 = vmatprep.subr.bf16.mxu1 %v10899_v32 }
 0xd8a   :  { %v1945_v10 = vpop.f32.mrb[24].mxu1 }
 0xd8b   :  { %v2025_v13 = vmul.f32 0.25, %v1945_v10  ;;  %v10134_v15 = vpop.f32.mrb[25].mxu1 }
 0xd8d   :  { %v2027_v16 = vsel %vm427_vm3, %v2025_v13, -inf }
 0xd8e   :  { %2028 = vmax.xlane.f32.xlu1 %v2027_v16  ;;  %v2021_v17 = vpop.f32.mrb[26].mxu1 }
 0xd8f   :  { %v2026_v18 = vmul.f32 0.25, %v2021_v17  ;;  %v10139_v11 = vpop.f32.mrb[27].mxu1 }
 0xd91   :  { %v2030_v19 = vsel %vm427_vm3, %v2026_v18, -inf }
 0xd92   :  { %2031 = vmax.xlane.f32.xlu0 %v2030_v19 }
 0xe1b   :  { %v2029_v9 = vpop.xlane.xlu1 %2028 }
 0xe1c   :  { %v2033_v20 = vsub.f32 %v2025_v13, %v2029_v9 }
 0xe1e   :  { %v2035_v21 = vmul.f32 1.442695, %v2033_v20 }
 0xe1f   :  { %v2032_v22 = vpop.xlane.xlu0 %2031 }
 0xe20   :  { %11257 = vpow2.f32 %v2035_v21  ;;  %v2034_v23 = vsub.f32 %v2026_v18, %v2032_v22 }
 0xe22   :  { %v2037_v24 = vmul.f32 1.442695, %v2034_v23 }
 0xe24   :  { %11259 = vpow2.f32 %v2037_v24 }
 0xe2a   :  { %v11258_v25 = vpop.eup %11257 }
 0xe2b   :  { %v2039_v26 = vsel %vm427_vm3, %v11258_v25, 0.0 }
 0xe2c   :  { %2040 = vadd.xlane.f32.xlu1 %v2039_v26 }
 0xe2e   :  { %v11260_v12 = vpop.eup %11259 }
 0xe2f   :  { %v2042_v5 = vsel %vm427_vm3, %v11260_v12, 0.0 }
 0xe30   :  { %2043 = vadd.xlane.f32.xlu0 %v2042_v5 }
 0xeb9   :  { %v2041_v33 = vpop.xlane.xlu1 %2040 }
 0xeba   :  { %11261 = vrcp.f32 %v2041_v33  ;;  %v2771_v33 = vld [vmem:[%s12875_s1 + $0x290] sm:$0xff] }
 0xebd   :  { %v2044_v34 = vpop.xlane.xlu0 %2043 }
 0xebe   :  { %11263 = vrcp.f32 %v2044_v34  ;;  %v2772_v34 = vld [vmem:[%s12875_s1 + $0x298] sm:$0xff] }
 0xebf   :  { %v10915_v35 = vpack.c.bf16 %v2772_v34, %v2771_v33 }
 0xec4   :  { %v11262_v37 = vpop.eup %11261 }
 0xec5   :  { %v2047_v38 = vmul.f32 %v11262_v37, %v11258_v25  ;;  %v2196_v37 = vld [vmem:[%s12875_s1 + $0x210] sm:$0xff] }
 0xec7   :  { %10143 = vmatmul.mubr.msk.f32.vlgmr.msra.gmra.mrb[16].mxu0 %vm427_vm3, %v2047_v38  ;;  %v10919_v38 = vpack.c.bf16 %v2196_v37, %v2195_v36  ;;  %v3336_v36 = vld [vmem:[%s12875_s1 + $0x370] sm:$0xff]  ;;  %v3337_v37 = vld [vmem:[%s12875_s1 + $0x378] sm:$0xff] }
 0xec8   :  { %v11264_v44 = vpop.eup %11263  ;;  %10894 = vmatpush3.bf16.msra.mxu0 %v10891_v29  ;;  %10158 = vmatprep.mubr.msk.f32.mxu0 %vm22_vm0, %v11694_v54 }
 0xec9   :  { %v2048_v45 = vmul.f32 %v11264_v44, %v11260_v12  ;;  %10896 = vmatprep.subr.bf16.mxu0 %v10895_v39 }
 0xecb   :  { %10148 = vmatmul.mubr.msk.f32.vlgmr.msra.gmra.mrb[28].mxu1 %vm427_vm3, %v2048_v45 }
 0xecc   :  { %10898 = vmatpush3.bf16.msra.mxu0 %v10895_v39  ;;  %10902 = vmatpush3.bf16.msra.mxu1 %v10899_v32 }
 0xecd   :  { %10169 = vmatprep.mubr.msk.f32.mxu1 %vm22_vm0, %v11694_v54  ;;  %10904 = vmatprep.subr.bf16.mxu1 %v10903_v46 }
 0xece   :  { %10908 = vmatprep.subr.bf16.mxu0 %v10907_v47 }
 0xecf   :  { %10159 = vmatmul.mubr.msk.f32.vlgmr.msra.gmra.mrb[18].mxu0 %vm22_vm0, %v11696_v55 }
 0xed0   :  { %10906 = vmatpush3.bf16.msra.mxu1 %v10903_v46  ;;  %10910 = vmatpush3.bf16.msra.mxu0 %v10907_v47 }
 0xed1   :  { %10180 = vmatprep.mubr.msk.f32.mxu0 %vm22_vm0, %v11694_v54  ;;  %10912 = vmatprep.subr.bf16.mxu0 %v10911_v50 }
 0xed2   :  { %10183 = vmatprep.subr.mxu1 %v11379_v14 }
 0xed3   :  { %10170 = vmatmul.mubr.msk.f32.vlgmr.msra.gmra.mrb[30].mxu1 %vm22_vm0, %v11696_v55 }
 0xed4   :  { %10914 = vmatpush3.bf16.msra.mxu0 %v10911_v50  ;;  %10185 = vmatprep.mubr.msk.f32.mxu1 %vm11380_vm1, %v11379_v14 }
 0xed5   :  { %10193 = vmatprep.subr.mxu0 %v11379_v14 }
 0xed7   :  { %10181 = vmatmul.mubr.msk.f32.vlgmr.msra.gmra.mrb[20].mxu0 %vm22_vm0, %v11696_v55 }
 0xed8   :  { %10195 = vmatprep.mubr.msk.f32.mxu0 %vm11380_vm1, %v11379_v14 }
 0xf9a   :  { %v11794_v51 = vpop.f32.mrb[16].mxu0 }
 0xf9b   :  { %v10144_v52 = vpop.f32.mrb[17].mxu0 }
 0xf9e   :  { %v11796_v53 = vpop.f32.mrb[28].mxu1 }
 0xf9f   :  { %v10149_v56 = vpop.f32.mrb[29].mxu1 }
 0xfa2   :  { %v10160_v57 = vpop.f32.mrb[18].mxu0 }
 0xfa3   :  { %v2272_v58 = vpop.f32.mrb[19].mxu0  ;;  %v2278_v7 = vadd.f32 %v10160_v57, %v9324_v62 }
 0xfa4   :  { %v2273_v2 = vadd.f32 %v9324_v62, %v2272_v58 }
 0xfa6   :  { %v10171_v60 = vpop.f32.mrb[30].mxu1 }
 0xfa7   :  { %v2356_v61 = vpop.f32.mrb[31].mxu1  ;;  %v2362_v4 = vadd.f32 %v10171_v60, %v9327_v59 }
 0xfa8   :  { %v2357_v63 = vadd.f32 %v9327_v59, %v2356_v61 }
 0xfaa   :  { %v10182_v1 = vpop.f32.mrb[20].mxu0  ;;  %10184 = vmatpush3.xpose.msk.msra.mxu1 %vm272_vm2, %v2357_v63  ;;  %v2985_v63 = vld [vmem:[%s12875_s1 + $0x2d8] sm:$0xff] }
 0xfab   :  { %v2440_v3 = vpop.f32.mrb[21].mxu0  ;;  %10188 = vmatprep.subr.mxu1 %v11379_v14  ;;  %v2446_v8 = vadd.f32 %v10182_v1, %v9330_v0  ;;  %v2986_v1 = vld [vmem:[%s12875_s1 + $0x2e0] sm:$0xff] }
 0xfac   :  { %v2441_v6 = vadd.f32 %v9330_v0, %v2440_v3 }
 0xfad   :  { %10186 = vmatmul.mubr.msk.f32.vlgmr.msra.gmra.mrb[32].mxu1 %vm272_vm2, %v2273_v2  ;;  %v2987_v2 = vld [vmem:[%s12875_s1 + $0x2e8] sm:$0xff] }
 0xfae   :  { %10189 = vmatpush3.xpose.msk.msra.mxu1 %vm272_vm2, %v2362_v4  ;;  %10194 = vmatpush3.msra.mxu0 %v2441_v6  ;;  %v10927_v3 = vpack.c.bf16 %v2987_v2, %v2986_v1  ;;  %v3252_v4 = vld [vmem:[%s12875_s1 + $0x350] sm:$0xff]  ;;  %v3253_v6 = vld [vmem:[%s12875_s1 + $0x358] sm:$0xff]  ;;  %v3422_v2 = vld [vmem:[%s12875_s1 + $0x3a0] sm:$0xff] }
 0xfaf   :  { %10190 = vmatprep.mubr.msk.f32.mxu1 %vm11380_vm1, %v11379_v14  ;;  %10198 = vmatprep.subr.mxu1 %v11379_v14  ;;  %v3421_v1 = vld [vmem:[%s12875_s1 + $0x398] sm:$0xff] }
 0xfb0   :  { %10916 = vmatprep.subr.bf16.mxu0 %v10915_v35 }
 0xfb1   :  { %10191 = vmatmul.mubr.msk.f32.vlgmr.msra.gmra.mrb[34].mxu1 %vm272_vm2, %v2278_v7  ;;  %v10947_v7 = vpack.c.bf16 %v3253_v6, %v3252_v4  ;;  %v3423_v4 = vld [vmem:[%s12875_s1 + $0x3a8] sm:$0xff] }
 0xfb2   :  { %10199 = vmatpush3.msra.mxu1 %v2446_v8  ;;  %10200 = vmatprep.mubr.msk.f32.mxu1 %vm11380_vm1, %v11379_v14  ;;  %v3076_v8 = vld [vmem:[%s12875_s1 + $0x2f8] sm:$0xff]  ;;  %v10967_v6 = vpack.c.bf16 %v3423_v4, %v3422_v2 }
 0xfb3   :  { %v3996_v4 = vld [vmem:[%s12875_s1 + $0x418] sm:$0xff] }
0x1080   :  { %v2521_v10 = vpop.f32.mrb[32].mxu1 }
0x1081   :  { %v2601_v13 = vmul.f32 0.25, %v2521_v10  ;;  %v10187_v15 = vpop.f32.mrb[33].mxu1  ;;  %v3077_v10 = vld [vmem:[%s12875_s1 + $0x300] sm:$0xff] }
0x1082   :  { %v10931_v15 = vpack.c.bf16 %v3077_v10, %v3076_v8 }
0x1083   :  { %v2603_v16 = vsel %vm427_vm3, %v2601_v13, -inf }
0x1084   :  { %2604 = vmax.xlane.f32.xlu0 %v2603_v16  ;;  %v2597_v17 = vpop.f32.mrb[34].mxu1  ;;  %v3079_v16 = vld [vmem:[%s12875_s1 + $0x310] sm:$0xff] }
0x1085   :  { %v2602_v18 = vmul.f32 0.25, %v2597_v17  ;;  %v10192_v11 = vpop.f32.mrb[35].mxu1 }
0x1086   :  { %v3081_v11 = vld [vmem:[%s12875_s1 + $0x320] sm:$0xff] }
0x1087   :  { %v2606_v19 = vsel %vm427_vm3, %v2602_v18, -inf }
0x1088   :  { %2607 = vmax.xlane.f32.xlu1 %v2606_v19 }
0x1111   :  { %v2605_v9 = vpop.xlane.xlu0 %2604 }
0x1112   :  { %v2609_v20 = vsub.f32 %v2601_v13, %v2605_v9  ;;  %v3078_v13 = vld [vmem:[%s12875_s1 + $0x308] sm:$0xff] }
0x1113   :  { %v10935_v17 = vpack.c.bf16 %v3079_v16, %v3078_v13 }
0x1114   :  { %v2611_v21 = vmul.f32 1.442695, %v2609_v20 }
0x1115   :  { %v2608_v22 = vpop.xlane.xlu1 %2607 }
0x1116   :  { %11265 = vpow2.f32 %v2611_v21  ;;  %v2610_v23 = vsub.f32 %v2602_v18, %v2608_v22  ;;  %v3080_v18 = vld [vmem:[%s12875_s1 + $0x318] sm:$0xff] }
0x1117   :  { %v10939_v19 = vpack.c.bf16 %v3081_v11, %v3080_v18 }
0x1118   :  { %v2613_v24 = vmul.f32 1.442695, %v2610_v23 }
0x111a   :  { %11267 = vpow2.f32 %v2613_v24 }
0x1120   :  { %v11266_v25 = vpop.eup %11265 }
0x1121   :  { %v2615_v26 = vsel %vm427_vm3, %v11266_v25, 0.0 }
0x1122   :  { %2616 = vadd.xlane.f32.xlu0 %v2615_v26  ;;  %v9344_v26 = vld [vmem:[%s12875_s1 + $0x2c0] ss:$0 sm:$0xff] }
0x1124   :  { %v11268_v12 = vpop.eup %11267 }
0x1125   :  { %v2618_v5 = vsel %vm427_vm3, %v11268_v12, 0.0 }
0x1126   :  { %2619 = vadd.xlane.f32.xlu1 %v2618_v5 }
0x11af   :  { %v2617_v27 = vpop.xlane.xlu0 %2616 }
0x11b0   :  { %11269 = vrcp.f32 %v2617_v27 }
0x11b3   :  { %v2620_v28 = vpop.xlane.xlu1 %2619 }
0x11b4   :  { %11271 = vrcp.f32 %v2620_v28  ;;  %v9345_v28 = vld [vmem:[%s12875_s1 + $0x2c8] ss:$0 sm:$0xff] }
0x11ba   :  { %v11270_v29 = vpop.eup %11269 }
0x11bb   :  { %v2623_v30 = vmul.f32 %v11270_v29, %v11266_v25 }
0x11bd   :  { %10196 = vmatmul.mubr.msk.f32.vlgmr.msra.gmra.mrb[22].mxu0 %vm427_vm3, %v2623_v30 }
0x11be   :  { %v11272_v31 = vpop.eup %11271  ;;  %10918 = vmatpush3.bf16.msra.mxu0 %v10915_v35 }
0x11bf   :  { %v2624_v32 = vmul.f32 %v11272_v31, %v11268_v12  ;;  %10920 = vmatprep.subr.bf16.mxu0 %v10919_v38  ;;  %v3254_v31 = vld [vmem:[%s12875_s1 + $0x360] sm:$0xff] }
0x11c1   :  { %10201 = vmatmul.mubr.msk.f32.vlgmr.msra.gmra.mrb[36].mxu1 %vm427_vm3, %v2624_v32  ;;  %v3255_v32 = vld [vmem:[%s12875_s1 + $0x368] sm:$0xff] }
0x11c2   :  { %v10951_v35 = vpack.c.bf16 %v3255_v32, %v3254_v31  ;;  %v3912_v32 = vld [vmem:[%s12875_s1 + $0x3f8] sm:$0xff] }
0x1290   :  { %v2694_v39 = vpop.f32.mrb[22].mxu0 }
0x1291   :  { %v10197_v40 = vpop.f32.mrb[23].mxu0  ;;  %10207 = vmatprep.mubr.msk.f32.mxu0 %vm272_vm2, %v2694_v39  ;;  %v10955_v39 = vpack.c.bf16 %v3337_v37, %v3336_v36  ;;  %v3828_v37 = vld [vmem:[%s12875_s1 + $0x3d8] sm:$0xff] }
0x1292   :  { %v3338_v40 = vld [vmem:[%s12875_s1 + $0x380] sm:$0xff] }
0x1294   :  { %v2767_v41 = vpop.f32.mrb[36].mxu1 }
0x1295   :  { %v10202_v42 = vpop.f32.mrb[37].mxu1  ;;  %10208 = vmatmul.mubr.msk.f32.vlgmr.msra.gmra.mrb[24].mxu0 %vm272_vm2, %v2767_v41  ;;  %v3339_v41 = vld [vmem:[%s12875_s1 + $0x388] sm:$0xff] }
0x1296   :  { %10922 = vmatpush3.bf16.msra.mxu0 %v10919_v38  ;;  %10214 = vmatprep.mubr.msk.f32.mxu0 %vm272_vm2, %v11794_v51  ;;  %v11915_v38 = vld [vmem:[%s12876_s0] sm:$0xff]  ;;  %v10959_v42 = vpack.c.bf16 %v3339_v41, %v3338_v40 }
0x1297   :  { %10932 = vmatprep.subr.bf16.mxu0 %v10931_v15 }
0x129d   :  { %10215 = vmatmul.mubr.msk.f32.vlgmr.msra.gmra.mrb[24].mxu0 %vm272_vm2, %v11796_v53 }
0x129e   :  { %10934 = vmatpush3.bf16.msra.mxu0 %v10931_v15 }
0x129f   :  { %10936 = vmatprep.subr.bf16.mxu0 %v10935_v17 }
0x12a2   :  { %10938 = vmatpush3.bf16.msra.mxu0 %v10935_v17 }
0x12a3   :  { %10940 = vmatprep.subr.bf16.mxu0 %v10939_v19 }
0x12a6   :  { %10942 = vmatpush3.bf16.msra.mxu0 %v10939_v19 }
0x1370   :  { %v10216_v44 = vpop.f32.mrb[24].mxu0 }
0x1371   :  { %v2941_v45 = vadd.f32 %v10216_v44, %v9343_v43  ;;  %v2926_v46 = vpop.f32.mrb[25].mxu0  ;;  %v3082_v44 = vld [vmem:[%s12875_s1 + $0x328] sm:$0xff] }
0x1372   :  { %v2940_v47 = vadd.f32 %v9343_v43, %v2926_v46  ;;  %v11928_v43 = vld [vmem:[%s12876_s0 + $0x8] sm:$0xff] }
0x1373   :  { %v2943_v48 = vadd.f32 %v2941_v45, %v11696_v55  ;;  %v3083_v45 = vld [vmem:[%s12875_s1 + $0x330] sm:$0xff] }
0x1374   :  { %v2942_v49 = vadd.f32 %v2940_v47, %v11694_v54  ;;  %v2984_v54 = vld [vmem:[%s12875_s1 + $0x2d0] sm:$0xff]  ;;  %v10943_v46 = vpack.c.bf16 %v3083_v45, %v3082_v44  ;;  %v3830_v44 = vld [vmem:[%s12875_s1 + $0x3e8] sm:$0xff] }
0x1375   :  { %v2949_v50 = vsel %vm22_vm0, %v2943_v48, 0.0  ;;  %v10923_v0 = vpack.c.bf16 %v2985_v63, %v2984_v54  ;;  %v9346_v47 = vld [vmem:[%s12875_s1 + $0x2f0] ss:$0 sm:$0xff] }
0x1376   :  { %2950 = vadd.xlane.f32.xlu1 %v2949_v50  ;;  %v2946_v51 = vsel %vm22_vm0, %v2942_v49, 0.0  ;;  %10944 = vmatprep.subr.bf16.mxu0 %v10943_v46  ;;  %v3831_v45 = vld [vmem:[%s12875_s1 + $0x3f0] sm:$0xff] }
0x1377   :  { %2947 = vadd.xlane.f32.xlu0 %v2946_v51  ;;  %10924 = vmatprep.subr.bf16.mxu1 %v10923_v0 }
0x1378   :  { %10926 = vmatpush3.bf16.msra.mxu1 %v10923_v0  ;;  %10946 = vmatpush3.bf16.msra.mxu0 %v10943_v46  ;;  %v3420_v0 = vld [vmem:[%s12875_s1 + $0x390] sm:$0xff] }
0x1379   :  { %10928 = vmatprep.subr.bf16.mxu1 %v10927_v3 }
0x137c   :  { %10930 = vmatpush3.bf16.msra.mxu1 %v10927_v3  ;;  %v10963_v3 = vpack.c.bf16 %v3421_v1, %v3420_v0 }
0x137d   :  { %10948 = vmatprep.subr.bf16.mxu1 %v10947_v7 }
0x137e   :  { %10964 = vmatprep.subr.bf16.mxu0 %v10963_v3 }
0x1403   :  { %v2951_v52 = vpop.xlane.xlu1 %2950 }
0x1404   :  { %v2953_v53 = vmul.f32 0.03125, %v2951_v52  ;;  %v2948_v56 = vpop.xlane.xlu0 %2947 }
0x1405   :  { %v2952_v57 = vmul.f32 0.03125, %v2948_v56 }
0x1406   :  { %v2955_v58 = vsub.f32 %v2943_v48, %v2953_v53 }
0x1407   :  { %v2954_v59 = vsub.f32 %v2942_v49, %v2952_v57 }
0x1408   :  { %v2957_v60 = vmul.f32 %v2955_v58, %v2955_v58 }
0x1409   :  { %v2956_v61 = vmul.f32 %v2954_v59, %v2954_v59 }
0x140a   :  { %v2961_v62 = vsel %vm22_vm0, %v2957_v60, 0.0 }
0x140b   :  { %2962 = vadd.xlane.f32.xlu1 %v2961_v62  ;;  %v2958_v55 = vsel %vm22_vm0, %v2956_v61, 0.0  ;;  %v9356_v61 = vld [vmem:[%s12875_s1 + $0x3c0] ss:$0 sm:$0xff] }
0x140c   :  { %2959 = vadd.xlane.f32.xlu0 %v2958_v55 }
0x1498   :  { %v2963_v9 = vpop.xlane.xlu1 %2962 }
0x1499   :  { %v2965_v20 = vmul.f32 0.03125, %v2963_v9  ;;  %v2960_v21 = vpop.xlane.xlu0 %2959 }
0x149a   :  { %v2964_v22 = vmul.f32 0.03125, %v2960_v21 }
0x149b   :  { %v2967_v23 = vadd.f32 1e-05, %v2965_v20 }
0x149c   :  { %v2966_v24 = vadd.f32 1e-05, %v2964_v22 }
0x149d   :  { %11273 = vrsqrt.f32 %v2967_v23 }
0x149e   :  { %11275 = vrsqrt.f32 %v2966_v24 }
0x14a7   :  { %v11274_v25 = vpop.eup %11273 }
0x14a8   :  { %v11276_v12 = vpop.eup %11275  ;;  %v2971_v5 = vmul.f32 %v11274_v25, %v2955_v58  ;;  %v9359_v58 = vld [vmem:[%s12875_s1 + $0x3c8] ss:$0 sm:$0xff] }
0x14a9   :  { %v2970_v27 = vmul.f32 %v11276_v12, %v2954_v59 }
0x14aa   :  { %v2977_v29 = vmul.f32 %v9344_v26, %v2971_v5 }
0x14ab   :  { %v2976_v30 = vmul.f32 %v9344_v26, %v2970_v27 }
0x14ac   :  { %v11900_v34 = vadd.f32 %v9345_v28, %v2977_v29 }
0x14ad   :  { %v11898_v33 = vadd.f32 %v9345_v28, %v2976_v30  ;;  %v9362_v28 = vld [vmem:[%s12875_s1 + $0x3d0] ss:$0 sm:$0xff] }
0x14af   :  { %10225 = vmatprep.mubr.msk.f32.mxu1 %vm22_vm0, %v11898_v33 }
0x14b0   :  { %10226 = vmatmul.mubr.msk.f32.vlgmr.msra.gmra.mrb[38].mxu1 %vm22_vm0, %v11900_v34 }
0x14b1   :  { %10950 = vmatpush3.bf16.msra.mxu1 %v10947_v7  ;;  %10255 = vmatprep.mubr.msk.f32.mxu1 %vm22_vm0, %v11915_v38 }
0x14b2   :  { %10952 = vmatprep.subr.bf16.mxu1 %v10951_v35 }
0x14b5   :  { %10954 = vmatpush3.bf16.msra.mxu1 %v10951_v35  ;;  %v3913_v35 = vld [vmem:[%s12875_s1 + $0x400] sm:$0xff] }
0x14b6   :  { %10956 = vmatprep.subr.bf16.mxu1 %v10955_v39  ;;  %v10979_v36 = vpack.c.bf16 %v3913_v35, %v3912_v32 }
0x14b8   :  { %10256 = vmatmul.mubr.msk.f32.vlgmr.msra.gmra.mrb[40].mxu1 %vm22_vm0, %v11928_v43 }
0x14b9   :  { %10958 = vmatpush3.bf16.msra.mxu1 %v10955_v39  ;;  %10266 = vmatprep.mubr.msk.f32.mxu1 %vm22_vm0, %v11915_v38  ;;  %v3829_v39 = vld [vmem:[%s12875_s1 + $0x3e0] sm:$0xff] }
0x14ba   :  { %10960 = vmatprep.subr.bf16.mxu1 %v10959_v42  ;;  %v10971_v40 = vpack.c.bf16 %v3829_v39, %v3828_v37 }
0x14bd   :  { %10962 = vmatpush3.bf16.msra.mxu1 %v10959_v42 }
0x14be   :  { %10280 = vmatprep.subr.mxu1 %v11379_v14 }
0x14c0   :  { %10267 = vmatmul.mubr.msk.f32.vlgmr.msra.gmra.mrb[42].mxu1 %vm22_vm0, %v11928_v43 }
0x14c1   :  { %10282 = vmatprep.mubr.msk.f32.mxu1 %vm11380_vm1, %v11379_v14 }
0x1583   :  { %v10227_v48 = vpop.f32.mrb[38].mxu1 }
0x1584   :  { %v3071_v49 = vadd.f32 %v10227_v48, %v9346_v47  ;;  %v3065_v50 = vpop.f32.mrb[39].mxu1  ;;  %v10975_v48 = vpack.c.bf16 %v3831_v45, %v3830_v44 }
0x1585   :  { %v3066_v51 = vadd.f32 %v9346_v47, %v3065_v50  ;;  %v3915_v50 = vld [vmem:[%s12875_s1 + $0x410] sm:$0xff] }
0x1586   :  { %v3075_v53 = vmax.f32 %v3071_v49, 0.0  ;;  %v3914_v49 = vld [vmem:[%s12875_s1 + $0x408] sm:$0xff] }
0x1587   :  { %v3074_v52 = vmax.f32 %v3066_v51, 0.0 }
0x1589   :  { %10244 = vmatprep.mubr.msk.f32.mxu0 %vm1491_vm4, %v3074_v52 }
0x158a   :  { %10245 = vmatmul.mubr.msk.f32.vlgmr.msra.gmra.mrb[26].mxu0 %vm1491_vm4, %v3075_v53  ;;  %v10983_v53 = vpack.c.bf16 %v3915_v50, %v3914_v49 }
0x158b   :  { %v10257_v56 = vpop.f32.mrb[40].mxu1  ;;  %10277 = vmatprep.mubr.msk.f32.mxu0 %vm22_vm0, %v11915_v38  ;;  %10966 = vmatpush3.bf16.msra.mxu0 %v10963_v3 }
0x158c   :  { %v3327_v57 = vpop.f32.mrb[41].mxu1  ;;  %v3333_v63 = vadd.f32 %v10257_v56, %v9356_v61  ;;  %10968 = vmatprep.subr.bf16.mxu0 %v10967_v6 }
0x158d   :  { %v3328_v55 = vadd.f32 %v9356_v61, %v3327_v57 }
0x158f   :  { %10970 = vmatpush3.bf16.msra.mxu0 %v10967_v6  ;;  %v3997_v6 = vld [vmem:[%s12875_s1 + $0x420] sm:$0xff] }
0x1590   :  { %10290 = vmatprep.subr.mxu0 %v11379_v14 }
0x1592   :  { %10278 = vmatmul.mubr.msk.f32.vlgmr.msra.gmra.mrb[28].mxu0 %vm22_vm0, %v11928_v43 }
0x1593   :  { %v10268_v59 = vpop.f32.mrb[42].mxu1  ;;  %10292 = vmatprep.mubr.msk.f32.mxu0 %vm11380_vm1, %v11379_v14 }
0x1594   :  { %v3411_v60 = vpop.f32.mrb[43].mxu1  ;;  %v3417_v54 = vadd.f32 %v10268_v59, %v9359_v58 }
0x1595   :  { %v3412_v62 = vadd.f32 %v9359_v58, %v3411_v60 }
0x1597   :  { %10281 = vmatpush3.xpose.msk.msra.mxu1 %vm272_vm2, %v3412_v62  ;;  %v9374_v62 = vld [vmem:[%s12875_s1 + $0x450] ss:$0 sm:$0xff] }
0x1598   :  { %10285 = vmatprep.subr.mxu1 %v11379_v14 }
0x159a   :  { %10283 = vmatmul.mubr.msk.f32.vlgmr.msra.gmra.mrb[44].mxu1 %vm272_vm2, %v3328_v55 }
0x159b   :  { %10286 = vmatpush3.xpose.msk.msra.mxu1 %vm272_vm2, %v3417_v54  ;;  %10287 = vmatprep.mubr.msk.f32.mxu1 %vm11380_vm1, %v11379_v14  ;;  %v9371_v54 = vld [vmem:[%s12875_s1 + $0x448] ss:$0 sm:$0xff] }
0x159c   :  { %10295 = vmatprep.subr.mxu1 %v11379_v14 }
0x159e   :  { %10288 = vmatmul.mubr.msk.f32.vlgmr.msra.gmra.mrb[46].mxu1 %vm272_vm2, %v3333_v63 }
0x159f   :  { %10297 = vmatprep.mubr.msk.f32.mxu1 %vm11380_vm1, %v11379_v14 }
0x165d   :  { %v11985_v7 = vpop.f32.mrb[26].mxu0 }
0x165e   :  { %v11987_v8 = vpop.f32.mrb[27].mxu0 }
0x1665   :  { %v10279_v27 = vpop.f32.mrb[28].mxu0 }
0x1666   :  { %v3495_v29 = vpop.f32.mrb[29].mxu0  ;;  %v3501_v31 = vadd.f32 %v10279_v27, %v9362_v28  ;;  %v9349_v27 = vld [vmem:[%s12875_s1 + $0x338] ss:$0 sm:$0xff] }
0x1667   :  { %v3496_v30 = vadd.f32 %v9362_v28, %v3495_v29  ;;  %v3162_v28 = vadd.f32 %v9349_v27, %v11987_v8 }
0x1668   :  { %10296 = vmatpush3.msra.mxu1 %v3501_v31 }
0x1669   :  { %10291 = vmatpush3.msra.mxu0 %v3496_v30  ;;  %10980 = vmatprep.subr.bf16.mxu1 %v10979_v36  ;;  %v3167_v30 = vadd.f32 %v11985_v7, %v9349_v27  ;;  %v3170_v32 = vadd.f32 %v3162_v28, %v11898_v33  ;;  %v9377_v7 = vld [vmem:[%s12875_s1 + $0x458] ss:$0 sm:$0xff] }
0x166a   :  { %10972 = vmatprep.subr.bf16.mxu0 %v10971_v40 }
0x166b   :  { %v3174_v37 = vsel %vm22_vm0, %v3170_v32, 0.0  ;;  %v3171_v39 = vadd.f32 %v3167_v30, %v11900_v34 }
0x166d   :  { %v3576_v10 = vpop.f32.mrb[44].mxu1 }
0x166e   :  { %v3656_v13 = vmul.f32 0.25, %v3576_v10  ;;  %v10284_v15 = vpop.f32.mrb[45].mxu1  ;;  %v3998_v10 = vld [vmem:[%s12875_s1 + $0x428] sm:$0xff] }
0x166f   :  { %v3999_v15 = vld [vmem:[%s12875_s1 + $0x430] sm:$0xff] }
0x1670   :  { %v3658_v16 = vsel %vm427_vm3, %v3656_v13, -inf }
0x1671   :  { %3659 = vmax.xlane.f32.xlu1 %v3658_v16  ;;  %v3652_v17 = vpop.f32.mrb[46].mxu1  ;;  %v10991_v16 = vpack.c.bf16 %v3999_v15, %v3998_v10 }
0x1672   :  { %v3657_v18 = vmul.f32 0.25, %v3652_v17  ;;  %v10289_v11 = vpop.f32.mrb[47].mxu1 }
0x1674   :  { %v3661_v19 = vsel %vm427_vm3, %v3657_v18, -inf }
0x1675   :  { %3662 = vmax.xlane.f32.xlu0 %v3661_v19 }
0x16fe   :  { %v3660_v9 = vpop.xlane.xlu1 %3659 }
0x16ff   :  { %v3664_v20 = vsub.f32 %v3656_v13, %v3660_v9  ;;  %v10987_v13 = vpack.c.bf16 %v3997_v6, %v3996_v4 }
0x1701   :  { %v3666_v21 = vmul.f32 1.442695, %v3664_v20 }
0x1702   :  { %v3663_v22 = vpop.xlane.xlu0 %3662 }
0x1703   :  { %11277 = vpow2.f32 %v3666_v21  ;;  %v3665_v23 = vsub.f32 %v3657_v18, %v3663_v22 }
0x1705   :  { %v3668_v24 = vmul.f32 1.442695, %v3665_v23 }
0x1707   :  { %11279 = vpow2.f32 %v3668_v24 }
0x170d   :  { %v11278_v25 = vpop.eup %11277 }
0x170e   :  { %v3670_v26 = vsel %vm427_vm3, %v11278_v25, 0.0 }
0x170f   :  { %3671 = vadd.xlane.f32.xlu1 %v3670_v26 }
0x1711   :  { %v11280_v12 = vpop.eup %11279 }
0x1712   :  { %v3673_v5 = vsel %vm427_vm3, %v11280_v12, 0.0 }
0x1713   :  { %3674 = vadd.xlane.f32.xlu0 %v3673_v5 }
0x179c   :  { %v3672_v41 = vpop.xlane.xlu1 %3671 }
0x179d   :  { %11281 = vrcp.f32 %v3672_v41 }
0x17a0   :  { %v3675_v42 = vpop.xlane.xlu0 %3674 }
0x17a1   :  { %11283 = vrcp.f32 %v3675_v42 }
0x17a7   :  { %v11282_v46 = vpop.eup %11281 }
0x17a8   :  { %v3678_v47 = vmul.f32 %v11282_v46, %v11278_v25 }
0x17aa   :  { %10293 = vmatmul.mubr.msk.f32.vlgmr.msra.gmra.mrb[30].mxu0 %vm427_vm3, %v3678_v47 }
0x17ab   :  { %v11284_v51 = vpop.eup %11283  ;;  %10974 = vmatpush3.bf16.msra.mxu0 %v10971_v40  ;;  %10308 = vmatprep.mubr.msk.f32.mxu0 %vm22_vm0, %v11915_v38  ;;  %v3177_v40 = vsel %vm22_vm0, %v3171_v39, 0.0 }
0x17ac   :  { %v3679_v52 = vmul.f32 %v11284_v51, %v11280_v12  ;;  %10976 = vmatprep.subr.bf16.mxu0 %v10975_v48 }
0x17ae   :  { %10298 = vmatmul.mubr.msk.f32.vlgmr.msra.gmra.mrb[48].mxu1 %vm427_vm3, %v3679_v52 }
0x17af   :  { %10982 = vmatpush3.bf16.msra.mxu1 %v10979_v36  ;;  %10978 = vmatpush3.bf16.msra.mxu0 %v10975_v48 }
0x17b0   :  { %10984 = vmatprep.subr.bf16.mxu1 %v10983_v53  ;;  %10319 = vmatprep.mubr.msk.f32.mxu1 %vm22_vm0, %v11915_v38 }
0x17b1   :  { %10988 = vmatprep.subr.bf16.mxu0 %v10987_v13 }
0x17b2   :  { %10309 = vmatmul.mubr.msk.f32.vlgmr.msra.gmra.mrb[32].mxu0 %vm22_vm0, %v11928_v43 }
0x17b3   :  { %10986 = vmatpush3.bf16.msra.mxu1 %v10983_v53  ;;  %10330 = vmatprep.mubr.msk.f32.mxu0 %vm22_vm0, %v11915_v38 }
0x17b4   :  { %10333 = vmatprep.subr.mxu1 %v11379_v14  ;;  %10990 = vmatpush3.bf16.msra.mxu0 %v10987_v13 }
0x17b5   :  { %10992 = vmatprep.subr.bf16.mxu0 %v10991_v16 }
0x17b6   :  { %10320 = vmatmul.mubr.msk.f32.vlgmr.msra.gmra.mrb[50].mxu1 %vm22_vm0, %v11928_v43 }
0x17b7   :  { %10335 = vmatprep.mubr.msk.f32.mxu1 %vm11380_vm1, %v11379_v14 }
0x17b8   :  { %10994 = vmatpush3.bf16.msra.mxu0 %v10991_v16 }
0x17b9   :  { %10343 = vmatprep.subr.mxu0 %v11379_v14 }
0x17bb   :  { %10331 = vmatmul.mubr.msk.f32.vlgmr.msra.gmra.mrb[34].mxu0 %vm22_vm0, %v11928_v43 }
0x17bc   :  { %10345 = vmatprep.mubr.msk.f32.mxu0 %vm11380_vm1, %v11379_v14 }
0x187d   :  { %v12035_v56 = vpop.f32.mrb[30].mxu0 }
0x187e   :  { %v10294_v57 = vpop.f32.mrb[31].mxu0 }
0x1881   :  { %v12037_v58 = vpop.f32.mrb[48].mxu1 }
0x1882   :  { %v10299_v59 = vpop.f32.mrb[49].mxu1 }
0x1885   :  { %v10310_v60 = vpop.f32.mrb[32].mxu0 }
0x1886   :  { %v3903_v61 = vpop.f32.mrb[33].mxu0  ;;  %v3909_v3 = vadd.f32 %v10310_v60, %v9371_v54 }
0x1887   :  { %v3904_v1 = vadd.f32 %v9371_v54, %v3903_v61  ;;  %v4403_v54 = vld [vmem:[%s12875_s1 + $0x440] sm:$0xff] }
0x1889   :  { %v10321_v55 = vpop.f32.mrb[50].mxu1 }
0x188a   :  { %v3987_v63 = vpop.f32.mrb[51].mxu1  ;;  %v3993_v2 = vadd.f32 %v10321_v55, %v9374_v62  ;;  %v4402_v55 = vld [vmem:[%s12875_s1 + $0x438] sm:$0xff] }
0x188b   :  { %v3988_v0 = vadd.f32 %v9374_v62, %v3987_v63  ;;  %v10995_v63 = vpack.c.bf16 %v4403_v54, %v4402_v55 }
0x188d   :  { %10334 = vmatpush3.xpose.msk.msra.mxu1 %vm272_vm2, %v3988_v0  ;;  %v3826_v0 = vld [vmem:[%s12875_s1 + $0x3b0] sm:$0xff] }
0x188e   :  { %10338 = vmatprep.subr.mxu1 %v11379_v14  ;;  %v10332_v8 = vpop.f32.mrb[34].mxu0 }
0x188f   :  { %v4071_v41 = vpop.f32.mrb[35].mxu0  ;;  %v4077_v42 = vadd.f32 %v10332_v8, %v9377_v7 }
0x1890   :  { %10336 = vmatmul.mubr.msk.f32.vlgmr.msra.gmra.mrb[52].mxu1 %vm272_vm2, %v3904_v1  ;;  %v4072_v33 = vadd.f32 %v9377_v7, %v4071_v41  ;;  %v3827_v1 = vld [vmem:[%s12875_s1 + $0x3b8] sm:$0xff] }
0x1891   :  { %10339 = vmatpush3.xpose.msk.msra.mxu1 %vm272_vm2, %v3993_v2  ;;  %10340 = vmatprep.mubr.msk.f32.mxu1 %vm11380_vm1, %v11379_v14  ;;  %v10999_v2 = vpack.c.bf16 %v3827_v1, %v3826_v0 }
0x1892   :  { %10348 = vmatprep.subr.mxu1 %v11379_v14  ;;  %10344 = vmatpush3.msra.mxu0 %v4072_v33 }
0x1893   :  { %10996 = vmatprep.subr.bf16.mxu0 %v10995_v63 }
0x1894   :  { %10341 = vmatmul.mubr.msk.f32.vlgmr.msra.gmra.mrb[54].mxu1 %vm272_vm2, %v3909_v3 }
0x1895   :  { %10350 = vmatprep.mubr.msk.f32.mxu1 %vm11380_vm1, %v11379_v14  ;;  %10349 = vmatpush3.msra.mxu1 %v4077_v42 }
0x1963   :  { %v4152_v17 = vpop.f32.mrb[52].mxu1 }
0x1964   :  { %v4232_v18 = vmul.f32 0.25, %v4152_v17  ;;  %v10337_v11 = vpop.f32.mrb[53].mxu1  ;;  %v9352_v17 = vld [vmem:[%s12875_s1 + $0x340] ss:$0 sm:$0xff] }
0x1965   :  { %v9353_v11 = vld [vmem:[%s12875_s1 + $0x348] ss:$0 sm:$0xff] }
0x1966   :  { %v4234_v19 = vsel %vm427_vm3, %v4232_v18, -inf }
0x1967   :  { %4235 = vmax.xlane.f32.xlu0 %v4234_v19  ;;  %v4228_v9 = vpop.f32.mrb[54].mxu1 }
0x1968   :  { %v4233_v20 = vmul.f32 0.25, %v4228_v9  ;;  %v10342_v21 = vpop.f32.mrb[55].mxu1 }
0x196a   :  { %v4237_v22 = vsel %vm427_vm3, %v4233_v20, -inf }
0x196b   :  { %4238 = vmax.xlane.f32.xlu1 %v4237_v22 }
0x19f4   :  { %v4236_v23 = vpop.xlane.xlu0 %4235 }
0x19f5   :  { %v4240_v24 = vsub.f32 %v4232_v18, %v4236_v23 }
0x19f7   :  { %v4242_v25 = vmul.f32 1.442695, %v4240_v24 }
0x19f8   :  { %v4239_v26 = vpop.xlane.xlu1 %4238 }
0x19f9   :  { %11285 = vpow2.f32 %v4242_v25  ;;  %v4241_v12 = vsub.f32 %v4233_v20, %v4239_v26 }
0x19fb   :  { %v4244_v5 = vmul.f32 1.442695, %v4241_v12 }
0x19fd   :  { %11287 = vpow2.f32 %v4244_v5 }
0x1a03   :  { %v11286_v29 = vpop.eup %11285 }
0x1a04   :  { %v4246_v31 = vsel %vm427_vm3, %v11286_v29, 0.0 }
0x1a05   :  { %4247 = vadd.xlane.f32.xlu0 %v4246_v31 }
0x1a07   :  { %v11288_v35 = vpop.eup %11287 }
0x1a08   :  { %v4249_v36 = vsel %vm427_vm3, %v11288_v35, 0.0 }
0x1a09   :  { %4250 = vadd.xlane.f32.xlu1 %v4249_v36  ;;  %3175 = vadd.xlane.f32.xlu0 %v3174_v37 }
0x1a0d   :  { %3178 = vadd.xlane.f32.xlu1 %v3177_v40 }
0x1a92   :  { %v4248_v44 = vpop.xlane.xlu0 %4247 }
0x1a93   :  { %11289 = vrcp.f32 %v4248_v44 }
0x1a96   :  { %v4251_v45 = vpop.xlane.xlu1 %4250  ;;  %v3176_v46 = vpop.xlane.xlu0 %3175 }
0x1a97   :  { %11291 = vrcp.f32 %v4251_v45  ;;  %v3180_v34 = vmul.f32 0.03125, %v3176_v46 }
0x1a99   :  { %v3182_v47 = vsub.f32 %v3170_v32, %v3180_v34  ;;  %v9390_v32 = vld [vmem:[%s12875_s1 + $0x460] ss:$0 sm:$0xff]  ;;  %v4707_v34 = vld [vmem:[%s12875_s1 + $0x4a8] sm:$0xff] }
0x1a9a   :  { %v3179_v48 = vpop.xlane.xlu1 %3178 }
0x1a9b   :  { %v3181_v49 = vmul.f32 0.03125, %v3179_v48  ;;  %v3184_v50 = vmul.f32 %v3182_v47, %v3182_v47 }
0x1a9d   :  { %v11290_v51 = vpop.eup %11289  ;;  %v3183_v52 = vsub.f32 %v3171_v39, %v3181_v49  ;;  %v3186_v53 = vsel %vm22_vm0, %v3184_v50, 0.0 }
0x1a9e   :  { %v4254_v57 = vmul.f32 %v11290_v51, %v11286_v29  ;;  %3187 = vadd.xlane.f32.xlu0 %v3186_v53 }
0x1a9f   :  { %v3185_v59 = vmul.f32 %v3183_v52, %v3183_v52 }
0x1aa0   :  { %10346 = vmatmul.mubr.msk.f32.vlgmr.msra.gmra.mrb[36].mxu0 %vm427_vm3, %v4254_v57 }
0x1aa1   :  { %v11292_v60 = vpop.eup %11291  ;;  %v3189_v61 = vsel %vm22_vm0, %v3185_v59, 0.0  ;;  %10998 = vmatpush3.bf16.msra.mxu0 %v10995_v63 }
0x1aa2   :  { %v4255_v62 = vmul.f32 %v11292_v60, %v11288_v35  ;;  %3190 = vadd.xlane.f32.xlu1 %v3189_v61  ;;  %11000 = vmatprep.subr.bf16.mxu0 %v10999_v2 }
0x1aa4   :  { %10351 = vmatmul.mubr.msk.f32.vlgmr.msra.gmra.mrb[56].mxu1 %vm427_vm3, %v4255_v62 }
0x1b2b   :  { %v3188_v3 = vpop.xlane.xlu0 %3187 }
0x1b2c   :  { %v3192_v4 = vmul.f32 0.03125, %v3188_v3 }
0x1b2e   :  { %v3194_v6 = vadd.f32 1e-05, %v3192_v4  ;;  %v9354_v4 = vld [vmem:[%s12875_s1 + $0x8f0] ss:$0 sm:$0xff] }
0x1b2f   :  { %v3191_v10 = vpop.xlane.xlu1 %3190 }
0x1b30   :  { %11293 = vrsqrt.f32 %v3194_v6  ;;  %v3193_v13 = vmul.f32 0.03125, %v3191_v10 }
0x1b32   :  { %v3195_v15 = vadd.f32 1e-05, %v3193_v13 }
0x1b34   :  { %11295 = vrsqrt.f32 %v3195_v15  ;;  %v9355_v15 = vld [vmem:[%s12875_s1 + $0x8f8] ss:$0 sm:$0xff] }
0x1b3a   :  { %v11294_v16 = vpop.eup %11293 }
0x1b3b   :  { %v3198_v18 = vmul.f32 %v11294_v16, %v3182_v47  ;;  %v4708_v47 = vld [vmem:[%s12875_s1 + $0x4b0] sm:$0xff] }
0x1b3c   :  { %v11015_v48 = vpack.c.bf16 %v4708_v47, %v4707_v34 }
0x1b3d   :  { %v3204_v19 = vmul.f32 %v9352_v17, %v3198_v18 }
0x1b3e   :  { %v11296_v9 = vpop.eup %11295 }
0x1b3f   :  { %v3210_v20 = vadd.f32 %v9353_v11, %v3204_v19  ;;  %v3199_v21 = vmul.f32 %v11296_v9, %v3183_v52  ;;  %v4615_v19 = vld [vmem:[%s12875_s1 + $0x478] sm:$0xff]  ;;  %v4616_v9 = vld [vmem:[%s12875_s1 + $0x480] sm:$0xff] }
0x1b41   :  { %v3214_v22 = vsel %vm22_vm0, %v3210_v20, 0.0  ;;  %v3205_v23 = vmul.f32 %v9352_v17, %v3199_v21  ;;  %v4617_v21 = vld [vmem:[%s12875_s1 + $0x488] sm:$0xff] }
0x1b42   :  { %3215 = vadd.xlane.f32.xlu0 %v3214_v22  ;;  %v4618_v22 = vld [vmem:[%s12875_s1 + $0x490] sm:$0xff] }
0x1b43   :  { %v3211_v24 = vadd.f32 %v9353_v11, %v3205_v23  ;;  %v11007_v23 = vpack.c.bf16 %v4618_v22, %v4617_v21  ;;  %v5203_v21 = vld [vmem:[%s12875_s1 + $0x500] sm:$0xff]  ;;  %v5204_v22 = vld [vmem:[%s12875_s1 + $0x508] sm:$0xff] }
0x1b45   :  { %v3217_v25 = vsel %vm22_vm0, %v3211_v24, 0.0 }
0x1b46   :  { %3218 = vadd.xlane.f32.xlu1 %v3217_v25  ;;  %v4796_v25 = vld [vmem:[%s12875_s1 + $0x4c0] sm:$0xff] }
0x1b73   :  { %v4325_v26 = vpop.f32.mrb[36].mxu0 }
0x1b74   :  { %v10347_v12 = vpop.f32.mrb[37].mxu0  ;;  %10357 = vmatprep.mubr.msk.f32.mxu0 %vm272_vm2, %v4325_v26 }
0x1b77   :  { %v4398_v5 = vpop.f32.mrb[56].mxu1 }
0x1b78   :  { %v10352_v27 = vpop.f32.mrb[57].mxu1  ;;  %10358 = vmatmul.mubr.msk.f32.vlgmr.msra.gmra.mrb[38].mxu0 %vm272_vm2, %v4398_v5 }
0x1b79   :  { %11002 = vmatpush3.bf16.msra.mxu0 %v10999_v2  ;;  %10364 = vmatprep.mubr.msk.f32.mxu0 %vm272_vm2, %v12035_v56 }
0x1b80   :  { %10365 = vmatmul.mubr.msk.f32.vlgmr.msra.gmra.mrb[38].mxu0 %vm272_vm2, %v12037_v58 }
0x1bcf   :  { %v3216_v29 = vpop.xlane.xlu0 %3215 }
0x1bd0   :  { %v3220_v31 = vmul.f32 0.03125, %v3216_v29 }
0x1bd2   :  { %v3222_v40 = vsub.f32 %v3210_v20, %v3220_v31  ;;  %v11003_v20 = vpack.c.bf16 %v4616_v9, %v4615_v19  ;;  %v5287_v19 = vld [vmem:[%s12875_s1 + $0x520] sm:$0xff]  ;;  %v5288_v9 = vld [vmem:[%s12875_s1 + $0x528] sm:$0xff] }
0x1bd3   :  { %v3219_v28 = vpop.xlane.xlu1 %3218 }
0x1bd4   :  { %v3221_v30 = vmul.f32 0.03125, %v3219_v28  ;;  %v3224_v42 = vmul.f32 %v3222_v40, %v3222_v40  ;;  %11004 = vmatprep.subr.bf16.mxu1 %v11003_v20 }
0x1bd5   :  { %11006 = vmatpush3.bf16.msra.mxu1 %v11003_v20  ;;  %v11035_v20 = vpack.c.bf16 %v5288_v9, %v5287_v19 }
0x1bd6   :  { %v3223_v36 = vsub.f32 %v3211_v24, %v3221_v30  ;;  %v3226_v45 = vsel %vm22_vm0, %v3224_v42, 0.0  ;;  %11008 = vmatprep.subr.bf16.mxu1 %v11007_v23  ;;  %v4795_v24 = vld [vmem:[%s12875_s1 + $0x4b8] sm:$0xff]  ;;  %v9396_v42 = vld [vmem:[%s12875_s1 + $0x4f0] ss:$0 sm:$0xff] }
0x1bd7   :  { %v11019_v26 = vpack.c.bf16 %v4796_v25, %v4795_v24 }
0x1bd8   :  { %v3225_v41 = vmul.f32 %v3223_v36, %v3223_v36 }
0x1bd9   :  { %11010 = vmatpush3.bf16.msra.mxu1 %v11007_v23  ;;  %v11027_v23 = vpack.c.bf16 %v5204_v22, %v5203_v21 }
0x1bda   :  { %v3229_v44 = vsel %vm22_vm0, %v3225_v41, 0.0  ;;  %11020 = vmatprep.subr.bf16.mxu1 %v11019_v26 }
0x1c53   :  { %v10366_v35 = vpop.f32.mrb[38].mxu0 }
0x1c54   :  { %v4572_v37 = vadd.f32 %v10366_v35, %v9390_v32  ;;  %v4557_v39 = vpop.f32.mrb[39].mxu0 }
0x1c55   :  { %v4571_v8 = vadd.f32 %v9390_v32, %v4557_v39  ;;  %v9391_v32 = vld [vmem:[%s12875_s1 + $0x468] ss:$0 sm:$0xff]  ;;  %v9392_v39 = vld [vmem:[%s12875_s1 + $0x470] ss:$0 sm:$0xff] }
0x1c56   :  { %v4574_v7 = vadd.f32 %v11928_v43, %v4572_v37  ;;  %v4705_v43 = vld [vmem:[%s12875_s1 + $0x498] sm:$0xff] }
0x1c57   :  { %v4573_v56 = vadd.f32 %v11915_v38, %v4571_v8  ;;  %v4706_v38 = vld [vmem:[%s12875_s1 + $0x4a0] sm:$0xff] }
0x1c58   :  { %v4580_v58 = vsel %vm22_vm0, %v4574_v7, 0.0  ;;  %v11011_v46 = vpack.c.bf16 %v4706_v38, %v4705_v43 }
0x1c59   :  { %4581 = vadd.xlane.f32.xlu1 %v4580_v58  ;;  %v4577_v33 = vsel %vm22_vm0, %v4573_v56, 0.0 }
0x1c5a   :  { %4578 = vadd.xlane.f32.xlu0 %v4577_v33  ;;  %11012 = vmatprep.subr.bf16.mxu0 %v11011_v46 }
0x1c5b   :  { %11014 = vmatpush3.bf16.msra.mxu0 %v11011_v46  ;;  %v9393_v46 = vld [vmem:[%s12875_s1 + $0x4e8] ss:$0 sm:$0xff] }
0x1c5c   :  { %11016 = vmatprep.subr.bf16.mxu0 %v11015_v48 }
0x1c5d   :  { %3230 = vadd.xlane.f32.xlu1 %v3229_v44 }
0x1c5e   :  { %3227 = vadd.xlane.f32.xlu0 %v3226_v45 }
0x1c5f   :  { %11018 = vmatpush3.bf16.msra.mxu0 %v11015_v48 }
0x1c60   :  { %10400 = vmatprep.subr.mxu0 %v11379_v14 }
0x1ce6   :  { %v4582_v49 = vpop.xlane.xlu1 %4581 }
0x1ce7   :  { %v4584_v50 = vmul.f32 0.03125, %v4582_v49  ;;  %v4579_v51 = vpop.xlane.xlu0 %4578 }
0x1ce8   :  { %v4583_v52 = vmul.f32 0.03125, %v4579_v51 }
0x1ce9   :  { %v4586_v53 = vsub.f32 %v4574_v7, %v4584_v50  ;;  %v4797_v7 = vld [vmem:[%s12875_s1 + $0x4c8] sm:$0xff]  ;;  %v9399_v50 = vld [vmem:[%s12875_s1 + $0x4f8] ss:$0 sm:$0xff] }
0x1cea   :  { %v4585_v57 = vsub.f32 %v4573_v56, %v4583_v52  ;;  %v3231_v59 = vpop.xlane.xlu1 %3230  ;;  %v4798_v56 = vld [vmem:[%s12875_s1 + $0x4d0] sm:$0xff] }
0x1ceb   :  { %v3233_v60 = vmul.f32 0.03125, %v3231_v59  ;;  %v3228_v61 = vpop.xlane.xlu0 %3227  ;;  %v4588_v62 = vmul.f32 %v4586_v53, %v4586_v53  ;;  %v11023_v33 = vpack.c.bf16 %v4798_v56, %v4797_v7 }
0x1cec   :  { %v3232_v55 = vmul.f32 0.03125, %v3228_v61  ;;  %v4587_v54 = vmul.f32 %v4585_v57, %v4585_v57 }
0x1ced   :  { %v3235_v63 = vadd.f32 1e-05, %v3233_v60  ;;  %v4592_v0 = vsel %vm22_vm0, %v4588_v62, 0.0 }
0x1cee   :  { %v3234_v1 = vadd.f32 1e-05, %v3232_v55  ;;  %4593 = vadd.xlane.f32.xlu1 %v4592_v0  ;;  %v4589_v2 = vsel %vm22_vm0, %v4587_v54, 0.0 }
0x1cef   :  { %11297 = vrsqrt.f32 %v3235_v63  ;;  %4590 = vadd.xlane.f32.xlu0 %v4589_v2 }
0x1cf0   :  { %11299 = vrsqrt.f32 %v3234_v1 }
0x1cf9   :  { %v11298_v3 = vpop.eup %11297 }
0x1cfa   :  { %v11300_v6 = vpop.eup %11299  ;;  %v3239_v10 = vmul.f32 %v11298_v3, %v3223_v36 }
0x1cfb   :  { %v3238_v13 = vmul.f32 %v11300_v6, %v3222_v40 }
0x1cfc   :  { %v3245_v16 = vmul.f32 %v9354_v4, %v3239_v10 }
0x1cfd   :  { %v3244_v17 = vmul.f32 %v9354_v4, %v3238_v13 }
0x1cfe   :  { %v12150_v11 = vadd.f32 %v9355_v15, %v3245_v16 }
0x1cff   :  { %v12148_v18 = vadd.f32 %v9355_v15, %v3244_v17 }
0x1d01   :  { %10386 = vmatprep.mubr.msk.f32.mxu0 %vm22_vm0, %v12148_v18 }
0x1d02   :  { %10387 = vmatmul.mubr.msk.f32.vlgmr.msra.gmra.mrb[40].mxu0 %vm22_vm0, %v12150_v11 }
0x1d03   :  { %10402 = vmatprep.mubr.msk.f32.mxu0 %vm11380_vm1, %v11379_v14 }
0x1d7b   :  { %v4594_v12 = vpop.xlane.xlu1 %4593 }
0x1d7c   :  { %v4596_v5 = vmul.f32 0.03125, %v4594_v12  ;;  %v4591_v27 = vpop.xlane.xlu0 %4590  ;;  %v5290_v12 = vld [vmem:[%s12875_s1 + $0x538] sm:$0xff] }
0x1d7d   :  { %v4595_v28 = vmul.f32 0.03125, %v4591_v27  ;;  %v5205_v27 = vld [vmem:[%s12875_s1 + $0x510] sm:$0xff] }
0x1d7e   :  { %v4598_v29 = vadd.f32 1e-05, %v4596_v5 }
0x1d7f   :  { %v4597_v30 = vadd.f32 1e-05, %v4595_v28  ;;  %v5206_v28 = vld [vmem:[%s12875_s1 + $0x518] sm:$0xff] }
0x1d80   :  { %11301 = vrsqrt.f32 %v4598_v29 }
0x1d81   :  { %11303 = vrsqrt.f32 %v4597_v30 }
0x1d8a   :  { %v11302_v31 = vpop.eup %11301 }
0x1d8b   :  { %v11304_v35 = vpop.eup %11303  ;;  %v4602_v36 = vmul.f32 %v11302_v31, %v4586_v53 }
0x1d8c   :  { %v4601_v37 = vmul.f32 %v11304_v35, %v4585_v57  ;;  %v11031_v35 = vpack.c.bf16 %v5206_v28, %v5205_v27  ;;  %v5201_v27 = vld [vmem:[%s12875_s1 + $0x4d8] sm:$0xff]  ;;  %v5202_v28 = vld [vmem:[%s12875_s1 + $0x4e0] sm:$0xff] }
0x1d8d   :  { %v4608_v40 = vmul.f32 %v9391_v32, %v4602_v36  ;;  %v5371_v36 = vld [vmem:[%s12875_s1 + $0x540] sm:$0xff] }
0x1d8e   :  { %v4607_v8 = vmul.f32 %v9391_v32, %v4601_v37  ;;  %v5372_v37 = vld [vmem:[%s12875_s1 + $0x548] sm:$0xff] }
0x1d8f   :  { %v12190_v41 = vadd.f32 %v9392_v39, %v4608_v40  ;;  %v5373_v40 = vld [vmem:[%s12875_s1 + $0x550] sm:$0xff] }
0x1d90   :  { %v12188_v58 = vadd.f32 %v9392_v39, %v4607_v8  ;;  %v11043_v39 = vpack.c.bf16 %v5372_v37, %v5371_v36  ;;  %v5374_v8 = vld [vmem:[%s12875_s1 + $0x558] sm:$0xff]  ;;  %v9427_v36 = vld [vmem:[%s12875_s1 + $0x588] ss:$0 sm:$0xff] }
0x1d91   :  { %v11047_v7 = vpack.c.bf16 %v5374_v8, %v5373_v40 }
0x1d92   :  { %10375 = vmatprep.mubr.msk.f32.mxu1 %vm22_vm0, %v12188_v58 }
0x1d93   :  { %10376 = vmatmul.mubr.msk.f32.vlgmr.msra.gmra.mrb[58].mxu1 %vm22_vm0, %v12190_v41 }
0x1d94   :  { %11022 = vmatpush3.bf16.msra.mxu1 %v11019_v26  ;;  %10397 = vmatprep.mubr.msk.f32.mxu1 %vm22_vm0, %v12148_v18  ;;  %v5289_v26 = vld [vmem:[%s12875_s1 + $0x530] sm:$0xff] }
0x1d95   :  { %11024 = vmatprep.subr.bf16.mxu1 %v11023_v33  ;;  %v11039_v32 = vpack.c.bf16 %v5290_v12, %v5289_v26  ;;  %v5777_v26 = vld [vmem:[%s12875_s1 + $0x560] sm:$0xff]  ;;  %v5778_v12 = vld [vmem:[%s12875_s1 + $0x568] sm:$0xff] }
0x1d98   :  { %11026 = vmatpush3.bf16.msra.mxu1 %v11023_v33 }
0x1d99   :  { %10405 = vmatprep.subr.mxu1 %v11379_v14 }
0x1d9b   :  { %10398 = vmatmul.mubr.msk.f32.vlgmr.msra.gmra.mrb[60].mxu1 %vm22_vm0, %v12150_v11 }
0x1d9c   :  { %10407 = vmatprep.mubr.msk.f32.mxu1 %vm11380_vm1, %v11379_v14 }
0x1dd5   :  { %v10388_v44 = vpop.f32.mrb[40].mxu0 }
0x1dd6   :  { %v4792_v45 = vadd.f32 %v10388_v44, %v9396_v42  ;;  %v4786_v43 = vpop.f32.mrb[41].mxu0 }
0x1dd7   :  { %v4787_v38 = vadd.f32 %v9396_v42, %v4786_v43 }
0x1dd8   :  { %10406 = vmatpush3.xpose.msk.msra.mxu1 %vm272_vm2, %v4792_v45  ;;  %v9411_v45 = vld [vmem:[%s12875_s1 + $0x578] ss:$0 sm:$0xff] }
0x1dd9   :  { %10401 = vmatpush3.xpose.msk.msra.mxu0 %vm272_vm2, %v4787_v38  ;;  %10415 = vmatprep.subr.mxu1 %v11379_v14 }
0x1dda   :  { %10410 = vmatprep.subr.mxu0 %v11379_v14 }
0x1e66   :  { %v10377_v34 = vpop.f32.mrb[58].mxu1 }
0x1e67   :  { %v4702_v47 = vadd.f32 %v10377_v34, %v9393_v46  ;;  %v4696_v48 = vpop.f32.mrb[59].mxu1  ;;  %v9408_v34 = vld [vmem:[%s12875_s1 + $0x570] ss:$0 sm:$0xff] }
0x1e68   :  { %v4697_v49 = vadd.f32 %v9393_v46, %v4696_v48 }
0x1e69   :  { %10408 = vmatmul.mubr.msk.f32.vlgmr.msra.gmra.mrb[62].mxu1 %vm272_vm2, %v4702_v47 }
0x1e6a   :  { %10403 = vmatmul.mubr.msk.f32.vlgmr.msra.gmra.mrb[42].mxu0 %vm272_vm2, %v4697_v49  ;;  %10417 = vmatprep.mubr.msk.f32.mxu1 %vm11380_vm1, %v11379_v14 }
0x1e6b   :  { %10412 = vmatprep.mubr.msk.f32.mxu0 %vm11380_vm1, %v11379_v14 }
0x1e6e   :  { %v10399_v51 = vpop.f32.mrb[60].mxu1 }
0x1e6f   :  { %v4876_v52 = vadd.f32 %v10399_v51, %v9399_v50  ;;  %v4870_v53 = vpop.f32.mrb[61].mxu1  ;;  %v9414_v51 = vld [vmem:[%s12875_s1 + $0x580] ss:$0 sm:$0xff] }
0x1e70   :  { %v4871_v57 = vadd.f32 %v9399_v50, %v4870_v53 }
0x1e71   :  { %10416 = vmatpush3.msra.mxu1 %v4876_v52 }
0x1e72   :  { %10411 = vmatpush3.msra.mxu0 %v4871_v57  ;;  %11036 = vmatprep.subr.bf16.mxu1 %v11035_v20 }
0x1e73   :  { %11028 = vmatprep.subr.bf16.mxu0 %v11027_v23 }
0x1f3c   :  { %v5027_v59 = vpop.f32.mrb[62].mxu1 }
0x1f3d   :  { %v5032_v60 = vmul.f32 0.25, %v5027_v59  ;;  %v4951_v61 = vpop.f32.mrb[42].mxu0  ;;  %v10409_v62 = vpop.f32.mrb[63].mxu1 }
0x1f3e   :  { %v5031_v55 = vmul.f32 0.25, %v4951_v61  ;;  %v10404_v54 = vpop.f32.mrb[43].mxu0 }
0x1f3f   :  { %v5036_v63 = vsel %vm427_vm3, %v5032_v60, -inf }
0x1f40   :  { %5037 = vmax.xlane.f32.xlu0 %v5036_v63  ;;  %v5033_v0 = vsel %vm427_vm3, %v5031_v55, -inf }
0x1f41   :  { %5034 = vmax.xlane.f32.xlu1 %v5033_v0 }
0x1fcd   :  { %v5038_v1 = vpop.xlane.xlu0 %5037 }
0x1fce   :  { %v5040_v2 = vsub.f32 %v5032_v60, %v5038_v1  ;;  %v5035_v3 = vpop.xlane.xlu1 %5034 }
0x1fcf   :  { %v5039_v4 = vsub.f32 %v5031_v55, %v5035_v3 }
0x1fd0   :  { %v5043_v6 = vmul.f32 1.442695, %v5040_v2 }
0x1fd1   :  { %v5041_v10 = vmul.f32 1.442695, %v5039_v4 }
0x1fd2   :  { %11305 = vpow2.f32 %v5043_v6 }
0x1fd3   :  { %11307 = vpow2.f32 %v5041_v10 }
0x1fdc   :  { %v11306_v13 = vpop.eup %11305 }
0x1fdd   :  { %v11308_v15 = vpop.eup %11307  ;;  %v5048_v16 = vsel %vm427_vm3, %v11306_v13, 0.0 }
0x1fde   :  { %5049 = vadd.xlane.f32.xlu0 %v5048_v16  ;;  %v5045_v17 = vsel %vm427_vm3, %v11308_v15, 0.0 }
0x1fdf   :  { %5046 = vadd.xlane.f32.xlu1 %v5045_v17 }
0x206b   :  { %v5050_v24 = vpop.xlane.xlu0 %5049 }
0x206c   :  { %11309 = vrcp.f32 %v5050_v24  ;;  %v5047_v25 = vpop.xlane.xlu1 %5046 }
0x206d   :  { %11311 = vrcp.f32 %v5047_v25 }
0x2076   :  { %v11310_v5 = vpop.eup %11309 }
0x2077   :  { %v11312_v29 = vpop.eup %11311  ;;  %v5054_v30 = vmul.f32 %v11310_v5, %v11306_v13  ;;  %v11051_v5 = vpack.c.bf16 %v5778_v12, %v5777_v26  ;;  %v6089_v26 = vld [vmem:[%s12875_s1 + $0x600] sm:$0xff] }
0x2078   :  { %v5053_v31 = vmul.f32 %v11312_v29, %v11308_v15  ;;  %v11055_v29 = vpack.c.bf16 %v5202_v28, %v5201_v27 }
0x2079   :  { %10418 = vmatmul.mubr.msk.f32.vlgmr.msra.gmra.mrb[64].mxu1 %vm427_vm3, %v5054_v30 }
0x207a   :  { %11038 = vmatpush3.bf16.msra.mxu1 %v11035_v20  ;;  %10413 = vmatmul.mubr.msk.f32.vlgmr.msra.gmra.mrb[44].mxu0 %vm427_vm3, %v5053_v31 }
0x207b   :  { %11030 = vmatpush3.bf16.msra.mxu0 %v11027_v23  ;;  %10439 = vmatprep.mubr.msk.f32.mxu1 %vm22_vm0, %v12148_v18 }
0x207c   :  { %10428 = vmatprep.mubr.msk.f32.mxu0 %vm22_vm0, %v12188_v58  ;;  %11040 = vmatprep.subr.bf16.mxu1 %v11039_v32 }
0x207d   :  { %11032 = vmatprep.subr.bf16.mxu0 %v11031_v35 }
0x207e   :  { %11042 = vmatpush3.bf16.msra.mxu1 %v11039_v32 }
0x207f   :  { %11034 = vmatpush3.bf16.msra.mxu0 %v11031_v35  ;;  %10453 = vmatprep.subr.mxu1 %v11379_v14 }
0x2080   :  { %11044 = vmatprep.subr.bf16.mxu0 %v11043_v39 }
0x2081   :  { %10440 = vmatmul.mubr.msk.f32.vlgmr.msra.gmra.mrb[66].mxu1 %vm22_vm0, %v12150_v11 }
0x2082   :  { %10429 = vmatmul.mubr.msk.f32.vlgmr.msra.gmra.mrb[46].mxu0 %vm22_vm0, %v12190_v41  ;;  %10455 = vmatprep.mubr.msk.f32.mxu1 %vm11380_vm1, %v11379_v14 }
0x2083   :  { %11046 = vmatpush3.bf16.msra.mxu0 %v11043_v39  ;;  %10450 = vmatprep.mubr.msk.f32.mxu0 %vm22_vm0, %v12148_v18 }
0x2084   :  { %11048 = vmatprep.subr.bf16.mxu0 %v11047_v7 }
0x2087   :  { %11050 = vmatpush3.bf16.msra.mxu0 %v11047_v7 }
0x2088   :  { %10463 = vmatprep.subr.mxu0 %v11379_v14 }
0x208a   :  { %10451 = vmatmul.mubr.msk.f32.vlgmr.msra.gmra.mrb[48].mxu0 %vm22_vm0, %v12150_v11 }
0x208b   :  { %10465 = vmatprep.mubr.msk.f32.mxu0 %vm11380_vm1, %v11379_v14 }
0x214c   :  { %v12282_v56 = vpop.f32.mrb[64].mxu1 }
0x214d   :  { %v12284_v33 = vpop.f32.mrb[44].mxu0  ;;  %v10419_v42 = vpop.f32.mrb[65].mxu1 }
0x214e   :  { %v10414_v44 = vpop.f32.mrb[45].mxu0 }
0x2154   :  { %v10441_v43 = vpop.f32.mrb[66].mxu1 }
0x2155   :  { %v10430_v38 = vpop.f32.mrb[46].mxu0  ;;  %v5362_v46 = vpop.f32.mrb[67].mxu1  ;;  %v5368_v50 = vadd.f32 %v10441_v43, %v9411_v45 }
0x2156   :  { %v5363_v47 = vadd.f32 %v9411_v45, %v5362_v46  ;;  %v5278_v48 = vpop.f32.mrb[47].mxu0  ;;  %v5284_v52 = vadd.f32 %v10430_v38, %v9408_v34 }
0x2157   :  { %v5279_v49 = vadd.f32 %v9408_v34, %v5278_v48 }
0x2158   :  { %10454 = vmatpush3.xpose.msk.msra.mxu1 %vm272_vm2, %v5363_v47 }
0x2159   :  { %10458 = vmatprep.subr.mxu1 %v11379_v14 }
0x215b   :  { %10456 = vmatmul.mubr.msk.f32.vlgmr.msra.gmra.mrb[68].mxu1 %vm272_vm2, %v5279_v49 }
0x215c   :  { %10459 = vmatpush3.xpose.msk.msra.mxu1 %vm272_vm2, %v5368_v50  ;;  %10460 = vmatprep.mubr.msk.f32.mxu1 %vm11380_vm1, %v11379_v14  ;;  %v5991_v50 = vld [vmem:[%s12875_s1 + $0x5a8] sm:$0xff] }
0x215d   :  { %v10452_v53 = vpop.f32.mrb[48].mxu0  ;;  %10468 = vmatprep.subr.mxu1 %v11379_v14 }
0x215e   :  { %v5452_v57 = vadd.f32 %v10452_v53, %v9414_v51  ;;  %v5446_v59 = vpop.f32.mrb[49].mxu0  ;;  %v5993_v53 = vld [vmem:[%s12875_s1 + $0x5b8] sm:$0xff] }
0x215f   :  { %v5447_v60 = vadd.f32 %v9414_v51, %v5446_v59  ;;  %10461 = vmatmul.mubr.msk.f32.vlgmr.msra.gmra.mrb[70].mxu1 %vm272_vm2, %v5284_v52  ;;  %v5992_v52 = vld [vmem:[%s12875_s1 + $0x5b0] sm:$0xff]  ;;  %v6082_v59 = vld [vmem:[%s12875_s1 + $0x5c8] sm:$0xff] }
0x2160   :  { %10469 = vmatpush3.msra.mxu1 %v5452_v57  ;;  %10470 = vmatprep.mubr.msk.f32.mxu1 %vm11380_vm1, %v11379_v14  ;;  %v11063_v57 = vpack.c.bf16 %v5993_v53, %v5992_v52  ;;  %v6393_v52 = vld [vmem:[%s12875_s1 + $0x668] sm:$0xff] }
0x2161   :  { %10464 = vmatpush3.msra.mxu0 %v5447_v60  ;;  %v6083_v60 = vld [vmem:[%s12875_s1 + $0x5d0] sm:$0xff] }
0x2162   :  { %11052 = vmatprep.subr.bf16.mxu0 %v11051_v5 }
0x222e   :  { %v5527_v61 = vpop.f32.mrb[68].mxu1 }
0x222f   :  { %v5607_v62 = vmul.f32 0.25, %v5527_v61  ;;  %v10457_v55 = vpop.f32.mrb[69].mxu1  ;;  %v6084_v61 = vld [vmem:[%s12875_s1 + $0x5d8] sm:$0xff] }
0x2230   :  { %v6085_v55 = vld [vmem:[%s12875_s1 + $0x5e0] sm:$0xff] }
0x2231   :  { %v5609_v54 = vsel %vm427_vm3, %v5607_v62, -inf }
0x2232   :  { %5610 = vmax.xlane.f32.xlu0 %v5609_v54  ;;  %v5603_v63 = vpop.f32.mrb[70].mxu1  ;;  %v11071_v54 = vpack.c.bf16 %v6085_v55, %v6084_v61  ;;  %v6394_v61 = vld [vmem:[%s12875_s1 + $0x670] sm:$0xff] }
0x2233   :  { %v5608_v0 = vmul.f32 0.25, %v5603_v63  ;;  %v10462_v1 = vpop.f32.mrb[71].mxu1  ;;  %v6086_v63 = vld [vmem:[%s12875_s1 + $0x5e8] sm:$0xff] }
0x2235   :  { %v5612_v2 = vsel %vm427_vm3, %v5608_v0, -inf }
0x2236   :  { %5613 = vmax.xlane.f32.xlu1 %v5612_v2 }
0x22bf   :  { %v5611_v3 = vpop.xlane.xlu0 %5610 }
0x22c0   :  { %v5615_v4 = vsub.f32 %v5607_v62, %v5611_v3  ;;  %v11067_v62 = vpack.c.bf16 %v6083_v60, %v6082_v59  ;;  %v6221_v59 = vld [vmem:[%s12875_s1 + $0x638] sm:$0xff] }
0x22c2   :  { %v5617_v6 = vmul.f32 1.442695, %v5615_v4 }
0x22c3   :  { %v5614_v10 = vpop.xlane.xlu1 %5613 }
0x22c4   :  { %11313 = vpow2.f32 %v5617_v6  ;;  %v5616_v13 = vsub.f32 %v5608_v0, %v5614_v10  ;;  %v6087_v0 = vld [vmem:[%s12875_s1 + $0x5f0] sm:$0xff] }
0x22c5   :  { %v11075_v1 = vpack.c.bf16 %v6087_v0, %v6086_v63  ;;  %v6309_v63 = vld [vmem:[%s12875_s1 + $0x648] sm:$0xff] }
0x22c6   :  { %v5619_v15 = vmul.f32 1.442695, %v5616_v13 }
0x22c8   :  { %11315 = vpow2.f32 %v5619_v15 }
0x22ce   :  { %v11314_v16 = vpop.eup %11313 }
0x22cf   :  { %v5621_v17 = vsel %vm427_vm3, %v11314_v16, 0.0 }
0x22d0   :  { %5622 = vadd.xlane.f32.xlu0 %v5621_v17 }
0x22d2   :  { %v11316_v19 = vpop.eup %11315 }
0x22d3   :  { %v5624_v9 = vsel %vm427_vm3, %v11316_v19, 0.0 }
0x22d4   :  { %5625 = vadd.xlane.f32.xlu1 %v5624_v9 }
0x235d   :  { %v5623_v20 = vpop.xlane.xlu0 %5622 }
0x235e   :  { %11317 = vrcp.f32 %v5623_v20  ;;  %v9429_v20 = vld [vmem:[%s12875_s1 + $0x598] ss:$0 sm:$0xff] }
0x2361   :  { %v5626_v21 = vpop.xlane.xlu1 %5625 }
0x2362   :  { %11319 = vrcp.f32 %v5626_v21 }
0x2368   :  { %v11318_v22 = vpop.eup %11317 }
0x2369   :  { %v5629_v23 = vmul.f32 %v11318_v22, %v11314_v16  ;;  %v9428_v16 = vld [vmem:[%s12875_s1 + $0x590] ss:$0 sm:$0xff] }
0x236b   :  { %10466 = vmatmul.mubr.msk.f32.vlgmr.msra.gmra.mrb[50].mxu0 %vm427_vm3, %v5629_v23 }
0x236c   :  { %v11320_v24 = vpop.eup %11319  ;;  %11054 = vmatpush3.bf16.msra.mxu0 %v11051_v5  ;;  %v9430_v5 = vld [vmem:[%s12875_s1 + $0x5c0] ss:$0 sm:$0xff] }
0x236d   :  { %v5630_v25 = vmul.f32 %v11320_v24, %v11316_v19  ;;  %11056 = vmatprep.subr.bf16.mxu0 %v11055_v29 }
0x236f   :  { %10471 = vmatmul.mubr.msk.f32.vlgmr.msra.gmra.mrb[72].mxu1 %vm427_vm3, %v5630_v25  ;;  %v6088_v25 = vld [vmem:[%s12875_s1 + $0x5f8] sm:$0xff] }
0x2370   :  { %v11079_v12 = vpack.c.bf16 %v6089_v26, %v6088_v25 }
0x243e   :  { %v5700_v30 = vpop.f32.mrb[50].mxu0 }
0x243f   :  { %v10467_v31 = vpop.f32.mrb[51].mxu0  ;;  %10477 = vmatprep.mubr.msk.f32.mxu0 %vm272_vm2, %v5700_v30 }
0x2442   :  { %v5773_v32 = vpop.f32.mrb[72].mxu1 }
0x2443   :  { %v10472_v35 = vpop.f32.mrb[73].mxu1  ;;  %10478 = vmatmul.mubr.msk.f32.vlgmr.msra.gmra.mrb[52].mxu0 %vm272_vm2, %v5773_v32 }
0x2444   :  { %11058 = vmatpush3.bf16.msra.mxu0 %v11055_v29  ;;  %10484 = vmatprep.mubr.msk.f32.mxu0 %vm272_vm2, %v12284_v33  ;;  %v9433_v35 = vld [vmem:[%s12875_s1 + $0x608] ss:$0 sm:$0xff] }
0x2445   :  { %11068 = vmatprep.subr.bf16.mxu0 %v11067_v62 }
0x244b   :  { %10485 = vmatmul.mubr.msk.f32.vlgmr.msra.gmra.mrb[52].mxu0 %vm272_vm2, %v12282_v56 }
0x244c   :  { %11070 = vmatpush3.bf16.msra.mxu0 %v11067_v62  ;;  %v6395_v62 = vld [vmem:[%s12875_s1 + $0x678] sm:$0xff] }
0x244d   :  { %11072 = vmatprep.subr.bf16.mxu0 %v11071_v54  ;;  %v11103_v55 = vpack.c.bf16 %v6395_v62, %v6394_v61  ;;  %v6884_v61 = vld [vmem:[%s12875_s1 + $0x6c8] sm:$0xff]  ;;  %v6885_v62 = vld [vmem:[%s12875_s1 + $0x6d0] sm:$0xff] }
0x2450   :  { %11074 = vmatpush3.bf16.msra.mxu0 %v11071_v54  ;;  %v6308_v54 = vld [vmem:[%s12875_s1 + $0x640] sm:$0xff] }
0x2451   :  { %11076 = vmatprep.subr.bf16.mxu0 %v11075_v1  ;;  %v11091_v0 = vpack.c.bf16 %v6309_v63, %v6308_v54 }
0x2454   :  { %11078 = vmatpush3.bf16.msra.mxu0 %v11075_v1 }
0x2455   :  { %11080 = vmatprep.subr.bf16.mxu0 %v11079_v12 }
0x2458   :  { %11082 = vmatpush3.bf16.msra.mxu0 %v11079_v12  ;;  %v9444_v12 = vld [vmem:[%s12875_s1 + $0x6a0] ss:$0 sm:$0xff] }
0x251e   :  { %v10486_v37 = vpop.f32.mrb[52].mxu0 }
0x251f   :  { %v5947_v39 = vadd.f32 %v10486_v37, %v9427_v36  ;;  %v5932_v40 = vpop.f32.mrb[53].mxu0 }
0x2520   :  { %v5946_v8 = vadd.f32 %v9427_v36, %v5932_v40 }
0x2521   :  { %v5949_v7 = vadd.f32 %v5947_v39, %v12190_v41 }
0x2522   :  { %v5948_v42 = vadd.f32 %v5946_v8, %v12188_v58  ;;  %v5990_v58 = vld [vmem:[%s12875_s1 + $0x5a0] sm:$0xff] }
0x2523   :  { %v5955_v44 = vsel %vm22_vm0, %v5949_v7, 0.0  ;;  %v11059_v51 = vpack.c.bf16 %v5991_v50, %v5990_v58  ;;  %v6219_v58 = vld [vmem:[%s12875_s1 + $0x628] sm:$0xff] }
0x2524   :  { %5956 = vadd.xlane.f32.xlu1 %v5955_v44  ;;  %v5952_v33 = vsel %vm22_vm0, %v5948_v42, 0.0 }
0x2525   :  { %5953 = vadd.xlane.f32.xlu0 %v5952_v33  ;;  %11060 = vmatprep.subr.bf16.mxu1 %v11059_v51 }
0x2526   :  { %11062 = vmatpush3.bf16.msra.mxu1 %v11059_v51  ;;  %v6392_v51 = vld [vmem:[%s12875_s1 + $0x660] sm:$0xff] }
0x2527   :  { %11064 = vmatprep.subr.bf16.mxu1 %v11063_v57  ;;  %v11099_v53 = vpack.c.bf16 %v6393_v52, %v6392_v51 }
0x2529   :  { %11100 = vmatprep.subr.bf16.mxu0 %v11099_v53 }
0x252a   :  { %11066 = vmatpush3.bf16.msra.mxu1 %v11063_v57  ;;  %v6220_v57 = vld [vmem:[%s12875_s1 + $0x630] sm:$0xff] }
0x252b   :  { %v11087_v60 = vpack.c.bf16 %v6221_v59, %v6220_v57  ;;  %v6800_v57 = vld [vmem:[%s12875_s1 + $0x6a8] sm:$0xff]  ;;  %v6801_v59 = vld [vmem:[%s12875_s1 + $0x6b0] sm:$0xff] }
0x25b1   :  { %v5957_v45 = vpop.xlane.xlu1 %5956 }
0x25b2   :  { %v5959_v56 = vmul.f32 0.03125, %v5957_v45  ;;  %v5954_v43 = vpop.xlane.xlu0 %5953 }
0x25b3   :  { %v5958_v38 = vmul.f32 0.03125, %v5954_v43 }
0x25b4   :  { %v5961_v46 = vsub.f32 %v5949_v7, %v5959_v56 }
0x25b5   :  { %v5960_v34 = vsub.f32 %v5948_v42, %v5958_v38 }
0x25b6   :  { %v5963_v47 = vmul.f32 %v5961_v46, %v5961_v46 }
0x25b7   :  { %v5962_v48 = vmul.f32 %v5960_v34, %v5960_v34 }
0x25b8   :  { %v5967_v49 = vsel %vm22_vm0, %v5963_v47, 0.0 }
0x25b9   :  { %5968 = vadd.xlane.f32.xlu1 %v5967_v49  ;;  %v5964_v41 = vsel %vm22_vm0, %v5962_v48, 0.0 }
0x25ba   :  { %5965 = vadd.xlane.f32.xlu0 %v5964_v41  ;;  %v6218_v41 = vld [vmem:[%s12875_s1 + $0x620] sm:$0xff] }
0x25bb   :  { %v11083_v50 = vpack.c.bf16 %v6219_v58, %v6218_v41 }
0x25bd   :  { %11084 = vmatprep.subr.bf16.mxu1 %v11083_v50 }
0x2646   :  { %v5969_v2 = vpop.xlane.xlu1 %5968 }
0x2647   :  { %v5971_v3 = vmul.f32 0.03125, %v5969_v2  ;;  %v5966_v4 = vpop.xlane.xlu0 %5965 }
0x2648   :  { %v5970_v6 = vmul.f32 0.03125, %v5966_v4 }
0x2649   :  { %v5973_v10 = vadd.f32 1e-05, %v5971_v3 }
0x264a   :  { %v5972_v13 = vadd.f32 1e-05, %v5970_v6 }
0x264b   :  { %11321 = vrsqrt.f32 %v5973_v10 }
0x264c   :  { %11323 = vrsqrt.f32 %v5972_v13 }
0x2655   :  { %v11322_v15 = vpop.eup %11321 }
0x2656   :  { %v11324_v17 = vpop.eup %11323  ;;  %v5977_v19 = vmul.f32 %v11322_v15, %v5961_v46  ;;  %v9436_v15 = vld [vmem:[%s12875_s1 + $0x610] ss:$0 sm:$0xff] }
0x2657   :  { %v5976_v9 = vmul.f32 %v11324_v17, %v5960_v34 }
0x2658   :  { %v5983_v21 = vmul.f32 %v9428_v16, %v5977_v19 }
0x2659   :  { %v5982_v22 = vmul.f32 %v9428_v16, %v5976_v9  ;;  %v9437_v9 = vld [vmem:[%s12875_s1 + $0x618] ss:$0 sm:$0xff] }
0x265a   :  { %v5989_v24 = vadd.f32 %v9429_v20, %v5983_v21 }
0x265b   :  { %v5988_v23 = vadd.f32 %v9429_v20, %v5982_v22  ;;  %v6310_v22 = vld [vmem:[%s12875_s1 + $0x650] sm:$0xff] }
0x265d   :  { %10495 = vmatprep.mubr.msk.f32.mxu1 %vm22_vm0, %v5988_v23 }
0x265e   :  { %10496 = vmatmul.mubr.msk.f32.vlgmr.msra.gmra.mrb[74].mxu1 %vm22_vm0, %v5989_v24 }
0x265f   :  { %11086 = vmatpush3.bf16.msra.mxu1 %v11083_v50 }
0x2660   :  { %11088 = vmatprep.subr.bf16.mxu1 %v11087_v60 }
0x2663   :  { %11090 = vmatpush3.bf16.msra.mxu1 %v11087_v60  ;;  %v11107_v60 = vpack.c.bf16 %v6801_v59, %v6800_v57 }
0x2664   :  { %11092 = vmatprep.subr.bf16.mxu1 %v11091_v0 }
0x2731   :  { %v10497_v27 = vpop.f32.mrb[74].mxu1 }
0x2732   :  { %v6077_v28 = vadd.f32 %v10497_v27, %v9430_v5  ;;  %v6071_v29 = vpop.f32.mrb[75].mxu1 }
0x2733   :  { %v6072_v30 = vadd.f32 %v9430_v5, %v6071_v29 }
0x2734   :  { %v6081_v32 = vmax.f32 %v6077_v28, 0.0 }
0x2735   :  { %v6080_v31 = vmax.f32 %v6072_v30, 0.0 }
0x2737   :  { %10514 = vmatprep.mubr.msk.f32.mxu0 %vm1491_vm4, %v6080_v31  ;;  %v9441_v31 = vld [vmem:[%s12875_s1 + $0x698] ss:$0 sm:$0xff] }
0x2738   :  { %10515 = vmatmul.mubr.msk.f32.vlgmr.msra.gmra.mrb[54].mxu0 %vm1491_vm4, %v6081_v32 }
0x2739   :  { %11102 = vmatpush3.bf16.msra.mxu0 %v11099_v53 }
0x273a   :  { %11104 = vmatprep.subr.bf16.mxu0 %v11103_v55 }
0x273d   :  { %11106 = vmatpush3.bf16.msra.mxu0 %v11103_v55  ;;  %v11115_v55 = vpack.c.bf16 %v6885_v62, %v6884_v61 }
0x273e   :  { %10560 = vmatprep.subr.mxu0 %v11379_v14 }
0x280b   :  { %v10516_v36 = vpop.f32.mrb[54].mxu0 }
0x280c   :  { %v6173_v37 = vadd.f32 %v10516_v36, %v9433_v35  ;;  %v6167_v39 = vpop.f32.mrb[55].mxu0  ;;  %v9438_v36 = vld [vmem:[%s12875_s1 + $0x690] ss:$0 sm:$0xff] }
0x280d   :  { %v6168_v40 = vadd.f32 %v9433_v35, %v6167_v39 }
0x280e   :  { %v6177_v8 = vadd.f32 %v6173_v37, %v5989_v24 }
0x280f   :  { %v6176_v7 = vadd.f32 %v6168_v40, %v5988_v23  ;;  %v6311_v23 = vld [vmem:[%s12875_s1 + $0x658] sm:$0xff] }
0x2810   :  { %v6183_v42 = vsel %vm22_vm0, %v6177_v8, 0.0  ;;  %v11095_v26 = vpack.c.bf16 %v6311_v23, %v6310_v22 }
0x2811   :  { %6184 = vadd.xlane.f32.xlu1 %v6183_v42  ;;  %v6180_v44 = vsel %vm22_vm0, %v6176_v7, 0.0 }
0x2812   :  { %6181 = vadd.xlane.f32.xlu0 %v6180_v44 }
0x289e   :  { %v6185_v33 = vpop.xlane.xlu1 %6184 }
0x289f   :  { %v6187_v45 = vmul.f32 0.03125, %v6185_v33  ;;  %v6182_v56 = vpop.xlane.xlu0 %6181 }
0x28a0   :  { %v6186_v43 = vmul.f32 0.03125, %v6182_v56 }
0x28a1   :  { %v6189_v38 = vsub.f32 %v6177_v8, %v6187_v45 }
0x28a2   :  { %v6188_v46 = vsub.f32 %v6176_v7, %v6186_v43 }
0x28a3   :  { %v6191_v34 = vmul.f32 %v6189_v38, %v6189_v38 }
0x28a4   :  { %v6190_v47 = vmul.f32 %v6188_v46, %v6188_v46 }
0x28a5   :  { %v6195_v48 = vsel %vm22_vm0, %v6191_v34, 0.0 }
0x28a6   :  { %6196 = vadd.xlane.f32.xlu1 %v6195_v48  ;;  %v6192_v49 = vsel %vm22_vm0, %v6190_v47, 0.0 }
0x28a7   :  { %6193 = vadd.xlane.f32.xlu0 %v6192_v49 }
0x2933   :  { %v6197_v1 = vpop.xlane.xlu1 %6196 }
0x2934   :  { %v6199_v2 = vmul.f32 0.03125, %v6197_v1  ;;  %v6194_v3 = vpop.xlane.xlu0 %6193  ;;  %v6803_v1 = vld [vmem:[%s12875_s1 + $0x6c0] sm:$0xff] }
0x2935   :  { %v6198_v4 = vmul.f32 0.03125, %v6194_v3 }
0x2936   :  { %v6201_v6 = vadd.f32 1e-05, %v6199_v2 }
0x2937   :  { %v6200_v10 = vadd.f32 1e-05, %v6198_v4 }
0x2938   :  { %11325 = vrsqrt.f32 %v6201_v6  ;;  %v6886_v6 = vld [vmem:[%s12875_s1 + $0x6d8] sm:$0xff] }
0x2939   :  { %11327 = vrsqrt.f32 %v6200_v10  ;;  %v6887_v10 = vld [vmem:[%s12875_s1 + $0x6e0] sm:$0xff] }
0x2942   :  { %v11326_v13 = vpop.eup %11325 }
0x2943   :  { %v11328_v16 = vpop.eup %11327  ;;  %v6205_v17 = vmul.f32 %v11326_v13, %v6189_v38  ;;  %v6968_v13 = vld [vmem:[%s12875_s1 + $0x6e8] sm:$0xff] }
0x2944   :  { %v6204_v19 = vmul.f32 %v11328_v16, %v6188_v46 }
0x2945   :  { %v6211_v20 = vmul.f32 %v9436_v15, %v6205_v17 }
0x2946   :  { %v6210_v21 = vmul.f32 %v9436_v15, %v6204_v19  ;;  %v6969_v15 = vld [vmem:[%s12875_s1 + $0x6f0] sm:$0xff]  ;;  %v11119_v19 = vpack.c.bf16 %v6887_v10, %v6886_v6 }
0x2947   :  { %v12439_v25 = vadd.f32 %v9437_v9, %v6211_v20  ;;  %v6970_v20 = vld [vmem:[%s12875_s1 + $0x6f8] sm:$0xff] }
0x2948   :  { %v12437_v24 = vadd.f32 %v9437_v9, %v6210_v21  ;;  %v11123_v9 = vpack.c.bf16 %v6969_v15, %v6968_v13  ;;  %v6971_v21 = vld [vmem:[%s12875_s1 + $0x700] sm:$0xff]  ;;  %v7677_v13 = vld [vmem:[%s12875_s1 + $0x768] sm:$0xff]  ;;  %v7678_v15 = vld [vmem:[%s12875_s1 + $0x770] sm:$0xff] }
0x2949   :  { %v11127_v22 = vpack.c.bf16 %v6971_v21, %v6970_v20  ;;  %v7679_v20 = vld [vmem:[%s12875_s1 + $0x778] sm:$0xff]  ;;  %v7680_v21 = vld [vmem:[%s12875_s1 + $0x780] sm:$0xff] }
0x294a   :  { %10525 = vmatprep.mubr.msk.f32.mxu1 %vm22_vm0, %v12437_v24  ;;  %10547 = vmatprep.mubr.msk.f32.mxu0 %vm22_vm0, %v12437_v24 }
0x294b   :  { %10526 = vmatmul.mubr.msk.f32.vlgmr.msra.gmra.mrb[76].mxu1 %vm22_vm0, %v12439_v25  ;;  %10548 = vmatmul.mubr.msk.f32.vlgmr.msra.gmra.mrb[56].mxu0 %vm22_vm0, %v12439_v25 }
0x294c   :  { %11094 = vmatpush3.bf16.msra.mxu1 %v11091_v0  ;;  %10536 = vmatprep.mubr.msk.f32.mxu1 %vm22_vm0, %v12437_v24  ;;  %v6802_v0 = vld [vmem:[%s12875_s1 + $0x6b8] sm:$0xff] }
0x294d   :  { %11096 = vmatprep.subr.bf16.mxu1 %v11095_v26  ;;  %10562 = vmatprep.mubr.msk.f32.mxu0 %vm11380_vm1, %v11379_v14  ;;  %v11111_v4 = vpack.c.bf16 %v6803_v1, %v6802_v0  ;;  %v7374_v0 = vld [vmem:[%s12875_s1 + $0x708] sm:$0xff]  ;;  %v7375_v1 = vld [vmem:[%s12875_s1 + $0x710] sm:$0xff] }
0x2950   :  { %11098 = vmatpush3.bf16.msra.mxu1 %v11095_v26 }
0x2951   :  { %10550 = vmatprep.subr.mxu1 %v11379_v14 }
0x2953   :  { %10537 = vmatmul.mubr.msk.f32.vlgmr.msra.gmra.mrb[78].mxu1 %vm22_vm0, %v12439_v25 }
0x2954   :  { %10552 = vmatprep.mubr.msk.f32.mxu1 %vm11380_vm1, %v11379_v14 }
0x2a1e   :  { %v10527_v5 = vpop.f32.mrb[76].mxu1  ;;  %v10549_v27 = vpop.f32.mrb[56].mxu0 }
0x2a1f   :  { %v6299_v28 = vpop.f32.mrb[77].mxu1  ;;  %v6467_v29 = vpop.f32.mrb[57].mxu0  ;;  %v6305_v8 = vadd.f32 %v10527_v5, %v9438_v36  ;;  %v6473_v7 = vadd.f32 %v10549_v27, %v9444_v12 }
0x2a20   :  { %v6468_v30 = vadd.f32 %v9444_v12, %v6467_v29  ;;  %v6300_v39 = vadd.f32 %v9438_v36, %v6299_v28  ;;  %v9456_v29 = vld [vmem:[%s12875_s1 + $0x720] ss:$0 sm:$0xff]  ;;  %v9459_v36 = vld [vmem:[%s12875_s1 + $0x728] ss:$0 sm:$0xff] }
0x2a22   :  { %10561 = vmatpush3.msra.mxu0 %v6468_v30 }
0x2a23   :  { %11108 = vmatprep.subr.bf16.mxu0 %v11107_v60 }
0x2a26   :  { %v10538_v32 = vpop.f32.mrb[78].mxu1 }
0x2a27   :  { %v6383_v35 = vpop.f32.mrb[79].mxu1  ;;  %v6389_v40 = vadd.f32 %v10538_v32, %v9441_v31  ;;  %v9453_v32 = vld [vmem:[%s12875_s1 + $0x718] ss:$0 sm:$0xff] }
0x2a28   :  { %v6384_v37 = vadd.f32 %v9441_v31, %v6383_v35 }
0x2a2a   :  { %10551 = vmatpush3.xpose.msk.msra.mxu1 %vm272_vm2, %v6384_v37 }
0x2a2b   :  { %10555 = vmatprep.subr.mxu1 %v11379_v14 }
0x2a2d   :  { %10553 = vmatmul.mubr.msk.f32.vlgmr.msra.gmra.mrb[80].mxu1 %vm272_vm2, %v6300_v39 }
0x2a2e   :  { %10556 = vmatpush3.xpose.msk.msra.mxu1 %vm272_vm2, %v6389_v40  ;;  %10557 = vmatprep.mubr.msk.f32.mxu1 %vm11380_vm1, %v11379_v14 }
0x2a2f   :  { %10565 = vmatprep.subr.mxu1 %v11379_v14 }
0x2a31   :  { %10558 = vmatmul.mubr.msk.f32.vlgmr.msra.gmra.mrb[82].mxu1 %vm272_vm2, %v6305_v8 }
0x2a32   :  { %10566 = vmatpush3.msra.mxu1 %v6473_v7  ;;  %10567 = vmatprep.mubr.msk.f32.mxu1 %vm11380_vm1, %v11379_v14 }
0x2a33   :  { %11116 = vmatprep.subr.bf16.mxu1 %v11115_v55 }
0x2b00   :  { %v6548_v42 = vpop.f32.mrb[80].mxu1 }
0x2b01   :  { %v6628_v44 = vmul.f32 0.25, %v6548_v42  ;;  %v10554_v33 = vpop.f32.mrb[81].mxu1 }
0x2b03   :  { %v6630_v45 = vsel %vm427_vm3, %v6628_v44, -inf }
0x2b04   :  { %6631 = vmax.xlane.f32.xlu1 %v6630_v45  ;;  %v6624_v56 = vpop.f32.mrb[82].mxu1 }
0x2b05   :  { %v6629_v43 = vmul.f32 0.25, %v6624_v56  ;;  %v10559_v38 = vpop.f32.mrb[83].mxu1 }
0x2b07   :  { %v6633_v46 = vsel %vm427_vm3, %v6629_v43, -inf }
0x2b08   :  { %6634 = vmax.xlane.f32.xlu0 %v6633_v46 }
0x2b91   :  { %v6632_v34 = vpop.xlane.xlu1 %6631 }
0x2b92   :  { %v6636_v47 = vsub.f32 %v6628_v44, %v6632_v34 }
0x2b94   :  { %v6638_v48 = vmul.f32 1.442695, %v6636_v47 }
0x2b95   :  { %v6635_v49 = vpop.xlane.xlu0 %6634 }
0x2b96   :  { %11329 = vpow2.f32 %v6638_v48  ;;  %v6637_v41 = vsub.f32 %v6629_v43, %v6635_v49 }
0x2b98   :  { %v6640_v58 = vmul.f32 1.442695, %v6637_v41 }
0x2b9a   :  { %11331 = vpow2.f32 %v6640_v58 }
0x2ba0   :  { %v11330_v50 = vpop.eup %11329 }
0x2ba1   :  { %v6642_v51 = vsel %vm427_vm3, %v11330_v50, 0.0 }
0x2ba2   :  { %6643 = vadd.xlane.f32.xlu1 %v6642_v51 }
0x2ba4   :  { %v11332_v52 = vpop.eup %11331 }
0x2ba5   :  { %v6645_v53 = vsel %vm427_vm3, %v11332_v52, 0.0 }
0x2ba6   :  { %6646 = vadd.xlane.f32.xlu0 %v6645_v53 }
0x2c2f   :  { %v6644_v54 = vpop.xlane.xlu1 %6643 }
0x2c30   :  { %11333 = vrcp.f32 %v6644_v54 }
0x2c33   :  { %v6647_v63 = vpop.xlane.xlu0 %6646 }
0x2c34   :  { %11335 = vrcp.f32 %v6647_v63 }
0x2c3a   :  { %v11334_v2 = vpop.eup %11333 }
0x2c3b   :  { %v6650_v3 = vmul.f32 %v11334_v2, %v11330_v50  ;;  %v11131_v2 = vpack.c.bf16 %v7375_v1, %v7374_v0 }
0x2c3d   :  { %10563 = vmatmul.mubr.msk.f32.vlgmr.msra.gmra.mrb[58].mxu0 %vm427_vm3, %v6650_v3  ;;  %v6798_v3 = vld [vmem:[%s12875_s1 + $0x680] sm:$0xff] }
0x2c3e   :  { %v11336_v16 = vpop.eup %11335  ;;  %11110 = vmatpush3.bf16.msra.mxu0 %v11107_v60  ;;  %10578 = vmatprep.mubr.msk.f32.mxu0 %vm22_vm0, %v12437_v24 }
0x2c3f   :  { %v6651_v17 = vmul.f32 %v11336_v16, %v11332_v52  ;;  %11112 = vmatprep.subr.bf16.mxu0 %v11111_v4 }
0x2c41   :  { %10568 = vmatmul.mubr.msk.f32.vlgmr.msra.gmra.mrb[84].mxu1 %vm427_vm3, %v6651_v17  ;;  %v11147_v17 = vpack.c.bf16 %v7678_v15, %v7677_v13  ;;  %v9475_v13 = vld [vmem:[%s12875_s1 + $0x7b8] ss:$0 sm:$0xff] }
0x2c42   :  { %11114 = vmatpush3.bf16.msra.mxu0 %v11111_v4  ;;  %11118 = vmatpush3.bf16.msra.mxu1 %v11115_v55  ;;  %v6799_v4 = vld [vmem:[%s12875_s1 + $0x688] sm:$0xff] }
0x2c43   :  { %10589 = vmatprep.mubr.msk.f32.mxu1 %vm22_vm0, %v12437_v24  ;;  %11120 = vmatprep.subr.bf16.mxu1 %v11119_v19  ;;  %v11135_v6 = vpack.c.bf16 %v6799_v4, %v6798_v3  ;;  %v7764_v3 = vld [vmem:[%s12875_s1 + $0x7a0] sm:$0xff] }
0x2c44   :  { %11124 = vmatprep.subr.bf16.mxu0 %v11123_v9 }
0x2c45   :  { %10579 = vmatmul.mubr.msk.f32.vlgmr.msra.gmra.mrb[60].mxu0 %vm22_vm0, %v12439_v25 }
0x2c46   :  { %11122 = vmatpush3.bf16.msra.mxu1 %v11119_v19  ;;  %11126 = vmatpush3.bf16.msra.mxu0 %v11123_v9 }
0x2c47   :  { %10600 = vmatprep.mubr.msk.f32.mxu0 %vm22_vm0, %v12437_v24  ;;  %11128 = vmatprep.subr.bf16.mxu0 %v11127_v22 }
0x2c48   :  { %10603 = vmatprep.subr.mxu1 %v11379_v14 }
0x2c49   :  { %10590 = vmatmul.mubr.msk.f32.vlgmr.msra.gmra.mrb[86].mxu1 %vm22_vm0, %v12439_v25 }
0x2c4a   :  { %11130 = vmatpush3.bf16.msra.mxu0 %v11127_v22  ;;  %10605 = vmatprep.mubr.msk.f32.mxu1 %vm11380_vm1, %v11379_v14  ;;  %v11151_v22 = vpack.c.bf16 %v7680_v21, %v7679_v20 }
0x2c4b   :  { %10613 = vmatprep.subr.mxu0 %v11379_v14 }
0x2c4d   :  { %10601 = vmatmul.mubr.msk.f32.vlgmr.msra.gmra.mrb[62].mxu0 %vm22_vm0, %v12439_v25 }
0x2c4e   :  { %10615 = vmatprep.mubr.msk.f32.mxu0 %vm11380_vm1, %v11379_v14 }
0x2d10   :  { %v12537_v23 = vpop.f32.mrb[58].mxu0 }
0x2d11   :  { %v10564_v26 = vpop.f32.mrb[59].mxu0 }
0x2d14   :  { %v12539_v12 = vpop.f32.mrb[84].mxu1 }
0x2d15   :  { %v10569_v5 = vpop.f32.mrb[85].mxu1 }
0x2d18   :  { %v10580_v27 = vpop.f32.mrb[60].mxu0 }
0x2d19   :  { %v6875_v28 = vpop.f32.mrb[61].mxu0  ;;  %v6881_v42 = vadd.f32 %v10580_v27, %v9453_v32 }
0x2d1a   :  { %v6876_v39 = vadd.f32 %v9453_v32, %v6875_v28 }
0x2d1c   :  { %v10591_v30 = vpop.f32.mrb[86].mxu1 }
0x2d1d   :  { %v6959_v31 = vpop.f32.mrb[87].mxu1  ;;  %v6965_v8 = vadd.f32 %v10591_v30, %v9456_v29 }
0x2d1e   :  { %v6960_v35 = vadd.f32 %v9456_v29, %v6959_v31  ;;  %v9478_v31 = vld [vmem:[%s12875_s1 + $0x7c0] ss:$0 sm:$0xff] }
0x2d20   :  { %v10602_v37 = vpop.f32.mrb[62].mxu0  ;;  %10604 = vmatpush3.xpose.msk.msra.mxu1 %vm272_vm2, %v6960_v35 }
0x2d21   :  { %v7043_v40 = vpop.f32.mrb[63].mxu0  ;;  %10608 = vmatprep.subr.mxu1 %v11379_v14  ;;  %v7049_v44 = vadd.f32 %v10602_v37, %v9459_v36 }
0x2d22   :  { %v7044_v7 = vadd.f32 %v9459_v36, %v7043_v40 }
0x2d23   :  { %10606 = vmatmul.mubr.msk.f32.vlgmr.msra.gmra.mrb[88].mxu1 %vm272_vm2, %v6876_v39 }
0x2d24   :  { %10609 = vmatpush3.xpose.msk.msra.mxu1 %vm272_vm2, %v6965_v8  ;;  %10614 = vmatpush3.msra.mxu0 %v7044_v7 }
0x2d25   :  { %10610 = vmatprep.mubr.msk.f32.mxu1 %vm11380_vm1, %v11379_v14  ;;  %10618 = vmatprep.subr.mxu1 %v11379_v14 }
0x2d26   :  { %11132 = vmatprep.subr.bf16.mxu0 %v11131_v2 }
0x2d27   :  { %10611 = vmatmul.mubr.msk.f32.vlgmr.msra.gmra.mrb[90].mxu1 %vm272_vm2, %v6881_v42 }
0x2d28   :  { %10619 = vmatpush3.msra.mxu1 %v7049_v44  ;;  %10620 = vmatprep.mubr.msk.f32.mxu1 %vm11380_vm1, %v11379_v14 }
0x2df6   :  { %v7124_v33 = vpop.f32.mrb[88].mxu1 }
0x2df7   :  { %v7204_v45 = vmul.f32 0.25, %v7124_v33  ;;  %v10607_v56 = vpop.f32.mrb[89].mxu1 }
0x2df9   :  { %v7206_v43 = vsel %vm427_vm3, %v7204_v45, -inf }
0x2dfa   :  { %7207 = vmax.xlane.f32.xlu0 %v7206_v43  ;;  %v7200_v38 = vpop.f32.mrb[90].mxu1  ;;  %v7587_v43 = vld [vmem:[%s12875_s1 + $0x748] sm:$0xff] }
0x2dfb   :  { %v7205_v46 = vmul.f32 0.25, %v7200_v38  ;;  %v10612_v34 = vpop.f32.mrb[91].mxu1  ;;  %v7588_v38 = vld [vmem:[%s12875_s1 + $0x750] sm:$0xff] }
0x2dfc   :  { %v7589_v34 = vld [vmem:[%s12875_s1 + $0x758] sm:$0xff] }
0x2dfd   :  { %v7209_v47 = vsel %vm427_vm3, %v7205_v46, -inf }
0x2dfe   :  { %7210 = vmax.xlane.f32.xlu1 %v7209_v47  ;;  %v7590_v47 = vld [vmem:[%s12875_s1 + $0x760] sm:$0xff] }
0x2e87   :  { %v7208_v48 = vpop.xlane.xlu0 %7207 }
0x2e88   :  { %v7212_v49 = vsub.f32 %v7204_v45, %v7208_v48  ;;  %v11143_v48 = vpack.c.bf16 %v7590_v47, %v7589_v34  ;;  %v8255_v34 = vld [vmem:[%s12875_s1 + $0x800] sm:$0xff]  ;;  %v8256_v47 = vld [vmem:[%s12875_s1 + $0x808] sm:$0xff] }
0x2e8a   :  { %v7214_v41 = vmul.f32 1.442695, %v7212_v49  ;;  %v7761_v49 = vld [vmem:[%s12875_s1 + $0x788] sm:$0xff] }
0x2e8b   :  { %v7211_v58 = vpop.xlane.xlu1 %7210 }
0x2e8c   :  { %11337 = vpow2.f32 %v7214_v41  ;;  %v7213_v50 = vsub.f32 %v7205_v46, %v7211_v58  ;;  %v11139_v46 = vpack.c.bf16 %v7588_v38, %v7587_v43  ;;  %v7762_v41 = vld [vmem:[%s12875_s1 + $0x790] sm:$0xff] }
0x2e8d   :  { %v11155_v58 = vpack.c.bf16 %v7762_v41, %v7761_v49  ;;  %v8171_v49 = vld [vmem:[%s12875_s1 + $0x7e0] sm:$0xff]  ;;  %v8172_v41 = vld [vmem:[%s12875_s1 + $0x7e8] sm:$0xff] }
0x2e8e   :  { %v7216_v51 = vmul.f32 1.442695, %v7213_v50  ;;  %11140 = vmatprep.subr.bf16.mxu1 %v11139_v46 }
0x2e90   :  { %11339 = vpow2.f32 %v7216_v51 }
0x2e96   :  { %v11338_v52 = vpop.eup %11337 }
0x2e97   :  { %v7218_v53 = vsel %vm427_vm3, %v11338_v52, 0.0 }
0x2e98   :  { %7219 = vadd.xlane.f32.xlu0 %v7218_v53 }
0x2e9a   :  { %v11340_v57 = vpop.eup %11339 }
0x2e9b   :  { %v7221_v59 = vsel %vm427_vm3, %v11340_v57, 0.0 }
0x2e9c   :  { %7222 = vadd.xlane.f32.xlu1 %v7221_v59 }
0x2f25   :  { %v7220_v60 = vpop.xlane.xlu0 %7219 }
0x2f26   :  { %11341 = vrcp.f32 %v7220_v60 }
0x2f29   :  { %v7223_v61 = vpop.xlane.xlu1 %7222 }
0x2f2a   :  { %11343 = vrcp.f32 %v7223_v61  ;;  %v9473_v61 = vld [vmem:[%s12875_s1 + $0x738] ss:$0 sm:$0xff] }
0x2f30   :  { %v11342_v62 = vpop.eup %11341 }
0x2f31   :  { %v7226_v55 = vmul.f32 %v11342_v62, %v11338_v52 }
0x2f33   :  { %10616 = vmatmul.mubr.msk.f32.vlgmr.msra.gmra.mrb[64].mxu0 %vm427_vm3, %v7226_v55 }
0x2f34   :  { %v11344_v54 = vpop.eup %11343  ;;  %11134 = vmatpush3.bf16.msra.mxu0 %v11131_v2  ;;  %v7763_v2 = vld [vmem:[%s12875_s1 + $0x798] sm:$0xff] }
0x2f35   :  { %v7227_v63 = vmul.f32 %v11344_v54, %v11340_v57  ;;  %11136 = vmatprep.subr.bf16.mxu0 %v11135_v6 }
0x2f37   :  { %10621 = vmatmul.mubr.msk.f32.vlgmr.msra.gmra.mrb[92].mxu1 %vm427_vm3, %v7227_v63  ;;  %v9474_v63 = vld [vmem:[%s12875_s1 + $0x740] ss:$0 sm:$0xff] }
0x2f38   :  { %11142 = vmatpush3.bf16.msra.mxu1 %v11139_v46 }
0x2f39   :  { %11144 = vmatprep.subr.bf16.mxu1 %v11143_v48 }
0x2f3c   :  { %11146 = vmatpush3.bf16.msra.mxu1 %v11143_v48 }
0x2f3d   :  { %11156 = vmatprep.subr.bf16.mxu1 %v11155_v58 }
0x3006   :  { %v7297_v10 = vpop.f32.mrb[64].mxu0 }
0x3007   :  { %v10617_v16 = vpop.f32.mrb[65].mxu0  ;;  %10627 = vmatprep.mubr.msk.f32.mxu0 %vm272_vm2, %v7297_v10  ;;  %v11159_v10 = vpack.c.bf16 %v7764_v3, %v7763_v2 }
0x300a   :  { %v7370_v19 = vpop.f32.mrb[92].mxu1 }
0x300b   :  { %v10622_v9 = vpop.f32.mrb[93].mxu1  ;;  %10628 = vmatmul.mubr.msk.f32.vlgmr.msra.gmra.mrb[66].mxu0 %vm272_vm2, %v7370_v19 }
0x300c   :  { %11138 = vmatpush3.bf16.msra.mxu0 %v11135_v6  ;;  %10634 = vmatprep.mubr.msk.f32.mxu0 %vm272_vm2, %v12537_v23  ;;  %v9472_v23 = vld [vmem:[%s12875_s1 + $0x730] ss:$0 sm:$0xff]  ;;  %v9481_v9 = vld [vmem:[%s12875_s1 + $0x7c8] ss:$0 sm:$0xff] }
0x300d   :  { %11148 = vmatprep.subr.bf16.mxu0 %v11147_v17 }
0x3013   :  { %10635 = vmatmul.mubr.msk.f32.vlgmr.msra.gmra.mrb[66].mxu0 %vm272_vm2, %v12539_v12 }
0x3014   :  { %11150 = vmatpush3.bf16.msra.mxu0 %v11147_v17  ;;  %10656 = vmatprep.mubr.msk.f32.mxu0 %vm22_vm0, %v12148_v18 }
0x3015   :  { %11152 = vmatprep.subr.bf16.mxu0 %v11151_v22 }
0x3018   :  { %11154 = vmatpush3.bf16.msra.mxu0 %v11151_v22 }
0x3019   :  { %10670 = vmatprep.subr.mxu0 %v11379_v14 }
0x301b   :  { %10657 = vmatmul.mubr.msk.f32.vlgmr.msra.gmra.mrb[68].mxu0 %vm22_vm0, %v12150_v11 }
0x301c   :  { %10672 = vmatprep.mubr.msk.f32.mxu0 %vm11380_vm1, %v11379_v14 }
0x30e6   :  { %v10636_v26 = vpop.f32.mrb[66].mxu0 }
0x30e7   :  { %v7544_v12 = vadd.f32 %v10636_v26, %v9472_v23  ;;  %v7529_v5 = vpop.f32.mrb[67].mxu0 }
0x30e8   :  { %v7543_v27 = vadd.f32 %v9472_v23, %v7529_v5 }
0x30e9   :  { %v7546_v28 = vadd.f32 %v7544_v12, %v12439_v25 }
0x30ea   :  { %v7545_v29 = vadd.f32 %v7543_v27, %v12437_v24 }
0x30eb   :  { %v7552_v30 = vsel %vm22_vm0, %v7546_v28, 0.0 }
0x30ec   :  { %7553 = vadd.xlane.f32.xlu1 %v7552_v30  ;;  %v7549_v32 = vsel %vm22_vm0, %v7545_v29, 0.0 }
0x30ed   :  { %7550 = vadd.xlane.f32.xlu0 %v7549_v32 }
0x30ee   :  { %v10658_v35 = vpop.f32.mrb[68].mxu0 }
0x30ef   :  { %v7758_v36 = vadd.f32 %v10658_v35, %v9478_v31  ;;  %v7752_v37 = vpop.f32.mrb[69].mxu0 }
0x30f0   :  { %v7753_v39 = vadd.f32 %v9478_v31, %v7752_v37 }
0x30f2   :  { %10671 = vmatpush3.xpose.msk.msra.mxu0 %vm272_vm2, %v7753_v39 }
0x30f3   :  { %10680 = vmatprep.subr.mxu0 %v11379_v14 }
0x3179   :  { %v7554_v25 = vpop.xlane.xlu1 %7553 }
0x317a   :  { %v7556_v24 = vmul.f32 0.03125, %v7554_v25  ;;  %v7551_v40 = vpop.xlane.xlu0 %7550 }
0x317b   :  { %v7555_v8 = vmul.f32 0.03125, %v7551_v40 }
0x317c   :  { %v7558_v7 = vsub.f32 %v7546_v28, %v7556_v24 }
0x317d   :  { %v7557_v42 = vsub.f32 %v7545_v29, %v7555_v8 }
0x317e   :  { %v7560_v44 = vmul.f32 %v7558_v7, %v7558_v7 }
0x317f   :  { %v7559_v33 = vmul.f32 %v7557_v42, %v7557_v42 }
0x3180   :  { %v7564_v45 = vsel %vm22_vm0, %v7560_v44, 0.0  ;;  %v8254_v44 = vld [vmem:[%s12875_s1 + $0x7f8] sm:$0xff] }
0x3181   :  { %7565 = vadd.xlane.f32.xlu1 %v7564_v45  ;;  %v7561_v56 = vsel %vm22_vm0, %v7559_v33, 0.0  ;;  %v8169_v45 = vld [vmem:[%s12875_s1 + $0x7d0] sm:$0xff] }
0x3182   :  { %7562 = vadd.xlane.f32.xlu0 %v7561_v56  ;;  %v8170_v56 = vld [vmem:[%s12875_s1 + $0x7d8] sm:$0xff] }
0x3183   :  { %v11163_v43 = vpack.c.bf16 %v8170_v56, %v8169_v45 }
0x320e   :  { %v7566_v50 = vpop.xlane.xlu1 %7565 }
0x320f   :  { %v7568_v51 = vmul.f32 0.03125, %v7566_v50  ;;  %v7563_v52 = vpop.xlane.xlu0 %7562 }
0x3210   :  { %v7567_v53 = vmul.f32 0.03125, %v7563_v52  ;;  %v11175_v52 = vpack.c.bf16 %v8256_v47, %v8255_v34  ;;  %v8167_v34 = vld [vmem:[%s12875_s1 + $0x7a8] sm:$0xff]  ;;  %v8168_v47 = vld [vmem:[%s12875_s1 + $0x7b0] sm:$0xff] }
0x3211   :  { %v7570_v57 = vadd.f32 1e-05, %v7568_v51 }
0x3212   :  { %v7569_v59 = vadd.f32 1e-05, %v7567_v53  ;;  %v11167_v53 = vpack.c.bf16 %v8172_v41, %v8171_v49 }
0x3213   :  { %11345 = vrsqrt.f32 %v7570_v57  ;;  %v8337_v57 = vld [vmem:[%s12875_s1 + $0x810] sm:$0xff] }
0x3214   :  { %11347 = vrsqrt.f32 %v7569_v59  ;;  %v8338_v59 = vld [vmem:[%s12875_s1 + $0x818] sm:$0xff] }
0x321d   :  { %v11346_v60 = vpop.eup %11345 }
0x321e   :  { %v11348_v62 = vpop.eup %11347  ;;  %v7574_v55 = vmul.f32 %v11346_v60, %v7558_v7  ;;  %v11179_v60 = vpack.c.bf16 %v8338_v59, %v8337_v57 }
0x321f   :  { %v7573_v54 = vmul.f32 %v11348_v62, %v7557_v42  ;;  %v8253_v42 = vld [vmem:[%s12875_s1 + $0x7f0] sm:$0xff]  ;;  %v8340_v62 = vld [vmem:[%s12875_s1 + $0x828] sm:$0xff] }
0x3220   :  { %v7580_v0 = vmul.f32 %v9473_v61, %v7574_v55  ;;  %v11171_v33 = vpack.c.bf16 %v8254_v44, %v8253_v42 }
0x3221   :  { %v7579_v1 = vmul.f32 %v9473_v61, %v7573_v54  ;;  %v8339_v61 = vld [vmem:[%s12875_s1 + $0x820] sm:$0xff] }
0x3222   :  { %v12649_v6 = vadd.f32 %v9474_v63, %v7580_v0  ;;  %v11183_v55 = vpack.c.bf16 %v8340_v62, %v8339_v61 }
0x3223   :  { %v12647_v4 = vadd.f32 %v9474_v63, %v7579_v1 }
0x3225   :  { %10645 = vmatprep.mubr.msk.f32.mxu1 %vm22_vm0, %v12647_v4 }
0x3226   :  { %10646 = vmatmul.mubr.msk.f32.vlgmr.msra.gmra.mrb[94].mxu1 %vm22_vm0, %v12649_v6 }
0x3227   :  { %11158 = vmatpush3.bf16.msra.mxu1 %v11155_v58  ;;  %10667 = vmatprep.mubr.msk.f32.mxu1 %vm22_vm0, %v12148_v18 }
0x3228   :  { %11160 = vmatprep.subr.bf16.mxu1 %v11159_v10 }
0x322b   :  { %11162 = vmatpush3.bf16.msra.mxu1 %v11159_v10 }
0x322c   :  { %10675 = vmatprep.subr.mxu1 %v11379_v14 }
0x322e   :  { %10668 = vmatmul.mubr.msk.f32.vlgmr.msra.gmra.mrb[96].mxu1 %vm22_vm0, %v12150_v11 }
0x322f   :  { %10677 = vmatprep.mubr.msk.f32.mxu1 %vm11380_vm1, %v11379_v14 }
0x3234   :  { %10676 = vmatpush3.xpose.msk.msra.mxu1 %vm272_vm2, %v7758_v36 }
0x3235   :  { %10685 = vmatprep.subr.mxu1 %v11379_v14 }
0x32f9   :  { %v10647_v15 = vpop.f32.mrb[94].mxu1 }
0x32fa   :  { %v7674_v16 = vadd.f32 %v10647_v15, %v9475_v13  ;;  %v7668_v17 = vpop.f32.mrb[95].mxu1 }
0x32fb   :  { %v7669_v19 = vadd.f32 %v9475_v13, %v7668_v17 }
0x32fc   :  { %10678 = vmatmul.mubr.msk.f32.vlgmr.msra.gmra.mrb[98].mxu1 %vm272_vm2, %v7674_v16 }
0x32fd   :  { %10673 = vmatmul.mubr.msk.f32.vlgmr.msra.gmra.mrb[70].mxu0 %vm272_vm2, %v7669_v19  ;;  %10687 = vmatprep.mubr.msk.f32.mxu1 %vm11380_vm1, %v11379_v14  ;;  %v9496_v19 = vld [vmem:[%s12875_s1 + $0x850] ss:$0 sm:$0xff] }
0x32fe   :  { %10682 = vmatprep.mubr.msk.f32.mxu0 %vm11380_vm1, %v11379_v14 }
0x3301   :  { %v10669_v20 = vpop.f32.mrb[96].mxu1 }
0x3302   :  { %v7842_v21 = vadd.f32 %v10669_v20, %v9481_v9  ;;  %v7836_v22 = vpop.f32.mrb[97].mxu1 }
0x3303   :  { %v7837_v23 = vadd.f32 %v9481_v9, %v7836_v22 }
0x3304   :  { %10686 = vmatpush3.msra.mxu1 %v7842_v21 }
0x3305   :  { %10681 = vmatpush3.msra.mxu0 %v7837_v23  ;;  %11172 = vmatprep.subr.bf16.mxu1 %v11171_v33 }
0x3306   :  { %11164 = vmatprep.subr.bf16.mxu0 %v11163_v43 }
0x33cf   :  { %v7993_v26 = vpop.f32.mrb[98].mxu1 }
0x33d0   :  { %v7998_v12 = vmul.f32 0.25, %v7993_v26  ;;  %v7917_v5 = vpop.f32.mrb[70].mxu0  ;;  %v10679_v27 = vpop.f32.mrb[99].mxu1 }
0x33d1   :  { %v7997_v28 = vmul.f32 0.25, %v7917_v5  ;;  %v10674_v29 = vpop.f32.mrb[71].mxu0 }
0x33d2   :  { %v8002_v30 = vsel %vm427_vm3, %v7998_v12, -inf }
0x33d3   :  { %8003 = vmax.xlane.f32.xlu0 %v8002_v30  ;;  %v7999_v31 = vsel %vm427_vm3, %v7997_v28, -inf }
0x33d4   :  { %8000 = vmax.xlane.f32.xlu1 %v7999_v31 }
0x3460   :  { %v8004_v32 = vpop.xlane.xlu0 %8003 }
0x3461   :  { %v8006_v35 = vsub.f32 %v7998_v12, %v8004_v32  ;;  %v8001_v36 = vpop.xlane.xlu1 %8000 }
0x3462   :  { %v8005_v37 = vsub.f32 %v7997_v28, %v8001_v36 }
0x3463   :  { %v8009_v39 = vmul.f32 1.442695, %v8006_v35 }
0x3464   :  { %v8007_v25 = vmul.f32 1.442695, %v8005_v37 }
0x3465   :  { %11349 = vpow2.f32 %v8009_v39 }
0x3466   :  { %11351 = vpow2.f32 %v8007_v25 }
0x346f   :  { %v11350_v24 = vpop.eup %11349 }
0x3470   :  { %v11352_v40 = vpop.eup %11351  ;;  %v8014_v8 = vsel %vm427_vm3, %v11350_v24, 0.0 }
0x3471   :  { %8015 = vadd.xlane.f32.xlu0 %v8014_v8  ;;  %v8011_v7 = vsel %vm427_vm3, %v11352_v40, 0.0 }
0x3472   :  { %8012 = vadd.xlane.f32.xlu1 %v8011_v7 }
0x34fe   :  { %v8016_v38 = vpop.xlane.xlu0 %8015 }
0x34ff   :  { %11353 = vrcp.f32 %v8016_v38  ;;  %v8013_v46 = vpop.xlane.xlu1 %8012  ;;  %v8744_v38 = vld [vmem:[%s12875_s1 + $0x838] sm:$0xff] }
0x3500   :  { %11355 = vrcp.f32 %v8013_v46 }
0x3509   :  { %v11354_v48 = vpop.eup %11353 }
0x350a   :  { %v11356_v58 = vpop.eup %11355  ;;  %v8020_v50 = vmul.f32 %v11354_v48, %v11350_v24  ;;  %v11191_v48 = vpack.c.bf16 %v8168_v47, %v8167_v34 }
0x350b   :  { %v8019_v51 = vmul.f32 %v11356_v58, %v11352_v40 }
0x350c   :  { %10688 = vmatmul.mubr.msk.f32.vlgmr.msra.gmra.mrb[100].mxu1 %vm427_vm3, %v8020_v50 }
0x350d   :  { %11174 = vmatpush3.bf16.msra.mxu1 %v11171_v33  ;;  %10683 = vmatmul.mubr.msk.f32.vlgmr.msra.gmra.mrb[72].mxu0 %vm427_vm3, %v8019_v51  ;;  %v9509_v51 = vld [vmem:[%s12875_s1 + $0x858] ss:$0 sm:$0xff] }
0x350e   :  { %11166 = vmatpush3.bf16.msra.mxu0 %v11163_v43  ;;  %10709 = vmatprep.mubr.msk.f32.mxu1 %vm22_vm0, %v12148_v18  ;;  %v8743_v43 = vld [vmem:[%s12875_s1 + $0x830] sm:$0xff] }
0x350f   :  { %10698 = vmatprep.mubr.msk.f32.mxu0 %vm22_vm0, %v12647_v4  ;;  %11176 = vmatprep.subr.bf16.mxu1 %v11175_v52  ;;  %v11187_v46 = vpack.c.bf16 %v8744_v38, %v8743_v43 }
0x3510   :  { %11168 = vmatprep.subr.bf16.mxu0 %v11167_v53 }
0x3511   :  { %11178 = vmatpush3.bf16.msra.mxu1 %v11175_v52 }
0x3512   :  { %11170 = vmatpush3.bf16.msra.mxu0 %v11167_v53  ;;  %10723 = vmatprep.subr.mxu1 %v11379_v14 }
0x3513   :  { %11180 = vmatprep.subr.bf16.mxu0 %v11179_v60 }
0x3514   :  { %10710 = vmatmul.mubr.msk.f32.vlgmr.msra.gmra.mrb[102].mxu1 %vm22_vm0, %v12150_v11 }
0x3515   :  { %10699 = vmatmul.mubr.msk.f32.vlgmr.msra.gmra.mrb[74].mxu0 %vm22_vm0, %v12649_v6  ;;  %10725 = vmatprep.mubr.msk.f32.mxu1 %vm11380_vm1, %v11379_v14 }
0x3516   :  { %11182 = vmatpush3.bf16.msra.mxu0 %v11179_v60  ;;  %10720 = vmatprep.mubr.msk.f32.mxu0 %vm22_vm0, %v12148_v18  ;;  %v9493_v18 = vld [vmem:[%s12875_s1 + $0x848] ss:$0 sm:$0xff] }
0x3517   :  { %11184 = vmatprep.subr.bf16.mxu0 %v11183_v55 }
0x351a   :  { %11186 = vmatpush3.bf16.msra.mxu0 %v11183_v55 }
0x351b   :  { %10733 = vmatprep.subr.mxu0 %v11379_v14 }
0x351d   :  { %10721 = vmatmul.mubr.msk.f32.vlgmr.msra.gmra.mrb[76].mxu0 %vm22_vm0, %v12150_v11  ;;  %v9490_v11 = vld [vmem:[%s12875_s1 + $0x840] ss:$0 sm:$0xff] }
0x351e   :  { %10735 = vmatprep.mubr.msk.f32.mxu0 %vm11380_vm1, %v11379_v14 }
0x35df   :  { %v12736_v54 = vpop.f32.mrb[100].mxu1 }
0x35e0   :  { %v12738_v63 = vpop.f32.mrb[72].mxu0  ;;  %v10689_v0 = vpop.f32.mrb[101].mxu1 }
0x35e1   :  { %v10684_v1 = vpop.f32.mrb[73].mxu0 }
0x35e7   :  { %v10711_v2 = vpop.f32.mrb[102].mxu1 }
0x35e8   :  { %v10700_v3 = vpop.f32.mrb[74].mxu0  ;;  %v8328_v10 = vpop.f32.mrb[103].mxu1  ;;  %v8334_v17 = vadd.f32 %v10711_v2, %v9493_v18 }
0x35e9   :  { %v8329_v13 = vadd.f32 %v9493_v18, %v8328_v10  ;;  %v8244_v15 = vpop.f32.mrb[75].mxu0  ;;  %v8250_v9 = vadd.f32 %v10700_v3, %v9490_v11 }
0x35ea   :  { %v8245_v16 = vadd.f32 %v9490_v11, %v8244_v15 }
0x35eb   :  { %10724 = vmatpush3.xpose.msk.msra.mxu1 %vm272_vm2, %v8329_v13  ;;  %v8957_v13 = vld [vmem:[%s12875_s1 + $0x878] sm:$0xff] }
0x35ec   :  { %10728 = vmatprep.subr.mxu1 %v11379_v14 }
0x35ee   :  { %10726 = vmatmul.mubr.msk.f32.vlgmr.msra.gmra.mrb[104].mxu1 %vm272_vm2, %v8245_v16  ;;  %v8958_v16 = vld [vmem:[%s12875_s1 + $0x880] sm:$0xff] }
0x35ef   :  { %10729 = vmatpush3.xpose.msk.msra.mxu1 %vm272_vm2, %v8334_v17  ;;  %10730 = vmatprep.mubr.msk.f32.mxu1 %vm11380_vm1, %v11379_v14  ;;  %v8959_v17 = vld [vmem:[%s12875_s1 + $0x888] sm:$0xff] }
0x35f0   :  { %v10722_v20 = vpop.f32.mrb[76].mxu0  ;;  %10738 = vmatprep.subr.mxu1 %v11379_v14 }
0x35f1   :  { %v8418_v21 = vadd.f32 %v10722_v20, %v9496_v19  ;;  %v8412_v22 = vpop.f32.mrb[77].mxu0  ;;  %v9049_v20 = vld [vmem:[%s12875_s1 + $0x8a0] sm:$0xff] }
0x35f2   :  { %v8413_v23 = vadd.f32 %v9496_v19, %v8412_v22  ;;  %10731 = vmatmul.mubr.msk.f32.vlgmr.msra.gmra.mrb[106].mxu1 %vm272_vm2, %v8250_v9  ;;  %v11199_v19 = vpack.c.bf16 %v8959_v17, %v8958_v16  ;;  %v9048_v9 = vld [vmem:[%s12875_s1 + $0x898] sm:$0xff]  ;;  %v9518_v16 = vld [vmem:[%s12875_s1 + $0x8e0] ss:$0 sm:$0xff] }
0x35f3   :  { %10739 = vmatpush3.msra.mxu1 %v8418_v21  ;;  %10740 = vmatprep.mubr.msk.f32.mxu1 %vm11380_vm1, %v11379_v14  ;;  %v9050_v21 = vld [vmem:[%s12875_s1 + $0x8a8] sm:$0xff]  ;;  %v11203_v22 = vpack.c.bf16 %v9049_v20, %v9048_v9 }
0x35f4   :  { %10734 = vmatpush3.msra.mxu0 %v8413_v23  ;;  %v9051_v23 = vld [vmem:[%s12875_s1 + $0x8b0] sm:$0xff]  ;;  %v9519_v9 = vld [vmem:[%s12875_s1 + $0x8e8] ss:$0 sm:$0xff] }
0x35f5   :  { %11188 = vmatprep.subr.bf16.mxu0 %v11187_v46 }
0x36c1   :  { %v8493_v26 = vpop.f32.mrb[104].mxu1 }
0x36c2   :  { %v8573_v12 = vmul.f32 0.25, %v8493_v26  ;;  %v10727_v5 = vpop.f32.mrb[105].mxu1  ;;  %v11207_v26 = vpack.c.bf16 %v9051_v23, %v9050_v21 }
0x36c3   :  { %v9053_v5 = vld [vmem:[%s12875_s1 + $0x8c0] sm:$0xff] }
0x36c4   :  { %v8575_v27 = vsel %vm427_vm3, %v8573_v12, -inf }
0x36c5   :  { %8576 = vmax.xlane.f32.xlu0 %v8575_v27  ;;  %v8569_v28 = vpop.f32.mrb[106].mxu1 }
0x36c6   :  { %v8574_v29 = vmul.f32 0.25, %v8569_v28  ;;  %v10732_v30 = vpop.f32.mrb[107].mxu1 }
0x36c8   :  { %v8578_v31 = vsel %vm427_vm3, %v8574_v29, -inf }
0x36c9   :  { %8579 = vmax.xlane.f32.xlu1 %v8578_v31 }
0x3752   :  { %v8577_v32 = vpop.xlane.xlu0 %8576 }
0x3753   :  { %v8581_v35 = vsub.f32 %v8573_v12, %v8577_v32  ;;  %v9052_v12 = vld [vmem:[%s12875_s1 + $0x8b8] sm:$0xff] }
0x3754   :  { %v11211_v27 = vpack.c.bf16 %v9053_v5, %v9052_v12 }
0x3755   :  { %v8583_v36 = vmul.f32 1.442695, %v8581_v35 }
0x3756   :  { %v8580_v37 = vpop.xlane.xlu1 %8579 }
0x3757   :  { %11357 = vpow2.f32 %v8583_v36  ;;  %v8582_v39 = vsub.f32 %v8574_v29, %v8580_v37  ;;  %v9510_v37 = vld [vmem:[%s12875_s1 + $0x860] ss:$0 sm:$0xff] }
0x3759   :  { %v8585_v14 = vmul.f32 1.442695, %v8582_v39 }
0x375b   :  { %11359 = vpow2.f32 %v8585_v14 }
0x3761   :  { %v11358_v25 = vpop.eup %11357 }
0x3762   :  { %v8587_v24 = vsel %vm427_vm3, %v11358_v25, 0.0 }
0x3763   :  { %8588 = vadd.xlane.f32.xlu0 %v8587_v24  ;;  %v9511_v24 = vld [vmem:[%s12875_s1 + $0x868] ss:$0 sm:$0xff] }
0x3765   :  { %v11360_v40 = vpop.eup %11359 }
0x3766   :  { %v8590_v8 = vsel %vm427_vm3, %v11360_v40, 0.0 }
0x3767   :  { %8591 = vadd.xlane.f32.xlu1 %v8590_v8 }
0x37f0   :  { %v8589_v7 = vpop.xlane.xlu0 %8588 }
0x37f1   :  { %11361 = vrcp.f32 %v8589_v7 }
0x37f4   :  { %v8592_v42 = vpop.xlane.xlu1 %8591 }
0x37f5   :  { %11363 = vrcp.f32 %v8592_v42 }
0x37fb   :  { %v11362_v44 = vpop.eup %11361 }
0x37fc   :  { %v8595_v33 = vmul.f32 %v11362_v44, %v11358_v25  ;;  %v9054_v44 = vld [vmem:[%s12875_s1 + $0x8c8] sm:$0xff] }
0x37fe   :  { %10736 = vmatmul.mubr.msk.f32.vlgmr.msra.gmra.mrb[78].mxu0 %vm427_vm3, %v8595_v33  ;;  %v9055_v33 = vld [vmem:[%s12875_s1 + $0x8d0] sm:$0xff] }
0x37ff   :  { %v11364_v45 = vpop.eup %11363  ;;  %11190 = vmatpush3.bf16.msra.mxu0 %v11187_v46 }
0x3800   :  { %v8596_v56 = vmul.f32 %v11364_v45, %v11360_v40  ;;  %11192 = vmatprep.subr.bf16.mxu0 %v11191_v48  ;;  %v11215_v45 = vpack.c.bf16 %v9055_v33, %v9054_v44  ;;  %v9520_v44 = vld [vmem:[%s12875_s1 + $0x900] ss:$0 sm:$0xff] }
0x3802   :  { %10741 = vmatmul.mubr.msk.f32.vlgmr.msra.gmra.mrb[108].mxu1 %vm427_vm3, %v8596_v56  ;;  %v9512_v56 = vld [vmem:[%s12875_s1 + $0x890] ss:$0 sm:$0xff] }
0x38d1   :  { %v8666_v49 = vpop.f32.mrb[78].mxu0 }
0x38d2   :  { %v10737_v41 = vpop.f32.mrb[79].mxu0  ;;  %10747 = vmatprep.mubr.msk.f32.mxu0 %vm272_vm2, %v8666_v49  ;;  %v9515_v49 = vld [vmem:[%s12875_s1 + $0x8d8] ss:$0 sm:$0xff] }
0x38d5   :  { %v8739_v58 = vpop.f32.mrb[108].mxu1 }
0x38d6   :  { %v10742_v50 = vpop.f32.mrb[109].mxu1  ;;  %10748 = vmatmul.mubr.msk.f32.vlgmr.msra.gmra.mrb[80].mxu0 %vm272_vm2, %v8739_v58 }
0x38d7   :  { %11194 = vmatpush3.bf16.msra.mxu0 %v11191_v48  ;;  %10754 = vmatprep.mubr.msk.f32.mxu0 %vm272_vm2, %v12738_v63 }
0x38d8   :  { %11204 = vmatprep.subr.bf16.mxu0 %v11203_v22 }
0x38de   :  { %10755 = vmatmul.mubr.msk.f32.vlgmr.msra.gmra.mrb[80].mxu0 %vm272_vm2, %v12736_v54 }
0x38df   :  { %11206 = vmatpush3.bf16.msra.mxu0 %v11203_v22 }
0x38e0   :  { %11208 = vmatprep.subr.bf16.mxu0 %v11207_v26 }
0x38e3   :  { %11210 = vmatpush3.bf16.msra.mxu0 %v11207_v26 }
0x38e4   :  { %11212 = vmatprep.subr.bf16.mxu0 %v11211_v27 }
0x38e7   :  { %11214 = vmatpush3.bf16.msra.mxu0 %v11211_v27 }
0x38e8   :  { %11216 = vmatprep.subr.bf16.mxu0 %v11215_v45 }
0x38eb   :  { %11218 = vmatpush3.bf16.msra.mxu0 %v11215_v45 }
0x39b1   :  { %v10756_v52 = vpop.f32.mrb[80].mxu0 }
0x39b2   :  { %v8913_v53 = vadd.f32 %v10756_v52, %v9509_v51  ;;  %v8898_v57 = vpop.f32.mrb[81].mxu0 }
0x39b3   :  { %v8912_v59 = vadd.f32 %v9509_v51, %v8898_v57 }
0x39b4   :  { %v8915_v60 = vadd.f32 %v8913_v53, %v12649_v6 }
0x39b5   :  { %v8914_v61 = vadd.f32 %v8912_v59, %v12647_v4  ;;  %v8956_v4 = vld [vmem:[%s12875_s1 + $0x870] sm:$0xff] }
0x39b6   :  { %v8921_v62 = vsel %vm22_vm0, %v8915_v60, 0.0  ;;  %v11195_v15 = vpack.c.bf16 %v8957_v13, %v8956_v4 }
0x39b7   :  { %8922 = vadd.xlane.f32.xlu1 %v8921_v62  ;;  %v8918_v55 = vsel %vm22_vm0, %v8914_v61, 0.0 }
0x39b8   :  { %8919 = vadd.xlane.f32.xlu0 %v8918_v55  ;;  %11196 = vmatprep.subr.bf16.mxu1 %v11195_v15 }
0x39b9   :  { %11198 = vmatpush3.bf16.msra.mxu1 %v11195_v15 }
0x39ba   :  { %11200 = vmatprep.subr.bf16.mxu1 %v11199_v19 }
0x39bd   :  { %11202 = vmatpush3.bf16.msra.mxu1 %v11199_v19 }
0x3a44   :  { %v8923_v63 = vpop.xlane.xlu1 %8922 }
0x3a45   :  { %v8925_v54 = vmul.f32 0.03125, %v8923_v63  ;;  %v8920_v0 = vpop.xlane.xlu0 %8919 }
0x3a46   :  { %v8924_v1 = vmul.f32 0.03125, %v8920_v0 }
0x3a47   :  { %v8927_v18 = vsub.f32 %v8915_v60, %v8925_v54 }
0x3a48   :  { %v8926_v2 = vsub.f32 %v8914_v61, %v8924_v1 }
0x3a49   :  { %v8929_v3 = vmul.f32 %v8927_v18, %v8927_v18 }
0x3a4a   :  { %v8928_v10 = vmul.f32 %v8926_v2, %v8926_v2 }
0x3a4b   :  { %v8933_v11 = vsel %vm22_vm0, %v8929_v3, 0.0 }
0x3a4c   :  { %8934 = vadd.xlane.f32.xlu1 %v8933_v11  ;;  %v8930_v6 = vsel %vm22_vm0, %v8928_v10, 0.0 }
0x3a4d   :  { %8931 = vadd.xlane.f32.xlu0 %v8930_v6 }
0x3ad9   :  { %v8935_v28 = vpop.xlane.xlu1 %8934 }
0x3ada   :  { %v8937_v29 = vmul.f32 0.03125, %v8935_v28  ;;  %v8932_v30 = vpop.xlane.xlu0 %8931 }
0x3adb   :  { %v8936_v31 = vmul.f32 0.03125, %v8932_v30 }
0x3adc   :  { %v8939_v32 = vadd.f32 1e-05, %v8937_v29 }
0x3add   :  { %v8938_v35 = vadd.f32 1e-05, %v8936_v31 }
0x3ade   :  { %11365 = vrsqrt.f32 %v8939_v32 }
0x3adf   :  { %11367 = vrsqrt.f32 %v8938_v35 }
0x3ae8   :  { %v11366_v36 = vpop.eup %11365 }
0x3ae9   :  { %v11368_v39 = vpop.eup %11367  ;;  %v8943_v14 = vmul.f32 %v11366_v36, %v8927_v18 }
0x3aea   :  { %v8942_v25 = vmul.f32 %v11368_v39, %v8926_v2 }
0x3aeb   :  { %v8949_v40 = vmul.f32 %v9510_v37, %v8943_v14 }
0x3aec   :  { %v8948_v8 = vmul.f32 %v9510_v37, %v8942_v25 }
0x3aed   :  { %v8955_v42 = vadd.f32 %v9511_v24, %v8949_v40 }
0x3aee   :  { %v8954_v7 = vadd.f32 %v9511_v24, %v8948_v8 }
0x3af0   :  { %10765 = vmatprep.mubr.msk.f32.mxu1 %vm22_vm0, %v8954_v7 }
0x3af1   :  { %10766 = vmatmul.mubr.msk.f32.vlgmr.msra.gmra.mrb[110].mxu1 %vm22_vm0, %v8955_v42 }
0x3bc4   :  { %v10767_v43 = vpop.f32.mrb[110].mxu1 }
0x3bc5   :  { %v9043_v38 = vadd.f32 %v10767_v43, %v9512_v56  ;;  %v9037_v46 = vpop.f32.mrb[111].mxu1 }
0x3bc6   :  { %v9038_v34 = vadd.f32 %v9512_v56, %v9037_v46  ;;  %v9521_v56 = vld [vmem:[%s12875_s1 + $0x908] ss:$0 sm:$0xff]  ;;  %v9224_v46 = vld [vmem:[%s12875_s1 + $0x910] sm:$0xff] }
0x3bc7   :  { %v9047_v48 = vmax.f32 %v9043_v38, 0.0 }
0x3bc8   :  { %v9046_v47 = vmax.f32 %v9038_v34, 0.0 }
0x3bca   :  { %10784 = vmatprep.mubr.msk.f32.mxu0 %vm1491_vm4, %v9046_v47 }
0x3bcb   :  { %10785 = vmatmul.mubr.msk.f32.vlgmr.msra.gmra.mrb[82].mxu0 %vm1491_vm4, %v9047_v48 }
0x3c9e   :  { %v10786_v41 = vpop.f32.mrb[82].mxu0 }
0x3c9f   :  { %v9139_v58 = vadd.f32 %v10786_v41, %v9515_v49  ;;  %v9133_v50 = vpop.f32.mrb[83].mxu0 }
0x3ca0   :  { %v9134_v51 = vadd.f32 %v9515_v49, %v9133_v50 }
0x3ca1   :  { %v9143_v52 = vadd.f32 %v9139_v58, %v8955_v42 }
0x3ca2   :  { %v9142_v53 = vadd.f32 %v9134_v51, %v8954_v7  ;;  %v9235_v51 = vlaneseq }
0x3ca3   :  { %v9149_v57 = vsel %vm22_vm0, %v9143_v52, 0.0 }
0x3ca4   :  { %9150 = vadd.xlane.f32.xlu1 %v9149_v57  ;;  %v9146_v59 = vsel %vm22_vm0, %v9142_v53, 0.0 }
0x3ca5   :  { %9147 = vadd.xlane.f32.xlu0 %v9146_v59 }
0x3d31   :  { %v9151_v60 = vpop.xlane.xlu1 %9150 }
0x3d32   :  { %v9153_v61 = vmul.f32 0.03125, %v9151_v60  ;;  %v9148_v62 = vpop.xlane.xlu0 %9147 }
0x3d33   :  { %v9152_v55 = vmul.f32 0.03125, %v9148_v62 }
0x3d34   :  { %v9155_v63 = vsub.f32 %v9143_v52, %v9153_v61  ;;  %v9236_v52 = vand.u32 127, %v9235_v51 }
0x3d35   :  { %v9154_v54 = vsub.f32 %v9142_v53, %v9152_v55  ;;  %v9238_v53 = vshrl.u32 %v9235_v51, 7 }
0x3d36   :  { %v9157_v0 = vmul.f32 %v9155_v63, %v9155_v63 }
0x3d37   :  { %v9156_v1 = vmul.f32 %v9154_v54, %v9154_v54  ;;  %v9239_v57 = vsub.s32 %v9236_v52, %v9238_v53 }
0x3d38   :  { %v9161_v18 = vsel %vm22_vm0, %v9157_v0, 0.0 }
0x3d39   :  { %9162 = vadd.xlane.f32.xlu1 %v9161_v18  ;;  %v9158_v2 = vsel %vm22_vm0, %v9156_v1, 0.0 }
0x3d3a   :  { %9159 = vadd.xlane.f32.xlu0 %v9158_v2 }
0x3dc6   :  { %v9163_v3 = vpop.xlane.xlu1 %9162 }
0x3dc7   :  { %v9165_v10 = vmul.f32 0.03125, %v9163_v3  ;;  %v9160_v11 = vpop.xlane.xlu0 %9159 }
0x3dc8   :  { %v9164_v6 = vmul.f32 0.03125, %v9160_v11 }
0x3dc9   :  { %v9167_v4 = vadd.f32 1e-05, %v9165_v10 }
0x3dca   :  { %v9166_v13 = vadd.f32 1e-05, %v9164_v6 }
0x3dcb   :  { %11369 = vrsqrt.f32 %v9167_v4 }
0x3dcc   :  { %11371 = vrsqrt.f32 %v9166_v13 }
0x3dd5   :  { %v11370_v15 = vpop.eup %11369 }
0x3dd6   :  { %v11372_v17 = vpop.eup %11371  ;;  %v9171_v19 = vmul.f32 %v11370_v15, %v9155_v63 }
0x3dd7   :  { %v9170_v20 = vmul.f32 %v11372_v17, %v9154_v54  ;;  %v9522_v54 = vld [vmem:[%s12875_s1 + $0x918] ss:$0 sm:$0xff] }
0x3dd8   :  { %v9177_v21 = vmul.f32 %v9518_v16, %v9171_v19 }
0x3dd9   :  { %v9176_v22 = vmul.f32 %v9518_v16, %v9170_v20 }
0x3dda   :  { %v9183_v23 = vadd.f32 %v9519_v9, %v9177_v21 }
0x3ddb   :  { %v9182_v26 = vadd.f32 %v9519_v9, %v9176_v22 }
0x3ddc   :  { %v9189_v12 = vsel %vm22_vm0, %v9183_v23, 0.0 }
0x3ddd   :  { %9190 = vadd.xlane.f32.xlu1 %v9189_v12  ;;  %v9186_v5 = vsel %vm22_vm0, %v9182_v26, 0.0 }
0x3dde   :  { %9187 = vadd.xlane.f32.xlu0 %v9186_v5 }
0x3e6a   :  { %v9191_v27 = vpop.xlane.xlu1 %9190 }
0x3e6b   :  { %v9193_v28 = vmul.f32 0.03125, %v9191_v27  ;;  %v9188_v29 = vpop.xlane.xlu0 %9187 }
0x3e6c   :  { %v9192_v30 = vmul.f32 0.03125, %v9188_v29 }
0x3e6d   :  { %v9195_v31 = vsub.f32 %v9183_v23, %v9193_v28 }
0x3e6e   :  { %v9194_v32 = vsub.f32 %v9182_v26, %v9192_v30 }
0x3e6f   :  { %v9197_v35 = vmul.f32 %v9195_v31, %v9195_v31 }
0x3e70   :  { %v9196_v36 = vmul.f32 %v9194_v32, %v9194_v32 }
0x3e71   :  { %v9201_v37 = vsel %vm22_vm0, %v9197_v35, 0.0 }
0x3e72   :  { %9202 = vadd.xlane.f32.xlu1 %v9201_v37  ;;  %v9198_v39 = vsel %vm22_vm0, %v9196_v36, 0.0 }
0x3e73   :  { %9199 = vadd.xlane.f32.xlu0 %v9198_v39 }
0x3eff   :  { %v9203_v14 = vpop.xlane.xlu1 %9202 }
0x3f00   :  { %v9205_v25 = vmul.f32 0.03125, %v9203_v14  ;;  %v9200_v24 = vpop.xlane.xlu0 %9199 }
0x3f01   :  { %v9204_v40 = vmul.f32 0.03125, %v9200_v24 }
0x3f02   :  { %v9207_v8 = vadd.f32 1e-05, %v9205_v25 }
0x3f03   :  { %v9206_v7 = vadd.f32 1e-05, %v9204_v40 }
0x3f04   :  { %11373 = vrsqrt.f32 %v9207_v8 }
0x3f05   :  { %11375 = vrsqrt.f32 %v9206_v7 }
0x3f0e   :  { %v11374_v42 = vpop.eup %11373 }
0x3f0f   :  { %v11376_v33 = vpop.eup %11375  ;;  %v9211_v45 = vmul.f32 %v11374_v42, %v9195_v31 }
0x3f10   :  { %v9210_v43 = vmul.f32 %v11376_v33, %v9194_v32 }
0x3f11   :  { %v9217_v38 = vmul.f32 %v9520_v44, %v9211_v45 }
0x3f12   :  { %v9216_v34 = vmul.f32 %v9520_v44, %v9210_v43 }
0x3f13   :  { %v9223_v47 = vadd.f32 %v9521_v56, %v9217_v38 }
0x3f14   :  { %v9222_v48 = vadd.f32 %v9521_v56, %v9216_v34 }
0x3f15   :  { %v9226_v49 = vmul.f32 %v9224_v46, %v9223_v47 }
0x3f16   :  { %v9225_v41 = vmul.f32 %v9224_v46, %v9222_v48 }
0x3f17   :  { %v9230_v58 = vsel %vm22_vm0, %v9226_v49, 0.0 }
0x3f18   :  { %9231 = vadd.xlane.f32.xlu1 %v9230_v58  ;;  %v9227_v50 = vsel %vm22_vm0, %v9225_v41, 0.0 }
0x3f19   :  { %9228 = vadd.xlane.f32.xlu0 %v9227_v50 }
0x3fa5   :  { %v9232_v59 = vpop.xlane.xlu1 %9231 }
0x3fa6   :  { %v9244_v60 = vrot.slane %v9232_v59, %v9239_v57  ;;  %v9229_v61 = vpop.xlane.xlu0 %9228 }
0x3fa7   :  { %v9240_v62 = vrot.slane %v9229_v61, %v9239_v57 }
0x3fa9   :  { %v9246_v55 = vsel %vm9245_vm5, %v9244_v60, %v9240_v62 }
0x3faa   :  { %v9249_v63 = vsel %vm9248_vm6, %v9246_v55, 0.0 }
0x3fab   :  { %9250 = vadd.xlane.f32.xlu0 %v9249_v63 }
0x4038   :  { %v9251_v0 = vpop.xlane.xlu0 %9250 }
0x4039   :  { %v9257_v1 = vadd.f32 %v9522_v54, %v9251_v0 }
0x403b   :  { %9259 = vst.msk [vmem:[%s12877_s2] sm:$0x3] %vm9258_vm7, %v9257_v1 }

</bundles_post_ra>
